<compile_context>
chip_gen: v5e
topology: v5e:2x2
jax: 0.10.0
libtpu: 0.0.40
codegen_flags: <defaults>
</compile_context>

<pallas_src>
import functools

import jax
import jax.numpy as jnp
from jax import lax
from jax.experimental import pallas as pl
from jax.experimental.pallas import tpu as pltpu

SUBLANE = 8
LANE = 128


# --------------------------- fused forward kernel ----------------------------

def _build_fused_kernel(seq, bp, n_layers, hp, op):
    """Builds the fused kernel for a fixed (seq, padded-batch, #layers, pads)."""

    def kernel(*refs):
        # Unpack: [x] + n_layers*[wih_t, whh_t, b_ih, b_hh] + [wreg_t, breg] + out + scratch
        x_ref = refs[0]
        idx = 1
        layer_refs = []
        for _ in range(n_layers):
            layer_refs.append(refs[idx:idx + 4])
            idx += 4
        wreg_ref = refs[idx]
        breg_ref = refs[idx + 1]
        out_ref = refs[idx + 2]
        gi_ref = refs[idx + 3]      # VMEM scratch (seq*bp, 3*hp): hoisted x@W_ih + b_ih
        hseq_ref = refs[idx + 4]    # VMEM scratch (seq*bp, hp):   per-layer hidden sequence

        def recurrence(whh_ref, bhh_ref):
            bhh = bhh_ref[...]
            h = jnp.zeros((bp, hp), dtype=jnp.float32)
            # seq is small & static -> fully unrolled serial recurrence.
            for t in range(seq):
                gi = gi_ref[pl.ds(t * bp, bp), :]
                gh = jnp.dot(h, whh_ref[...],
                             preferred_element_type=jnp.float32) + bhh
                # Gate order matches PyTorch: r, z, n; each gate padded to `hp` lanes
                # so these slices fall on 128-lane vreg boundaries.
                r = jax.nn.sigmoid(gi[:, 0:hp] + gh[:, 0:hp])
                z = jax.nn.sigmoid(gi[:, hp:2 * hp] + gh[:, hp:2 * hp])
                n = jnp.tanh(gi[:, 2 * hp:3 * hp] + r * gh[:, 2 * hp:3 * hp])
                h = (1.0 - z) * n + z * h
                hseq_ref[pl.ds(t * bp, bp), :] = h

        layer_in = x_ref
        for (wih_ref, whh_ref, bih_ref, bhh_ref) in layer_refs:
            # Hoisted input-to-hidden matmul for the whole sequence (off the serial path).
            gi_ref[...] = (jnp.dot(layer_in[...], wih_ref[...],
                                   preferred_element_type=jnp.float32)
                           + bih_ref[...])
            recurrence(whh_ref, bhh_ref)
            layer_in = hseq_ref

        # Final Linear over the whole (seq*bp, hp) slab; lane-dense padded output.
        out_ref[...] = (jnp.dot(hseq_ref[...], wreg_ref[...],
                                preferred_element_type=jnp.float32)
                        + breg_ref[...])

    return kernel


def reg_gru_forward(prepped, x):
    """Fused forward pass. x: (seq, batch, inp_dim) -> (seq, batch, out_dim)."""
    seq, batch, inp_dim = x.shape
    bp = ((batch + SUBLANE - 1) // SUBLANE) * SUBLANE
    n_layers = len(prepped["layers"])
    hp = prepped["hp"]
    op = prepped["op"]
    out_dim = prepped["out_dim"]

    # Pad batch to full sublanes; flatten to a lane-/sublane-friendly 2D slab.
    xp = jnp.zeros((seq, bp, inp_dim), jnp.float32).at[:, :batch, :].set(x)
    x2d = xp.reshape(seq * bp, inp_dim)

    args = [x2d]
    for lp in prepped["layers"]:
        args += [lp["wih_t"], lp["whh_t"], lp["b_ih"], lp["b_hh"]]
    args += [prepped["reg_w_t"], prepped["reg_b"]]

    vmem = pl.BlockSpec(memory_space=pltpu.MemorySpace.VMEM)
    out = pl.pallas_call(
        _build_fused_kernel(seq, bp, n_layers, hp, op),
        out_shape=jax.ShapeDtypeStruct((seq * bp, op), jnp.float32),
        in_specs=[vmem] * len(args),
        out_specs=vmem,
        scratch_shapes=[pltpu.VMEM((seq * bp, 3 * hp), jnp.float32),
                        pltpu.VMEM((seq * bp, hp), jnp.float32)],
    )(*args)
    # TODO(synk): for much larger seq/batch/mod_dim (esp. on v7x with 64 MiB VMEM),
    # switch to a gridded design with seq-chunking + batch-parallel axis.
    return out.reshape(seq, bp, op)[:, :batch, :out_dim]


# ----------------------- parameter init & kernel-layout prep ------------------

def init_reg_gru_params(key, inp_dim, out_dim, mod_dim, mid_layers):
    """PyTorch-layout params with uniform(-1/sqrt(H), 1/sqrt(H)) init."""
    params = {"layers": []}
    stdv = 1.0 / jnp.sqrt(jnp.float32(mod_dim))
    for layer in range(mid_layers):
        in_dim = inp_dim if layer == 0 else mod_dim
        key, k1, k2, k3, k4 = jax.random.split(key, 5)
        params["layers"].append({
            "w_ih": jax.random.uniform(k1, (3 * mod_dim, in_dim), jnp.float32, -stdv, stdv),
            "w_hh": jax.random.uniform(k2, (3 * mod_dim, mod_dim), jnp.float32, -stdv, stdv),
            "b_ih": jax.random.uniform(k3, (3 * mod_dim,), jnp.float32, -stdv, stdv),
            "b_hh": jax.random.uniform(k4, (3 * mod_dim,), jnp.float32, -stdv, stdv),
        })
    key, k1, k2 = jax.random.split(key, 3)
    lin_std = 1.0 / jnp.sqrt(jnp.float32(mod_dim))
    params["reg_w"] = jax.random.uniform(k1, (out_dim, mod_dim), jnp.float32, -lin_std, lin_std)
    params["reg_b"] = jax.random.uniform(k2, (out_dim,), jnp.float32, -lin_std, lin_std)
    return params


def _pad_gate_cols(w_t, hid, hp):
    """(rows, 3*hid) -> (rows, 3*hp): each gate block zero-padded to hp lanes."""
    rows = w_t.shape[0]
    out = jnp.zeros((rows, 3 * hp), w_t.dtype)
    for g in range(3):
        out = out.at[:, g * hp:g * hp + hid].set(w_t[:, g * hid:(g + 1) * hid])
    return out


def _pad_rows(w, rows_pad):
    out = jnp.zeros((rows_pad, w.shape[1]), w.dtype)
    return out.at[:w.shape[0], :].set(w)


def prepare_params(params):
    """One-time transpose + zero-pad to the lane-aligned layout the kernel consumes."""
    hid = params["layers"][0]["w_hh"].shape[1]
    out_dim = params["reg_w"].shape[0]
    hp = ((hid + LANE - 1) // LANE) * LANE
    op = ((out_dim + LANE - 1) // LANE) * LANE

    prepped = {"layers": [], "hid": hid, "out_dim": out_dim, "hp": hp, "op": op}
    for li, lp in enumerate(params["layers"]):
        wih_t = _pad_gate_cols(lp["w_ih"].T, hid, hp)          # (in_dim, 3*hp)
        if li > 0:
            wih_t = _pad_rows(wih_t, hp)                        # layer input is padded h
        whh_t = _pad_rows(_pad_gate_cols(lp["w_hh"].T, hid, hp), hp)   # (hp, 3*hp)
        b_ih = _pad_gate_cols(lp["b_ih"].reshape(1, -1), hid, hp)      # (1, 3*hp)
        b_hh = _pad_gate_cols(lp["b_hh"].reshape(1, -1), hid, hp)      # (1, 3*hp)
        prepped["layers"].append(
            {"wih_t": wih_t, "whh_t": whh_t, "b_ih": b_ih, "b_hh": b_hh})

    wreg_t = _pad_rows(params["reg_w"].T, hp)                   # (hp, out_dim)
    wreg_t = jnp.zeros((hp, op), jnp.float32).at[:, :out_dim].set(wreg_t)
    breg = jnp.zeros((1, op), jnp.float32).at[0, :out_dim].set(params["reg_b"])
    prepped["reg_w_t"] = wreg_t
    prepped["reg_b"] = breg
    return prepped


# ------------------------------ pure-JAX reference ----------------------------

def _ref_gru_layer(x, w_ih, w_hh, b_ih, b_hh):
    batch = x.shape[1]
    hid = w_hh.shape[1]

    def step(h, x_t):
        gi = x_t @ w_ih.T + b_ih
        gh = h @ w_hh.T + b_hh
        i_r, i_z, i_n = jnp.split(gi, 3, axis=-1)
        h_r, h_z, h_n = jnp.split(gh, 3, axis=-1)
        r = jax.nn.sigmoid(i_r + h_r)
        z = jax.nn.sigmoid(i_z + h_z)
        n = jnp.tanh(i_n + r * h_n)
        h_new = (1.0 - z) * n + z * h
        return h_new, h_new

    _, ys = lax.scan(step, jnp.zeros((batch, hid), jnp.float32), x)
    return ys


def _ref_forward(params, x):
    h_seq = x
    for lp in params["layers"]:
        h_seq = _ref_gru_layer(h_seq, lp["w_ih"], lp["w_hh"], lp["b_ih"], lp["b_hh"])
    seq, batch, hid = h_seq.shape
    y = h_seq.reshape(seq * batch, hid) @ params["reg_w"].T + params["reg_b"]
    return y.reshape(seq, batch, -1)


# ----------------------------------- main --------------------------------------

if __name__ == "__main__":
    inp_dim, out_dim, mod_dim, mid_layers = 4, 2, 32, 2
    seq_len, batch = 8, 2

    key = jax.random.PRNGKey(0)
    key, kx = jax.random.split(key)
    x = jax.random.normal(kx, (seq_len, batch, inp_dim), dtype=jnp.float32)

    params = init_reg_gru_params(key, inp_dim, out_dim, mod_dim, mid_layers)
    prepped = prepare_params(params)   # one-time transpose / pad to kernel layout

    fwd = jax.jit(functools.partial(reg_gru_forward, prepped))
    y = jax.block_until_ready(fwd(x))

    y_ref = jax.block_until_ready(_ref_forward(params, x))
    assert y.shape == (seq_len, batch, out_dim)
    assert jnp.allclose(y, y_ref, atol=1e-4, rtol=1e-4), "mismatch vs pure-JAX reference"

    print("KERNEL_OK")
</pallas_src>

<mosaic_0001>
module attributes {stable_mosaic.version = 11 : i64} {
  func.func @kernel(%arg0: memref<64x4xf32, #tpu.memory_space<vmem>>, %arg1: memref<4x384xf32, #tpu.memory_space<vmem>>, %arg2: memref<128x384xf32, #tpu.memory_space<vmem>>, %arg3: memref<1x384xf32, #tpu.memory_space<vmem>>, %arg4: memref<1x384xf32, #tpu.memory_space<vmem>>, %arg5: memref<128x384xf32, #tpu.memory_space<vmem>>, %arg6: memref<128x384xf32, #tpu.memory_space<vmem>>, %arg7: memref<1x384xf32, #tpu.memory_space<vmem>>, %arg8: memref<1x384xf32, #tpu.memory_space<vmem>>, %arg9: memref<128x128xf32, #tpu.memory_space<vmem>>, %arg10: memref<1x128xf32, #tpu.memory_space<vmem>>, %arg11: memref<64x128xf32, #tpu.memory_space<vmem>>, %arg12: memref<64x384xf32, #tpu.memory_space<vmem>>, %arg13: memref<64x128xf32, #tpu.memory_space<vmem>>) attributes {dimension_semantics = [], scalar_prefetch = 0 : i64, scratch_operands = 2 : i64, tpu.core_type = #tpu.core_type<tc>} {
    %c0 = arith.constant 0 : index
    %c0_0 = arith.constant 0 : index
    %0 = vector.load %arg0[%c0, %c0_0] : memref<64x4xf32, #tpu.memory_space<vmem>>, vector<64x4xf32>
    %c0_1 = arith.constant 0 : index
    %c0_2 = arith.constant 0 : index
    %1 = vector.load %arg1[%c0_1, %c0_2] : memref<4x384xf32, #tpu.memory_space<vmem>>, vector<4x384xf32>
    %cst = arith.constant dense<0.000000e+00> : vector<64x384xf32>
    %2 = tpu.matmul %0, %1, %cst {dimension_numbers = #tpu.dot_dimension_numbers<[1], [0], [0], [1], [0, 0, 1, 1], [], []>} : vector<64x4xf32>, vector<4x384xf32>, vector<64x384xf32> -> vector<64x384xf32>
    %c0_3 = arith.constant 0 : index
    %c0_4 = arith.constant 0 : index
    %3 = vector.load %arg3[%c0_3, %c0_4] : memref<1x384xf32, #tpu.memory_space<vmem>>, vector<1x384xf32>
    %4 = vector.broadcast %3 : vector<1x384xf32> to vector<64x384xf32>
    %5 = arith.addf %2, %4 : vector<64x384xf32>
    %c0_5 = arith.constant 0 : index
    %c0_6 = arith.constant 0 : index
    %6 = vector.load %arg12[%c0_5, %c0_6] : memref<64x384xf32, #tpu.memory_space<vmem>>, vector<64x384xf32>
    tpu.vector_store %arg12[%c0_5, %c0_6], %5 {strides = array<i32>} : memref<64x384xf32, #tpu.memory_space<vmem>>, vector<64x384xf32>,
    %c0_7 = arith.constant 0 : index
    %c0_8 = arith.constant 0 : index
    %7 = vector.load %arg4[%c0_7, %c0_8] : memref<1x384xf32, #tpu.memory_space<vmem>>, vector<1x384xf32>
    %cst_9 = arith.constant 0.000000e+00 : f32
    %8 = vector.broadcast %cst_9 : f32 to vector<8x128xf32>
    %c0_10 = arith.constant 0 : index
    %c0_11 = arith.constant 0 : index
    %9 = vector.load %arg12[%c0_10, %c0_11] : memref<64x384xf32, #tpu.memory_space<vmem>>, vector<8x384xf32>
    %c0_12 = arith.constant 0 : index
    %c0_13 = arith.constant 0 : index
    %10 = vector.load %arg2[%c0_12, %c0_13] : memref<128x384xf32, #tpu.memory_space<vmem>>, vector<128x384xf32>
    %cst_14 = arith.constant dense<0.000000e+00> : vector<8x384xf32>
    %11 = tpu.matmul %8, %10, %cst_14 {dimension_numbers = #tpu.dot_dimension_numbers<[1], [0], [0], [1], [0, 0, 1, 1], [], []>} : vector<8x128xf32>, vector<128x384xf32>, vector<8x384xf32> -> vector<8x384xf32>
    %12 = vector.broadcast %7 : vector<1x384xf32> to vector<8x384xf32>
    %13 = arith.addf %11, %12 : vector<8x384xf32>
    %14 = vector.extract_strided_slice %9 {offsets = [0, 0], sizes = [8, 128], strides = [1, 1]} : vector<8x384xf32> to vector<8x128xf32>
    %15 = vector.extract_strided_slice %13 {offsets = [0, 0], sizes = [8, 128], strides = [1, 1]} : vector<8x384xf32> to vector<8x128xf32>
    %16 = arith.addf %14, %15 : vector<8x128xf32>
    %17 = arith.negf %16 : vector<8x128xf32>
    %18 = math.exp %17 : vector<8x128xf32>
    %cst_15 = arith.constant 1.000000e+00 : f32
    %19 = vector.broadcast %cst_15 : f32 to vector<8x128xf32>
    %20 = arith.addf %19, %18 : vector<8x128xf32>
    %21 = arith.divf %19, %20 : vector<8x128xf32>
    %22 = vector.extract_strided_slice %9 {offsets = [0, 128], sizes = [8, 128], strides = [1, 1]} : vector<8x384xf32> to vector<8x128xf32>
    %23 = vector.extract_strided_slice %13 {offsets = [0, 128], sizes = [8, 128], strides = [1, 1]} : vector<8x384xf32> to vector<8x128xf32>
    %24 = arith.addf %22, %23 : vector<8x128xf32>
    %25 = arith.negf %24 : vector<8x128xf32>
    %26 = math.exp %25 : vector<8x128xf32>
    %cst_16 = arith.constant 1.000000e+00 : f32
    %27 = vector.broadcast %cst_16 : f32 to vector<8x128xf32>
    %28 = arith.addf %27, %26 : vector<8x128xf32>
    %29 = arith.divf %27, %28 : vector<8x128xf32>
    %30 = vector.extract_strided_slice %9 {offsets = [0, 256], sizes = [8, 128], strides = [1, 1]} : vector<8x384xf32> to vector<8x128xf32>
    %31 = vector.extract_strided_slice %13 {offsets = [0, 256], sizes = [8, 128], strides = [1, 1]} : vector<8x384xf32> to vector<8x128xf32>
    %32 = arith.mulf %21, %31 : vector<8x128xf32>
    %33 = arith.addf %30, %32 : vector<8x128xf32>
    %34 = math.tanh %33 : vector<8x128xf32>
    %cst_17 = arith.constant 1.000000e+00 : f32
    %35 = vector.broadcast %cst_17 : f32 to vector<8x128xf32>
    %36 = arith.subf %35, %29 : vector<8x128xf32>
    %37 = arith.mulf %36, %34 : vector<8x128xf32>
    %38 = arith.mulf %29, %8 : vector<8x128xf32>
    %39 = arith.addf %37, %38 : vector<8x128xf32>
    %c0_18 = arith.constant 0 : index
    %c0_19 = arith.constant 0 : index
    %40 = vector.load %arg13[%c0_18, %c0_19] : memref<64x128xf32, #tpu.memory_space<vmem>>, vector<8x128xf32>
    tpu.vector_store %arg13[%c0_18, %c0_19], %39 {strides = array<i32>} : memref<64x128xf32, #tpu.memory_space<vmem>>, vector<8x128xf32>,
    %c8 = arith.constant 8 : index
    %c0_20 = arith.constant 0 : index
    %41 = vector.load %arg12[%c8, %c0_20] : memref<64x384xf32, #tpu.memory_space<vmem>>, vector<8x384xf32>
    %c0_21 = arith.constant 0 : index
    %c0_22 = arith.constant 0 : index
    %42 = vector.load %arg2[%c0_21, %c0_22] : memref<128x384xf32, #tpu.memory_space<vmem>>, vector<128x384xf32>
    %cst_23 = arith.constant dense<0.000000e+00> : vector<8x384xf32>
    %43 = tpu.matmul %39, %42, %cst_23 {dimension_numbers = #tpu.dot_dimension_numbers<[1], [0], [0], [1], [0, 0, 1, 1], [], []>} : vector<8x128xf32>, vector<128x384xf32>, vector<8x384xf32> -> vector<8x384xf32>
    %44 = vector.broadcast %7 : vector<1x384xf32> to vector<8x384xf32>
    %45 = arith.addf %43, %44 : vector<8x384xf32>
    %46 = vector.extract_strided_slice %41 {offsets = [0, 0], sizes = [8, 128], strides = [1, 1]} : vector<8x384xf32> to vector<8x128xf32>
    %47 = vector.extract_strided_slice %45 {offsets = [0, 0], sizes = [8, 128], strides = [1, 1]} : vector<8x384xf32> to vector<8x128xf32>
    %48 = arith.addf %46, %47 : vector<8x128xf32>
    %49 = arith.negf %48 : vector<8x128xf32>
    %50 = math.exp %49 : vector<8x128xf32>
    %cst_24 = arith.constant 1.000000e+00 : f32
    %51 = vector.broadcast %cst_24 : f32 to vector<8x128xf32>
    %52 = arith.addf %51, %50 : vector<8x128xf32>
    %53 = arith.divf %51, %52 : vector<8x128xf32>
    %54 = vector.extract_strided_slice %41 {offsets = [0, 128], sizes = [8, 128], strides = [1, 1]} : vector<8x384xf32> to vector<8x128xf32>
    %55 = vector.extract_strided_slice %45 {offsets = [0, 128], sizes = [8, 128], strides = [1, 1]} : vector<8x384xf32> to vector<8x128xf32>
    %56 = arith.addf %54, %55 : vector<8x128xf32>
    %57 = arith.negf %56 : vector<8x128xf32>
    %58 = math.exp %57 : vector<8x128xf32>
    %cst_25 = arith.constant 1.000000e+00 : f32
    %59 = vector.broadcast %cst_25 : f32 to vector<8x128xf32>
    %60 = arith.addf %59, %58 : vector<8x128xf32>
    %61 = arith.divf %59, %60 : vector<8x128xf32>
    %62 = vector.extract_strided_slice %41 {offsets = [0, 256], sizes = [8, 128], strides = [1, 1]} : vector<8x384xf32> to vector<8x128xf32>
    %63 = vector.extract_strided_slice %45 {offsets = [0, 256], sizes = [8, 128], strides = [1, 1]} : vector<8x384xf32> to vector<8x128xf32>
    %64 = arith.mulf %53, %63 : vector<8x128xf32>
    %65 = arith.addf %62, %64 : vector<8x128xf32>
    %66 = math.tanh %65 : vector<8x128xf32>
    %cst_26 = arith.constant 1.000000e+00 : f32
    %67 = vector.broadcast %cst_26 : f32 to vector<8x128xf32>
    %68 = arith.subf %67, %61 : vector<8x128xf32>
    %69 = arith.mulf %68, %66 : vector<8x128xf32>
    %70 = arith.mulf %61, %39 : vector<8x128xf32>
    %71 = arith.addf %69, %70 : vector<8x128xf32>
    %c8_27 = arith.constant 8 : index
    %c0_28 = arith.constant 0 : index
    %72 = vector.load %arg13[%c8_27, %c0_28] : memref<64x128xf32, #tpu.memory_space<vmem>>, vector<8x128xf32>
    tpu.vector_store %arg13[%c8_27, %c0_28], %71 {strides = array<i32>} : memref<64x128xf32, #tpu.memory_space<vmem>>, vector<8x128xf32>,
    %c16 = arith.constant 16 : index
    %c0_29 = arith.constant 0 : index
    %73 = vector.load %arg12[%c16, %c0_29] : memref<64x384xf32, #tpu.memory_space<vmem>>, vector<8x384xf32>
    %c0_30 = arith.constant 0 : index
    %c0_31 = arith.constant 0 : index
    %74 = vector.load %arg2[%c0_30, %c0_31] : memref<128x384xf32, #tpu.memory_space<vmem>>, vector<128x384xf32>
    %cst_32 = arith.constant dense<0.000000e+00> : vector<8x384xf32>
    %75 = tpu.matmul %71, %74, %cst_32 {dimension_numbers = #tpu.dot_dimension_numbers<[1], [0], [0], [1], [0, 0, 1, 1], [], []>} : vector<8x128xf32>, vector<128x384xf32>, vector<8x384xf32> -> vector<8x384xf32>
    %76 = vector.broadcast %7 : vector<1x384xf32> to vector<8x384xf32>
    %77 = arith.addf %75, %76 : vector<8x384xf32>
    %78 = vector.extract_strided_slice %73 {offsets = [0, 0], sizes = [8, 128], strides = [1, 1]} : vector<8x384xf32> to vector<8x128xf32>
    %79 = vector.extract_strided_slice %77 {offsets = [0, 0], sizes = [8, 128], strides = [1, 1]} : vector<8x384xf32> to vector<8x128xf32>
    %80 = arith.addf %78, %79 : vector<8x128xf32>
    %81 = arith.negf %80 : vector<8x128xf32>
    %82 = math.exp %81 : vector<8x128xf32>
    %cst_33 = arith.constant 1.000000e+00 : f32
    %83 = vector.broadcast %cst_33 : f32 to vector<8x128xf32>
    %84 = arith.addf %83, %82 : vector<8x128xf32>
    %85 = arith.divf %83, %84 : vector<8x128xf32>
    %86 = vector.extract_strided_slice %73 {offsets = [0, 128], sizes = [8, 128], strides = [1, 1]} : vector<8x384xf32> to vector<8x128xf32>
    %87 = vector.extract_strided_slice %77 {offsets = [0, 128], sizes = [8, 128], strides = [1, 1]} : vector<8x384xf32> to vector<8x128xf32>
    %88 = arith.addf %86, %87 : vector<8x128xf32>
    %89 = arith.negf %88 : vector<8x128xf32>
    %90 = math.exp %89 : vector<8x128xf32>
    %cst_34 = arith.constant 1.000000e+00 : f32
    %91 = vector.broadcast %cst_34 : f32 to vector<8x128xf32>
    %92 = arith.addf %91, %90 : vector<8x128xf32>
    %93 = arith.divf %91, %92 : vector<8x128xf32>
    %94 = vector.extract_strided_slice %73 {offsets = [0, 256], sizes = [8, 128], strides = [1, 1]} : vector<8x384xf32> to vector<8x128xf32>
    %95 = vector.extract_strided_slice %77 {offsets = [0, 256], sizes = [8, 128], strides = [1, 1]} : vector<8x384xf32> to vector<8x128xf32>
    %96 = arith.mulf %85, %95 : vector<8x128xf32>
    %97 = arith.addf %94, %96 : vector<8x128xf32>
    %98 = math.tanh %97 : vector<8x128xf32>
    %cst_35 = arith.constant 1.000000e+00 : f32
    %99 = vector.broadcast %cst_35 : f32 to vector<8x128xf32>
    %100 = arith.subf %99, %93 : vector<8x128xf32>
    %101 = arith.mulf %100, %98 : vector<8x128xf32>
    %102 = arith.mulf %93, %71 : vector<8x128xf32>
    %103 = arith.addf %101, %102 : vector<8x128xf32>
    %c16_36 = arith.constant 16 : index
    %c0_37 = arith.constant 0 : index
    %104 = vector.load %arg13[%c16_36, %c0_37] : memref<64x128xf32, #tpu.memory_space<vmem>>, vector<8x128xf32>
    tpu.vector_store %arg13[%c16_36, %c0_37], %103 {strides = array<i32>} : memref<64x128xf32, #tpu.memory_space<vmem>>, vector<8x128xf32>,
    %c24 = arith.constant 24 : index
    %c0_38 = arith.constant 0 : index
    %105 = vector.load %arg12[%c24, %c0_38] : memref<64x384xf32, #tpu.memory_space<vmem>>, vector<8x384xf32>
    %c0_39 = arith.constant 0 : index
    %c0_40 = arith.constant 0 : index
    %106 = vector.load %arg2[%c0_39, %c0_40] : memref<128x384xf32, #tpu.memory_space<vmem>>, vector<128x384xf32>
    %cst_41 = arith.constant dense<0.000000e+00> : vector<8x384xf32>
    %107 = tpu.matmul %103, %106, %cst_41 {dimension_numbers = #tpu.dot_dimension_numbers<[1], [0], [0], [1], [0, 0, 1, 1], [], []>} : vector<8x128xf32>, vector<128x384xf32>, vector<8x384xf32> -> vector<8x384xf32>
    %108 = vector.broadcast %7 : vector<1x384xf32> to vector<8x384xf32>
    %109 = arith.addf %107, %108 : vector<8x384xf32>
    %110 = vector.extract_strided_slice %105 {offsets = [0, 0], sizes = [8, 128], strides = [1, 1]} : vector<8x384xf32> to vector<8x128xf32>
    %111 = vector.extract_strided_slice %109 {offsets = [0, 0], sizes = [8, 128], strides = [1, 1]} : vector<8x384xf32> to vector<8x128xf32>
    %112 = arith.addf %110, %111 : vector<8x128xf32>
    %113 = arith.negf %112 : vector<8x128xf32>
    %114 = math.exp %113 : vector<8x128xf32>
    %cst_42 = arith.constant 1.000000e+00 : f32
    %115 = vector.broadcast %cst_42 : f32 to vector<8x128xf32>
    %116 = arith.addf %115, %114 : vector<8x128xf32>
    %117 = arith.divf %115, %116 : vector<8x128xf32>
    %118 = vector.extract_strided_slice %105 {offsets = [0, 128], sizes = [8, 128], strides = [1, 1]} : vector<8x384xf32> to vector<8x128xf32>
    %119 = vector.extract_strided_slice %109 {offsets = [0, 128], sizes = [8, 128], strides = [1, 1]} : vector<8x384xf32> to vector<8x128xf32>
    %120 = arith.addf %118, %119 : vector<8x128xf32>
    %121 = arith.negf %120 : vector<8x128xf32>
    %122 = math.exp %121 : vector<8x128xf32>
    %cst_43 = arith.constant 1.000000e+00 : f32
    %123 = vector.broadcast %cst_43 : f32 to vector<8x128xf32>
    %124 = arith.addf %123, %122 : vector<8x128xf32>
    %125 = arith.divf %123, %124 : vector<8x128xf32>
    %126 = vector.extract_strided_slice %105 {offsets = [0, 256], sizes = [8, 128], strides = [1, 1]} : vector<8x384xf32> to vector<8x128xf32>
    %127 = vector.extract_strided_slice %109 {offsets = [0, 256], sizes = [8, 128], strides = [1, 1]} : vector<8x384xf32> to vector<8x128xf32>
    %128 = arith.mulf %117, %127 : vector<8x128xf32>
    %129 = arith.addf %126, %128 : vector<8x128xf32>
    %130 = math.tanh %129 : vector<8x128xf32>
    %cst_44 = arith.constant 1.000000e+00 : f32
    %131 = vector.broadcast %cst_44 : f32 to vector<8x128xf32>
    %132 = arith.subf %131, %125 : vector<8x128xf32>
    %133 = arith.mulf %132, %130 : vector<8x128xf32>
    %134 = arith.mulf %125, %103 : vector<8x128xf32>
    %135 = arith.addf %133, %134 : vector<8x128xf32>
    %c24_45 = arith.constant 24 : index
    %c0_46 = arith.constant 0 : index
    %136 = vector.load %arg13[%c24_45, %c0_46] : memref<64x128xf32, #tpu.memory_space<vmem>>, vector<8x128xf32>
    tpu.vector_store %arg13[%c24_45, %c0_46], %135 {strides = array<i32>} : memref<64x128xf32, #tpu.memory_space<vmem>>, vector<8x128xf32>,
    %c32 = arith.constant 32 : index
    %c0_47 = arith.constant 0 : index
    %137 = vector.load %arg12[%c32, %c0_47] : memref<64x384xf32, #tpu.memory_space<vmem>>, vector<8x384xf32>
    %c0_48 = arith.constant 0 : index
    %c0_49 = arith.constant 0 : index
    %138 = vector.load %arg2[%c0_48, %c0_49] : memref<128x384xf32, #tpu.memory_space<vmem>>, vector<128x384xf32>
    %cst_50 = arith.constant dense<0.000000e+00> : vector<8x384xf32>
    %139 = tpu.matmul %135, %138, %cst_50 {dimension_numbers = #tpu.dot_dimension_numbers<[1], [0], [0], [1], [0, 0, 1, 1], [], []>} : vector<8x128xf32>, vector<128x384xf32>, vector<8x384xf32> -> vector<8x384xf32>
    %140 = vector.broadcast %7 : vector<1x384xf32> to vector<8x384xf32>
    %141 = arith.addf %139, %140 : vector<8x384xf32>
    %142 = vector.extract_strided_slice %137 {offsets = [0, 0], sizes = [8, 128], strides = [1, 1]} : vector<8x384xf32> to vector<8x128xf32>
    %143 = vector.extract_strided_slice %141 {offsets = [0, 0], sizes = [8, 128], strides = [1, 1]} : vector<8x384xf32> to vector<8x128xf32>
    %144 = arith.addf %142, %143 : vector<8x128xf32>
    %145 = arith.negf %144 : vector<8x128xf32>
    %146 = math.exp %145 : vector<8x128xf32>
    %cst_51 = arith.constant 1.000000e+00 : f32
    %147 = vector.broadcast %cst_51 : f32 to vector<8x128xf32>
    %148 = arith.addf %147, %146 : vector<8x128xf32>
    %149 = arith.divf %147, %148 : vector<8x128xf32>
    %150 = vector.extract_strided_slice %137 {offsets = [0, 128], sizes = [8, 128], strides = [1, 1]} : vector<8x384xf32> to vector<8x128xf32>
    %151 = vector.extract_strided_slice %141 {offsets = [0, 128], sizes = [8, 128], strides = [1, 1]} : vector<8x384xf32> to vector<8x128xf32>
    %152 = arith.addf %150, %151 : vector<8x128xf32>
    %153 = arith.negf %152 : vector<8x128xf32>
    %154 = math.exp %153 : vector<8x128xf32>
    %cst_52 = arith.constant 1.000000e+00 : f32
    %155 = vector.broadcast %cst_52 : f32 to vector<8x128xf32>
    %156 = arith.addf %155, %154 : vector<8x128xf32>
    %157 = arith.divf %155, %156 : vector<8x128xf32>
    %158 = vector.extract_strided_slice %137 {offsets = [0, 256], sizes = [8, 128], strides = [1, 1]} : vector<8x384xf32> to vector<8x128xf32>
    %159 = vector.extract_strided_slice %141 {offsets = [0, 256], sizes = [8, 128], strides = [1, 1]} : vector<8x384xf32> to vector<8x128xf32>
    %160 = arith.mulf %149, %159 : vector<8x128xf32>
    %161 = arith.addf %158, %160 : vector<8x128xf32>
    %162 = math.tanh %161 : vector<8x128xf32>
    %cst_53 = arith.constant 1.000000e+00 : f32
    %163 = vector.broadcast %cst_53 : f32 to vector<8x128xf32>
    %164 = arith.subf %163, %157 : vector<8x128xf32>
    %165 = arith.mulf %164, %162 : vector<8x128xf32>
    %166 = arith.mulf %157, %135 : vector<8x128xf32>
    %167 = arith.addf %165, %166 : vector<8x128xf32>
    %c32_54 = arith.constant 32 : index
    %c0_55 = arith.constant 0 : index
    %168 = vector.load %arg13[%c32_54, %c0_55] : memref<64x128xf32, #tpu.memory_space<vmem>>, vector<8x128xf32>
    tpu.vector_store %arg13[%c32_54, %c0_55], %167 {strides = array<i32>} : memref<64x128xf32, #tpu.memory_space<vmem>>, vector<8x128xf32>,
    %c40 = arith.constant 40 : index
    %c0_56 = arith.constant 0 : index
    %169 = vector.load %arg12[%c40, %c0_56] : memref<64x384xf32, #tpu.memory_space<vmem>>, vector<8x384xf32>
    %c0_57 = arith.constant 0 : index
    %c0_58 = arith.constant 0 : index
    %170 = vector.load %arg2[%c0_57, %c0_58] : memref<128x384xf32, #tpu.memory_space<vmem>>, vector<128x384xf32>
    %cst_59 = arith.constant dense<0.000000e+00> : vector<8x384xf32>
    %171 = tpu.matmul %167, %170, %cst_59 {dimension_numbers = #tpu.dot_dimension_numbers<[1], [0], [0], [1], [0, 0, 1, 1], [], []>} : vector<8x128xf32>, vector<128x384xf32>, vector<8x384xf32> -> vector<8x384xf32>
    %172 = vector.broadcast %7 : vector<1x384xf32> to vector<8x384xf32>
    %173 = arith.addf %171, %172 : vector<8x384xf32>
    %174 = vector.extract_strided_slice %169 {offsets = [0, 0], sizes = [8, 128], strides = [1, 1]} : vector<8x384xf32> to vector<8x128xf32>
    %175 = vector.extract_strided_slice %173 {offsets = [0, 0], sizes = [8, 128], strides = [1, 1]} : vector<8x384xf32> to vector<8x128xf32>
    %176 = arith.addf %174, %175 : vector<8x128xf32>
    %177 = arith.negf %176 : vector<8x128xf32>
    %178 = math.exp %177 : vector<8x128xf32>
    %cst_60 = arith.constant 1.000000e+00 : f32
    %179 = vector.broadcast %cst_60 : f32 to vector<8x128xf32>
    %180 = arith.addf %179, %178 : vector<8x128xf32>
    %181 = arith.divf %179, %180 : vector<8x128xf32>
    %182 = vector.extract_strided_slice %169 {offsets = [0, 128], sizes = [8, 128], strides = [1, 1]} : vector<8x384xf32> to vector<8x128xf32>
    %183 = vector.extract_strided_slice %173 {offsets = [0, 128], sizes = [8, 128], strides = [1, 1]} : vector<8x384xf32> to vector<8x128xf32>
    %184 = arith.addf %182, %183 : vector<8x128xf32>
    %185 = arith.negf %184 : vector<8x128xf32>
    %186 = math.exp %185 : vector<8x128xf32>
    %cst_61 = arith.constant 1.000000e+00 : f32
    %187 = vector.broadcast %cst_61 : f32 to vector<8x128xf32>
    %188 = arith.addf %187, %186 : vector<8x128xf32>
    %189 = arith.divf %187, %188 : vector<8x128xf32>
    %190 = vector.extract_strided_slice %169 {offsets = [0, 256], sizes = [8, 128], strides = [1, 1]} : vector<8x384xf32> to vector<8x128xf32>
    %191 = vector.extract_strided_slice %173 {offsets = [0, 256], sizes = [8, 128], strides = [1, 1]} : vector<8x384xf32> to vector<8x128xf32>
    %192 = arith.mulf %181, %191 : vector<8x128xf32>
    %193 = arith.addf %190, %192 : vector<8x128xf32>
    %194 = math.tanh %193 : vector<8x128xf32>
    %cst_62 = arith.constant 1.000000e+00 : f32
    %195 = vector.broadcast %cst_62 : f32 to vector<8x128xf32>
    %196 = arith.subf %195, %189 : vector<8x128xf32>
    %197 = arith.mulf %196, %194 : vector<8x128xf32>
    %198 = arith.mulf %189, %167 : vector<8x128xf32>
    %199 = arith.addf %197, %198 : vector<8x128xf32>
    %c40_63 = arith.constant 40 : index
    %c0_64 = arith.constant 0 : index
    %200 = vector.load %arg13[%c40_63, %c0_64] : memref<64x128xf32, #tpu.memory_space<vmem>>, vector<8x128xf32>
    tpu.vector_store %arg13[%c40_63, %c0_64], %199 {strides = array<i32>} : memref<64x128xf32, #tpu.memory_space<vmem>>, vector<8x128xf32>,
    %c48 = arith.constant 48 : index
    %c0_65 = arith.constant 0 : index
    %201 = vector.load %arg12[%c48, %c0_65] : memref<64x384xf32, #tpu.memory_space<vmem>>, vector<8x384xf32>
    %c0_66 = arith.constant 0 : index
    %c0_67 = arith.constant 0 : index
    %202 = vector.load %arg2[%c0_66, %c0_67] : memref<128x384xf32, #tpu.memory_space<vmem>>, vector<128x384xf32>
    %cst_68 = arith.constant dense<0.000000e+00> : vector<8x384xf32>
    %203 = tpu.matmul %199, %202, %cst_68 {dimension_numbers = #tpu.dot_dimension_numbers<[1], [0], [0], [1], [0, 0, 1, 1], [], []>} : vector<8x128xf32>, vector<128x384xf32>, vector<8x384xf32> -> vector<8x384xf32>
    %204 = vector.broadcast %7 : vector<1x384xf32> to vector<8x384xf32>
    %205 = arith.addf %203, %204 : vector<8x384xf32>
    %206 = vector.extract_strided_slice %201 {offsets = [0, 0], sizes = [8, 128], strides = [1, 1]} : vector<8x384xf32> to vector<8x128xf32>
    %207 = vector.extract_strided_slice %205 {offsets = [0, 0], sizes = [8, 128], strides = [1, 1]} : vector<8x384xf32> to vector<8x128xf32>
    %208 = arith.addf %206, %207 : vector<8x128xf32>
    %209 = arith.negf %208 : vector<8x128xf32>
    %210 = math.exp %209 : vector<8x128xf32>
    %cst_69 = arith.constant 1.000000e+00 : f32
    %211 = vector.broadcast %cst_69 : f32 to vector<8x128xf32>
    %212 = arith.addf %211, %210 : vector<8x128xf32>
    %213 = arith.divf %211, %212 : vector<8x128xf32>
    %214 = vector.extract_strided_slice %201 {offsets = [0, 128], sizes = [8, 128], strides = [1, 1]} : vector<8x384xf32> to vector<8x128xf32>
    %215 = vector.extract_strided_slice %205 {offsets = [0, 128], sizes = [8, 128], strides = [1, 1]} : vector<8x384xf32> to vector<8x128xf32>
    %216 = arith.addf %214, %215 : vector<8x128xf32>
    %217 = arith.negf %216 : vector<8x128xf32>
    %218 = math.exp %217 : vector<8x128xf32>
    %cst_70 = arith.constant 1.000000e+00 : f32
    %219 = vector.broadcast %cst_70 : f32 to vector<8x128xf32>
    %220 = arith.addf %219, %218 : vector<8x128xf32>
    %221 = arith.divf %219, %220 : vector<8x128xf32>
    %222 = vector.extract_strided_slice %201 {offsets = [0, 256], sizes = [8, 128], strides = [1, 1]} : vector<8x384xf32> to vector<8x128xf32>
    %223 = vector.extract_strided_slice %205 {offsets = [0, 256], sizes = [8, 128], strides = [1, 1]} : vector<8x384xf32> to vector<8x128xf32>
    %224 = arith.mulf %213, %223 : vector<8x128xf32>
    %225 = arith.addf %222, %224 : vector<8x128xf32>
    %226 = math.tanh %225 : vector<8x128xf32>
    %cst_71 = arith.constant 1.000000e+00 : f32
    %227 = vector.broadcast %cst_71 : f32 to vector<8x128xf32>
    %228 = arith.subf %227, %221 : vector<8x128xf32>
    %229 = arith.mulf %228, %226 : vector<8x128xf32>
    %230 = arith.mulf %221, %199 : vector<8x128xf32>
    %231 = arith.addf %229, %230 : vector<8x128xf32>
    %c48_72 = arith.constant 48 : index
    %c0_73 = arith.constant 0 : index
    %232 = vector.load %arg13[%c48_72, %c0_73] : memref<64x128xf32, #tpu.memory_space<vmem>>, vector<8x128xf32>
    tpu.vector_store %arg13[%c48_72, %c0_73], %231 {strides = array<i32>} : memref<64x128xf32, #tpu.memory_space<vmem>>, vector<8x128xf32>,
    %c56 = arith.constant 56 : index
    %c0_74 = arith.constant 0 : index
    %233 = vector.load %arg12[%c56, %c0_74] : memref<64x384xf32, #tpu.memory_space<vmem>>, vector<8x384xf32>
    %c0_75 = arith.constant 0 : index
    %c0_76 = arith.constant 0 : index
    %234 = vector.load %arg2[%c0_75, %c0_76] : memref<128x384xf32, #tpu.memory_space<vmem>>, vector<128x384xf32>
    %cst_77 = arith.constant dense<0.000000e+00> : vector<8x384xf32>
    %235 = tpu.matmul %231, %234, %cst_77 {dimension_numbers = #tpu.dot_dimension_numbers<[1], [0], [0], [1], [0, 0, 1, 1], [], []>} : vector<8x128xf32>, vector<128x384xf32>, vector<8x384xf32> -> vector<8x384xf32>
    %236 = vector.broadcast %7 : vector<1x384xf32> to vector<8x384xf32>
    %237 = arith.addf %235, %236 : vector<8x384xf32>
    %238 = vector.extract_strided_slice %233 {offsets = [0, 0], sizes = [8, 128], strides = [1, 1]} : vector<8x384xf32> to vector<8x128xf32>
    %239 = vector.extract_strided_slice %237 {offsets = [0, 0], sizes = [8, 128], strides = [1, 1]} : vector<8x384xf32> to vector<8x128xf32>
    %240 = arith.addf %238, %239 : vector<8x128xf32>
    %241 = arith.negf %240 : vector<8x128xf32>
    %242 = math.exp %241 : vector<8x128xf32>
    %cst_78 = arith.constant 1.000000e+00 : f32
    %243 = vector.broadcast %cst_78 : f32 to vector<8x128xf32>
    %244 = arith.addf %243, %242 : vector<8x128xf32>
    %245 = arith.divf %243, %244 : vector<8x128xf32>
    %246 = vector.extract_strided_slice %233 {offsets = [0, 128], sizes = [8, 128], strides = [1, 1]} : vector<8x384xf32> to vector<8x128xf32>
    %247 = vector.extract_strided_slice %237 {offsets = [0, 128], sizes = [8, 128], strides = [1, 1]} : vector<8x384xf32> to vector<8x128xf32>
    %248 = arith.addf %246, %247 : vector<8x128xf32>
    %249 = arith.negf %248 : vector<8x128xf32>
    %250 = math.exp %249 : vector<8x128xf32>
    %cst_79 = arith.constant 1.000000e+00 : f32
    %251 = vector.broadcast %cst_79 : f32 to vector<8x128xf32>
    %252 = arith.addf %251, %250 : vector<8x128xf32>
    %253 = arith.divf %251, %252 : vector<8x128xf32>
    %254 = vector.extract_strided_slice %233 {offsets = [0, 256], sizes = [8, 128], strides = [1, 1]} : vector<8x384xf32> to vector<8x128xf32>
    %255 = vector.extract_strided_slice %237 {offsets = [0, 256], sizes = [8, 128], strides = [1, 1]} : vector<8x384xf32> to vector<8x128xf32>
    %256 = arith.mulf %245, %255 : vector<8x128xf32>
    %257 = arith.addf %254, %256 : vector<8x128xf32>
    %258 = math.tanh %257 : vector<8x128xf32>
    %cst_80 = arith.constant 1.000000e+00 : f32
    %259 = vector.broadcast %cst_80 : f32 to vector<8x128xf32>
    %260 = arith.subf %259, %253 : vector<8x128xf32>
    %261 = arith.mulf %260, %258 : vector<8x128xf32>
    %262 = arith.mulf %253, %231 : vector<8x128xf32>
    %263 = arith.addf %261, %262 : vector<8x128xf32>
    %c56_81 = arith.constant 56 : index
    %c0_82 = arith.constant 0 : index
    %264 = vector.load %arg13[%c56_81, %c0_82] : memref<64x128xf32, #tpu.memory_space<vmem>>, vector<8x128xf32>
    tpu.vector_store %arg13[%c56_81, %c0_82], %263 {strides = array<i32>} : memref<64x128xf32, #tpu.memory_space<vmem>>, vector<8x128xf32>,
    %c0_83 = arith.constant 0 : index
    %c0_84 = arith.constant 0 : index
    %265 = vector.load %arg13[%c0_83, %c0_84] : memref<64x128xf32, #tpu.memory_space<vmem>>, vector<64x128xf32>
    %c0_85 = arith.constant 0 : index
    %c0_86 = arith.constant 0 : index
    %266 = vector.load %arg5[%c0_85, %c0_86] : memref<128x384xf32, #tpu.memory_space<vmem>>, vector<128x384xf32>
    %cst_87 = arith.constant dense<0.000000e+00> : vector<64x384xf32>
    %267 = tpu.matmul %265, %266, %cst_87 {dimension_numbers = #tpu.dot_dimension_numbers<[1], [0], [0], [1], [0, 0, 1, 1], [], []>} : vector<64x128xf32>, vector<128x384xf32>, vector<64x384xf32> -> vector<64x384xf32>
    %c0_88 = arith.constant 0 : index
    %c0_89 = arith.constant 0 : index
    %268 = vector.load %arg7[%c0_88, %c0_89] : memref<1x384xf32, #tpu.memory_space<vmem>>, vector<1x384xf32>
    %269 = vector.broadcast %268 : vector<1x384xf32> to vector<64x384xf32>
    %270 = arith.addf %267, %269 : vector<64x384xf32>
    %c0_90 = arith.constant 0 : index
    %c0_91 = arith.constant 0 : index
    %271 = vector.load %arg12[%c0_90, %c0_91] : memref<64x384xf32, #tpu.memory_space<vmem>>, vector<64x384xf32>
    tpu.vector_store %arg12[%c0_90, %c0_91], %270 {strides = array<i32>} : memref<64x384xf32, #tpu.memory_space<vmem>>, vector<64x384xf32>,
    %c0_92 = arith.constant 0 : index
    %c0_93 = arith.constant 0 : index
    %272 = vector.load %arg8[%c0_92, %c0_93] : memref<1x384xf32, #tpu.memory_space<vmem>>, vector<1x384xf32>
    %cst_94 = arith.constant 0.000000e+00 : f32
    %273 = vector.broadcast %cst_94 : f32 to vector<8x128xf32>
    %c0_95 = arith.constant 0 : index
    %c0_96 = arith.constant 0 : index
    %274 = vector.load %arg12[%c0_95, %c0_96] : memref<64x384xf32, #tpu.memory_space<vmem>>, vector<8x384xf32>
    %c0_97 = arith.constant 0 : index
    %c0_98 = arith.constant 0 : index
    %275 = vector.load %arg6[%c0_97, %c0_98] : memref<128x384xf32, #tpu.memory_space<vmem>>, vector<128x384xf32>
    %cst_99 = arith.constant dense<0.000000e+00> : vector<8x384xf32>
    %276 = tpu.matmul %273, %275, %cst_99 {dimension_numbers = #tpu.dot_dimension_numbers<[1], [0], [0], [1], [0, 0, 1, 1], [], []>} : vector<8x128xf32>, vector<128x384xf32>, vector<8x384xf32> -> vector<8x384xf32>
    %277 = vector.broadcast %272 : vector<1x384xf32> to vector<8x384xf32>
    %278 = arith.addf %276, %277 : vector<8x384xf32>
    %279 = vector.extract_strided_slice %274 {offsets = [0, 0], sizes = [8, 128], strides = [1, 1]} : vector<8x384xf32> to vector<8x128xf32>
    %280 = vector.extract_strided_slice %278 {offsets = [0, 0], sizes = [8, 128], strides = [1, 1]} : vector<8x384xf32> to vector<8x128xf32>
    %281 = arith.addf %279, %280 : vector<8x128xf32>
    %282 = arith.negf %281 : vector<8x128xf32>
    %283 = math.exp %282 : vector<8x128xf32>
    %cst_100 = arith.constant 1.000000e+00 : f32
    %284 = vector.broadcast %cst_100 : f32 to vector<8x128xf32>
    %285 = arith.addf %284, %283 : vector<8x128xf32>
    %286 = arith.divf %284, %285 : vector<8x128xf32>
    %287 = vector.extract_strided_slice %274 {offsets = [0, 128], sizes = [8, 128], strides = [1, 1]} : vector<8x384xf32> to vector<8x128xf32>
    %288 = vector.extract_strided_slice %278 {offsets = [0, 128], sizes = [8, 128], strides = [1, 1]} : vector<8x384xf32> to vector<8x128xf32>
    %289 = arith.addf %287, %288 : vector<8x128xf32>
    %290 = arith.negf %289 : vector<8x128xf32>
    %291 = math.exp %290 : vector<8x128xf32>
    %cst_101 = arith.constant 1.000000e+00 : f32
    %292 = vector.broadcast %cst_101 : f32 to vector<8x128xf32>
    %293 = arith.addf %292, %291 : vector<8x128xf32>
    %294 = arith.divf %292, %293 : vector<8x128xf32>
    %295 = vector.extract_strided_slice %274 {offsets = [0, 256], sizes = [8, 128], strides = [1, 1]} : vector<8x384xf32> to vector<8x128xf32>
    %296 = vector.extract_strided_slice %278 {offsets = [0, 256], sizes = [8, 128], strides = [1, 1]} : vector<8x384xf32> to vector<8x128xf32>
    %297 = arith.mulf %286, %296 : vector<8x128xf32>
    %298 = arith.addf %295, %297 : vector<8x128xf32>
    %299 = math.tanh %298 : vector<8x128xf32>
    %cst_102 = arith.constant 1.000000e+00 : f32
    %300 = vector.broadcast %cst_102 : f32 to vector<8x128xf32>
    %301 = arith.subf %300, %294 : vector<8x128xf32>
    %302 = arith.mulf %301, %299 : vector<8x128xf32>
    %303 = arith.mulf %294, %273 : vector<8x128xf32>
    %304 = arith.addf %302, %303 : vector<8x128xf32>
    %c0_103 = arith.constant 0 : index
    %c0_104 = arith.constant 0 : index
    %305 = vector.load %arg13[%c0_103, %c0_104] : memref<64x128xf32, #tpu.memory_space<vmem>>, vector<8x128xf32>
    tpu.vector_store %arg13[%c0_103, %c0_104], %304 {strides = array<i32>} : memref<64x128xf32, #tpu.memory_space<vmem>>, vector<8x128xf32>,
    %c8_105 = arith.constant 8 : index
    %c0_106 = arith.constant 0 : index
    %306 = vector.load %arg12[%c8_105, %c0_106] : memref<64x384xf32, #tpu.memory_space<vmem>>, vector<8x384xf32>
    %c0_107 = arith.constant 0 : index
    %c0_108 = arith.constant 0 : index
    %307 = vector.load %arg6[%c0_107, %c0_108] : memref<128x384xf32, #tpu.memory_space<vmem>>, vector<128x384xf32>
    %cst_109 = arith.constant dense<0.000000e+00> : vector<8x384xf32>
    %308 = tpu.matmul %304, %307, %cst_109 {dimension_numbers = #tpu.dot_dimension_numbers<[1], [0], [0], [1], [0, 0, 1, 1], [], []>} : vector<8x128xf32>, vector<128x384xf32>, vector<8x384xf32> -> vector<8x384xf32>
    %309 = vector.broadcast %272 : vector<1x384xf32> to vector<8x384xf32>
    %310 = arith.addf %308, %309 : vector<8x384xf32>
    %311 = vector.extract_strided_slice %306 {offsets = [0, 0], sizes = [8, 128], strides = [1, 1]} : vector<8x384xf32> to vector<8x128xf32>
    %312 = vector.extract_strided_slice %310 {offsets = [0, 0], sizes = [8, 128], strides = [1, 1]} : vector<8x384xf32> to vector<8x128xf32>
    %313 = arith.addf %311, %312 : vector<8x128xf32>
    %314 = arith.negf %313 : vector<8x128xf32>
    %315 = math.exp %314 : vector<8x128xf32>
    %cst_110 = arith.constant 1.000000e+00 : f32
    %316 = vector.broadcast %cst_110 : f32 to vector<8x128xf32>
    %317 = arith.addf %316, %315 : vector<8x128xf32>
    %318 = arith.divf %316, %317 : vector<8x128xf32>
    %319 = vector.extract_strided_slice %306 {offsets = [0, 128], sizes = [8, 128], strides = [1, 1]} : vector<8x384xf32> to vector<8x128xf32>
    %320 = vector.extract_strided_slice %310 {offsets = [0, 128], sizes = [8, 128], strides = [1, 1]} : vector<8x384xf32> to vector<8x128xf32>
    %321 = arith.addf %319, %320 : vector<8x128xf32>
    %322 = arith.negf %321 : vector<8x128xf32>
    %323 = math.exp %322 : vector<8x128xf32>
    %cst_111 = arith.constant 1.000000e+00 : f32
    %324 = vector.broadcast %cst_111 : f32 to vector<8x128xf32>
    %325 = arith.addf %324, %323 : vector<8x128xf32>
    %326 = arith.divf %324, %325 : vector<8x128xf32>
    %327 = vector.extract_strided_slice %306 {offsets = [0, 256], sizes = [8, 128], strides = [1, 1]} : vector<8x384xf32> to vector<8x128xf32>
    %328 = vector.extract_strided_slice %310 {offsets = [0, 256], sizes = [8, 128], strides = [1, 1]} : vector<8x384xf32> to vector<8x128xf32>
    %329 = arith.mulf %318, %328 : vector<8x128xf32>
    %330 = arith.addf %327, %329 : vector<8x128xf32>
    %331 = math.tanh %330 : vector<8x128xf32>
    %cst_112 = arith.constant 1.000000e+00 : f32
    %332 = vector.broadcast %cst_112 : f32 to vector<8x128xf32>
    %333 = arith.subf %332, %326 : vector<8x128xf32>
    %334 = arith.mulf %333, %331 : vector<8x128xf32>
    %335 = arith.mulf %326, %304 : vector<8x128xf32>
    %336 = arith.addf %334, %335 : vector<8x128xf32>
    %c8_113 = arith.constant 8 : index
    %c0_114 = arith.constant 0 : index
    %337 = vector.load %arg13[%c8_113, %c0_114] : memref<64x128xf32, #tpu.memory_space<vmem>>, vector<8x128xf32>
    tpu.vector_store %arg13[%c8_113, %c0_114], %336 {strides = array<i32>} : memref<64x128xf32, #tpu.memory_space<vmem>>, vector<8x128xf32>,
    %c16_115 = arith.constant 16 : index
    %c0_116 = arith.constant 0 : index
    %338 = vector.load %arg12[%c16_115, %c0_116] : memref<64x384xf32, #tpu.memory_space<vmem>>, vector<8x384xf32>
    %c0_117 = arith.constant 0 : index
    %c0_118 = arith.constant 0 : index
    %339 = vector.load %arg6[%c0_117, %c0_118] : memref<128x384xf32, #tpu.memory_space<vmem>>, vector<128x384xf32>
    %cst_119 = arith.constant dense<0.000000e+00> : vector<8x384xf32>
    %340 = tpu.matmul %336, %339, %cst_119 {dimension_numbers = #tpu.dot_dimension_numbers<[1], [0], [0], [1], [0, 0, 1, 1], [], []>} : vector<8x128xf32>, vector<128x384xf32>, vector<8x384xf32> -> vector<8x384xf32>
    %341 = vector.broadcast %272 : vector<1x384xf32> to vector<8x384xf32>
    %342 = arith.addf %340, %341 : vector<8x384xf32>
    %343 = vector.extract_strided_slice %338 {offsets = [0, 0], sizes = [8, 128], strides = [1, 1]} : vector<8x384xf32> to vector<8x128xf32>
    %344 = vector.extract_strided_slice %342 {offsets = [0, 0], sizes = [8, 128], strides = [1, 1]} : vector<8x384xf32> to vector<8x128xf32>
    %345 = arith.addf %343, %344 : vector<8x128xf32>
    %346 = arith.negf %345 : vector<8x128xf32>
    %347 = math.exp %346 : vector<8x128xf32>
    %cst_120 = arith.constant 1.000000e+00 : f32
    %348 = vector.broadcast %cst_120 : f32 to vector<8x128xf32>
    %349 = arith.addf %348, %347 : vector<8x128xf32>
    %350 = arith.divf %348, %349 : vector<8x128xf32>
    %351 = vector.extract_strided_slice %338 {offsets = [0, 128], sizes = [8, 128], strides = [1, 1]} : vector<8x384xf32> to vector<8x128xf32>
    %352 = vector.extract_strided_slice %342 {offsets = [0, 128], sizes = [8, 128], strides = [1, 1]} : vector<8x384xf32> to vector<8x128xf32>
    %353 = arith.addf %351, %352 : vector<8x128xf32>
    %354 = arith.negf %353 : vector<8x128xf32>
    %355 = math.exp %354 : vector<8x128xf32>
    %cst_121 = arith.constant 1.000000e+00 : f32
    %356 = vector.broadcast %cst_121 : f32 to vector<8x128xf32>
    %357 = arith.addf %356, %355 : vector<8x128xf32>
    %358 = arith.divf %356, %357 : vector<8x128xf32>
    %359 = vector.extract_strided_slice %338 {offsets = [0, 256], sizes = [8, 128], strides = [1, 1]} : vector<8x384xf32> to vector<8x128xf32>
    %360 = vector.extract_strided_slice %342 {offsets = [0, 256], sizes = [8, 128], strides = [1, 1]} : vector<8x384xf32> to vector<8x128xf32>
    %361 = arith.mulf %350, %360 : vector<8x128xf32>
    %362 = arith.addf %359, %361 : vector<8x128xf32>
    %363 = math.tanh %362 : vector<8x128xf32>
    %cst_122 = arith.constant 1.000000e+00 : f32
    %364 = vector.broadcast %cst_122 : f32 to vector<8x128xf32>
    %365 = arith.subf %364, %358 : vector<8x128xf32>
    %366 = arith.mulf %365, %363 : vector<8x128xf32>
    %367 = arith.mulf %358, %336 : vector<8x128xf32>
    %368 = arith.addf %366, %367 : vector<8x128xf32>
    %c16_123 = arith.constant 16 : index
    %c0_124 = arith.constant 0 : index
    %369 = vector.load %arg13[%c16_123, %c0_124] : memref<64x128xf32, #tpu.memory_space<vmem>>, vector<8x128xf32>
    tpu.vector_store %arg13[%c16_123, %c0_124], %368 {strides = array<i32>} : memref<64x128xf32, #tpu.memory_space<vmem>>, vector<8x128xf32>,
    %c24_125 = arith.constant 24 : index
    %c0_126 = arith.constant 0 : index
    %370 = vector.load %arg12[%c24_125, %c0_126] : memref<64x384xf32, #tpu.memory_space<vmem>>, vector<8x384xf32>
    %c0_127 = arith.constant 0 : index
    %c0_128 = arith.constant 0 : index
    %371 = vector.load %arg6[%c0_127, %c0_128] : memref<128x384xf32, #tpu.memory_space<vmem>>, vector<128x384xf32>
    %cst_129 = arith.constant dense<0.000000e+00> : vector<8x384xf32>
    %372 = tpu.matmul %368, %371, %cst_129 {dimension_numbers = #tpu.dot_dimension_numbers<[1], [0], [0], [1], [0, 0, 1, 1], [], []>} : vector<8x128xf32>, vector<128x384xf32>, vector<8x384xf32> -> vector<8x384xf32>
    %373 = vector.broadcast %272 : vector<1x384xf32> to vector<8x384xf32>
    %374 = arith.addf %372, %373 : vector<8x384xf32>
    %375 = vector.extract_strided_slice %370 {offsets = [0, 0], sizes = [8, 128], strides = [1, 1]} : vector<8x384xf32> to vector<8x128xf32>
    %376 = vector.extract_strided_slice %374 {offsets = [0, 0], sizes = [8, 128], strides = [1, 1]} : vector<8x384xf32> to vector<8x128xf32>
    %377 = arith.addf %375, %376 : vector<8x128xf32>
    %378 = arith.negf %377 : vector<8x128xf32>
    %379 = math.exp %378 : vector<8x128xf32>
    %cst_130 = arith.constant 1.000000e+00 : f32
    %380 = vector.broadcast %cst_130 : f32 to vector<8x128xf32>
    %381 = arith.addf %380, %379 : vector<8x128xf32>
    %382 = arith.divf %380, %381 : vector<8x128xf32>
    %383 = vector.extract_strided_slice %370 {offsets = [0, 128], sizes = [8, 128], strides = [1, 1]} : vector<8x384xf32> to vector<8x128xf32>
    %384 = vector.extract_strided_slice %374 {offsets = [0, 128], sizes = [8, 128], strides = [1, 1]} : vector<8x384xf32> to vector<8x128xf32>
    %385 = arith.addf %383, %384 : vector<8x128xf32>
    %386 = arith.negf %385 : vector<8x128xf32>
    %387 = math.exp %386 : vector<8x128xf32>
    %cst_131 = arith.constant 1.000000e+00 : f32
    %388 = vector.broadcast %cst_131 : f32 to vector<8x128xf32>
    %389 = arith.addf %388, %387 : vector<8x128xf32>
    %390 = arith.divf %388, %389 : vector<8x128xf32>
    %391 = vector.extract_strided_slice %370 {offsets = [0, 256], sizes = [8, 128], strides = [1, 1]} : vector<8x384xf32> to vector<8x128xf32>
    %392 = vector.extract_strided_slice %374 {offsets = [0, 256], sizes = [8, 128], strides = [1, 1]} : vector<8x384xf32> to vector<8x128xf32>
    %393 = arith.mulf %382, %392 : vector<8x128xf32>
    %394 = arith.addf %391, %393 : vector<8x128xf32>
    %395 = math.tanh %394 : vector<8x128xf32>
    %cst_132 = arith.constant 1.000000e+00 : f32
    %396 = vector.broadcast %cst_132 : f32 to vector<8x128xf32>
    %397 = arith.subf %396, %390 : vector<8x128xf32>
    %398 = arith.mulf %397, %395 : vector<8x128xf32>
    %399 = arith.mulf %390, %368 : vector<8x128xf32>
    %400 = arith.addf %398, %399 : vector<8x128xf32>
    %c24_133 = arith.constant 24 : index
    %c0_134 = arith.constant 0 : index
    %401 = vector.load %arg13[%c24_133, %c0_134] : memref<64x128xf32, #tpu.memory_space<vmem>>, vector<8x128xf32>
    tpu.vector_store %arg13[%c24_133, %c0_134], %400 {strides = array<i32>} : memref<64x128xf32, #tpu.memory_space<vmem>>, vector<8x128xf32>,
    %c32_135 = arith.constant 32 : index
    %c0_136 = arith.constant 0 : index
    %402 = vector.load %arg12[%c32_135, %c0_136] : memref<64x384xf32, #tpu.memory_space<vmem>>, vector<8x384xf32>
    %c0_137 = arith.constant 0 : index
    %c0_138 = arith.constant 0 : index
    %403 = vector.load %arg6[%c0_137, %c0_138] : memref<128x384xf32, #tpu.memory_space<vmem>>, vector<128x384xf32>
    %cst_139 = arith.constant dense<0.000000e+00> : vector<8x384xf32>
    %404 = tpu.matmul %400, %403, %cst_139 {dimension_numbers = #tpu.dot_dimension_numbers<[1], [0], [0], [1], [0, 0, 1, 1], [], []>} : vector<8x128xf32>, vector<128x384xf32>, vector<8x384xf32> -> vector<8x384xf32>
    %405 = vector.broadcast %272 : vector<1x384xf32> to vector<8x384xf32>
    %406 = arith.addf %404, %405 : vector<8x384xf32>
    %407 = vector.extract_strided_slice %402 {offsets = [0, 0], sizes = [8, 128], strides = [1, 1]} : vector<8x384xf32> to vector<8x128xf32>
    %408 = vector.extract_strided_slice %406 {offsets = [0, 0], sizes = [8, 128], strides = [1, 1]} : vector<8x384xf32> to vector<8x128xf32>
    %409 = arith.addf %407, %408 : vector<8x128xf32>
    %410 = arith.negf %409 : vector<8x128xf32>
    %411 = math.exp %410 : vector<8x128xf32>
    %cst_140 = arith.constant 1.000000e+00 : f32
    %412 = vector.broadcast %cst_140 : f32 to vector<8x128xf32>
    %413 = arith.addf %412, %411 : vector<8x128xf32>
    %414 = arith.divf %412, %413 : vector<8x128xf32>
    %415 = vector.extract_strided_slice %402 {offsets = [0, 128], sizes = [8, 128], strides = [1, 1]} : vector<8x384xf32> to vector<8x128xf32>
    %416 = vector.extract_strided_slice %406 {offsets = [0, 128], sizes = [8, 128], strides = [1, 1]} : vector<8x384xf32> to vector<8x128xf32>
    %417 = arith.addf %415, %416 : vector<8x128xf32>
    %418 = arith.negf %417 : vector<8x128xf32>
    %419 = math.exp %418 : vector<8x128xf32>
    %cst_141 = arith.constant 1.000000e+00 : f32
    %420 = vector.broadcast %cst_141 : f32 to vector<8x128xf32>
    %421 = arith.addf %420, %419 : vector<8x128xf32>
    %422 = arith.divf %420, %421 : vector<8x128xf32>
    %423 = vector.extract_strided_slice %402 {offsets = [0, 256], sizes = [8, 128], strides = [1, 1]} : vector<8x384xf32> to vector<8x128xf32>
    %424 = vector.extract_strided_slice %406 {offsets = [0, 256], sizes = [8, 128], strides = [1, 1]} : vector<8x384xf32> to vector<8x128xf32>
    %425 = arith.mulf %414, %424 : vector<8x128xf32>
    %426 = arith.addf %423, %425 : vector<8x128xf32>
    %427 = math.tanh %426 : vector<8x128xf32>
    %cst_142 = arith.constant 1.000000e+00 : f32
    %428 = vector.broadcast %cst_142 : f32 to vector<8x128xf32>
    %429 = arith.subf %428, %422 : vector<8x128xf32>
    %430 = arith.mulf %429, %427 : vector<8x128xf32>
    %431 = arith.mulf %422, %400 : vector<8x128xf32>
    %432 = arith.addf %430, %431 : vector<8x128xf32>
    %c32_143 = arith.constant 32 : index
    %c0_144 = arith.constant 0 : index
    %433 = vector.load %arg13[%c32_143, %c0_144] : memref<64x128xf32, #tpu.memory_space<vmem>>, vector<8x128xf32>
    tpu.vector_store %arg13[%c32_143, %c0_144], %432 {strides = array<i32>} : memref<64x128xf32, #tpu.memory_space<vmem>>, vector<8x128xf32>,
    %c40_145 = arith.constant 40 : index
    %c0_146 = arith.constant 0 : index
    %434 = vector.load %arg12[%c40_145, %c0_146] : memref<64x384xf32, #tpu.memory_space<vmem>>, vector<8x384xf32>
    %c0_147 = arith.constant 0 : index
    %c0_148 = arith.constant 0 : index
    %435 = vector.load %arg6[%c0_147, %c0_148] : memref<128x384xf32, #tpu.memory_space<vmem>>, vector<128x384xf32>
    %cst_149 = arith.constant dense<0.000000e+00> : vector<8x384xf32>
    %436 = tpu.matmul %432, %435, %cst_149 {dimension_numbers = #tpu.dot_dimension_numbers<[1], [0], [0], [1], [0, 0, 1, 1], [], []>} : vector<8x128xf32>, vector<128x384xf32>, vector<8x384xf32> -> vector<8x384xf32>
    %437 = vector.broadcast %272 : vector<1x384xf32> to vector<8x384xf32>
    %438 = arith.addf %436, %437 : vector<8x384xf32>
    %439 = vector.extract_strided_slice %434 {offsets = [0, 0], sizes = [8, 128], strides = [1, 1]} : vector<8x384xf32> to vector<8x128xf32>
    %440 = vector.extract_strided_slice %438 {offsets = [0, 0], sizes = [8, 128], strides = [1, 1]} : vector<8x384xf32> to vector<8x128xf32>
    %441 = arith.addf %439, %440 : vector<8x128xf32>
    %442 = arith.negf %441 : vector<8x128xf32>
    %443 = math.exp %442 : vector<8x128xf32>
    %cst_150 = arith.constant 1.000000e+00 : f32
    %444 = vector.broadcast %cst_150 : f32 to vector<8x128xf32>
    %445 = arith.addf %444, %443 : vector<8x128xf32>
    %446 = arith.divf %444, %445 : vector<8x128xf32>
    %447 = vector.extract_strided_slice %434 {offsets = [0, 128], sizes = [8, 128], strides = [1, 1]} : vector<8x384xf32> to vector<8x128xf32>
    %448 = vector.extract_strided_slice %438 {offsets = [0, 128], sizes = [8, 128], strides = [1, 1]} : vector<8x384xf32> to vector<8x128xf32>
    %449 = arith.addf %447, %448 : vector<8x128xf32>
    %450 = arith.negf %449 : vector<8x128xf32>
    %451 = math.exp %450 : vector<8x128xf32>
    %cst_151 = arith.constant 1.000000e+00 : f32
    %452 = vector.broadcast %cst_151 : f32 to vector<8x128xf32>
    %453 = arith.addf %452, %451 : vector<8x128xf32>
    %454 = arith.divf %452, %453 : vector<8x128xf32>
    %455 = vector.extract_strided_slice %434 {offsets = [0, 256], sizes = [8, 128], strides = [1, 1]} : vector<8x384xf32> to vector<8x128xf32>
    %456 = vector.extract_strided_slice %438 {offsets = [0, 256], sizes = [8, 128], strides = [1, 1]} : vector<8x384xf32> to vector<8x128xf32>
    %457 = arith.mulf %446, %456 : vector<8x128xf32>
    %458 = arith.addf %455, %457 : vector<8x128xf32>
    %459 = math.tanh %458 : vector<8x128xf32>
    %cst_152 = arith.constant 1.000000e+00 : f32
    %460 = vector.broadcast %cst_152 : f32 to vector<8x128xf32>
    %461 = arith.subf %460, %454 : vector<8x128xf32>
    %462 = arith.mulf %461, %459 : vector<8x128xf32>
    %463 = arith.mulf %454, %432 : vector<8x128xf32>
    %464 = arith.addf %462, %463 : vector<8x128xf32>
    %c40_153 = arith.constant 40 : index
    %c0_154 = arith.constant 0 : index
    %465 = vector.load %arg13[%c40_153, %c0_154] : memref<64x128xf32, #tpu.memory_space<vmem>>, vector<8x128xf32>
    tpu.vector_store %arg13[%c40_153, %c0_154], %464 {strides = array<i32>} : memref<64x128xf32, #tpu.memory_space<vmem>>, vector<8x128xf32>,
    %c48_155 = arith.constant 48 : index
    %c0_156 = arith.constant 0 : index
    %466 = vector.load %arg12[%c48_155, %c0_156] : memref<64x384xf32, #tpu.memory_space<vmem>>, vector<8x384xf32>
    %c0_157 = arith.constant 0 : index
    %c0_158 = arith.constant 0 : index
    %467 = vector.load %arg6[%c0_157, %c0_158] : memref<128x384xf32, #tpu.memory_space<vmem>>, vector<128x384xf32>
    %cst_159 = arith.constant dense<0.000000e+00> : vector<8x384xf32>
    %468 = tpu.matmul %464, %467, %cst_159 {dimension_numbers = #tpu.dot_dimension_numbers<[1], [0], [0], [1], [0, 0, 1, 1], [], []>} : vector<8x128xf32>, vector<128x384xf32>, vector<8x384xf32> -> vector<8x384xf32>
    %469 = vector.broadcast %272 : vector<1x384xf32> to vector<8x384xf32>
    %470 = arith.addf %468, %469 : vector<8x384xf32>
    %471 = vector.extract_strided_slice %466 {offsets = [0, 0], sizes = [8, 128], strides = [1, 1]} : vector<8x384xf32> to vector<8x128xf32>
    %472 = vector.extract_strided_slice %470 {offsets = [0, 0], sizes = [8, 128], strides = [1, 1]} : vector<8x384xf32> to vector<8x128xf32>
    %473 = arith.addf %471, %472 : vector<8x128xf32>
    %474 = arith.negf %473 : vector<8x128xf32>
    %475 = math.exp %474 : vector<8x128xf32>
    %cst_160 = arith.constant 1.000000e+00 : f32
    %476 = vector.broadcast %cst_160 : f32 to vector<8x128xf32>
    %477 = arith.addf %476, %475 : vector<8x128xf32>
    %478 = arith.divf %476, %477 : vector<8x128xf32>
    %479 = vector.extract_strided_slice %466 {offsets = [0, 128], sizes = [8, 128], strides = [1, 1]} : vector<8x384xf32> to vector<8x128xf32>
    %480 = vector.extract_strided_slice %470 {offsets = [0, 128], sizes = [8, 128], strides = [1, 1]} : vector<8x384xf32> to vector<8x128xf32>
    %481 = arith.addf %479, %480 : vector<8x128xf32>
    %482 = arith.negf %481 : vector<8x128xf32>
    %483 = math.exp %482 : vector<8x128xf32>
    %cst_161 = arith.constant 1.000000e+00 : f32
    %484 = vector.broadcast %cst_161 : f32 to vector<8x128xf32>
    %485 = arith.addf %484, %483 : vector<8x128xf32>
    %486 = arith.divf %484, %485 : vector<8x128xf32>
    %487 = vector.extract_strided_slice %466 {offsets = [0, 256], sizes = [8, 128], strides = [1, 1]} : vector<8x384xf32> to vector<8x128xf32>
    %488 = vector.extract_strided_slice %470 {offsets = [0, 256], sizes = [8, 128], strides = [1, 1]} : vector<8x384xf32> to vector<8x128xf32>
    %489 = arith.mulf %478, %488 : vector<8x128xf32>
    %490 = arith.addf %487, %489 : vector<8x128xf32>
    %491 = math.tanh %490 : vector<8x128xf32>
    %cst_162 = arith.constant 1.000000e+00 : f32
    %492 = vector.broadcast %cst_162 : f32 to vector<8x128xf32>
    %493 = arith.subf %492, %486 : vector<8x128xf32>
    %494 = arith.mulf %493, %491 : vector<8x128xf32>
    %495 = arith.mulf %486, %464 : vector<8x128xf32>
    %496 = arith.addf %494, %495 : vector<8x128xf32>
    %c48_163 = arith.constant 48 : index
    %c0_164 = arith.constant 0 : index
    %497 = vector.load %arg13[%c48_163, %c0_164] : memref<64x128xf32, #tpu.memory_space<vmem>>, vector<8x128xf32>
    tpu.vector_store %arg13[%c48_163, %c0_164], %496 {strides = array<i32>} : memref<64x128xf32, #tpu.memory_space<vmem>>, vector<8x128xf32>,
    %c56_165 = arith.constant 56 : index
    %c0_166 = arith.constant 0 : index
    %498 = vector.load %arg12[%c56_165, %c0_166] : memref<64x384xf32, #tpu.memory_space<vmem>>, vector<8x384xf32>
    %c0_167 = arith.constant 0 : index
    %c0_168 = arith.constant 0 : index
    %499 = vector.load %arg6[%c0_167, %c0_168] : memref<128x384xf32, #tpu.memory_space<vmem>>, vector<128x384xf32>
    %cst_169 = arith.constant dense<0.000000e+00> : vector<8x384xf32>
    %500 = tpu.matmul %496, %499, %cst_169 {dimension_numbers = #tpu.dot_dimension_numbers<[1], [0], [0], [1], [0, 0, 1, 1], [], []>} : vector<8x128xf32>, vector<128x384xf32>, vector<8x384xf32> -> vector<8x384xf32>
    %501 = vector.broadcast %272 : vector<1x384xf32> to vector<8x384xf32>
    %502 = arith.addf %500, %501 : vector<8x384xf32>
    %503 = vector.extract_strided_slice %498 {offsets = [0, 0], sizes = [8, 128], strides = [1, 1]} : vector<8x384xf32> to vector<8x128xf32>
    %504 = vector.extract_strided_slice %502 {offsets = [0, 0], sizes = [8, 128], strides = [1, 1]} : vector<8x384xf32> to vector<8x128xf32>
    %505 = arith.addf %503, %504 : vector<8x128xf32>
    %506 = arith.negf %505 : vector<8x128xf32>
    %507 = math.exp %506 : vector<8x128xf32>
    %cst_170 = arith.constant 1.000000e+00 : f32
    %508 = vector.broadcast %cst_170 : f32 to vector<8x128xf32>
    %509 = arith.addf %508, %507 : vector<8x128xf32>
    %510 = arith.divf %508, %509 : vector<8x128xf32>
    %511 = vector.extract_strided_slice %498 {offsets = [0, 128], sizes = [8, 128], strides = [1, 1]} : vector<8x384xf32> to vector<8x128xf32>
    %512 = vector.extract_strided_slice %502 {offsets = [0, 128], sizes = [8, 128], strides = [1, 1]} : vector<8x384xf32> to vector<8x128xf32>
    %513 = arith.addf %511, %512 : vector<8x128xf32>
    %514 = arith.negf %513 : vector<8x128xf32>
    %515 = math.exp %514 : vector<8x128xf32>
    %cst_171 = arith.constant 1.000000e+00 : f32
    %516 = vector.broadcast %cst_171 : f32 to vector<8x128xf32>
    %517 = arith.addf %516, %515 : vector<8x128xf32>
    %518 = arith.divf %516, %517 : vector<8x128xf32>
    %519 = vector.extract_strided_slice %498 {offsets = [0, 256], sizes = [8, 128], strides = [1, 1]} : vector<8x384xf32> to vector<8x128xf32>
    %520 = vector.extract_strided_slice %502 {offsets = [0, 256], sizes = [8, 128], strides = [1, 1]} : vector<8x384xf32> to vector<8x128xf32>
    %521 = arith.mulf %510, %520 : vector<8x128xf32>
    %522 = arith.addf %519, %521 : vector<8x128xf32>
    %523 = math.tanh %522 : vector<8x128xf32>
    %cst_172 = arith.constant 1.000000e+00 : f32
    %524 = vector.broadcast %cst_172 : f32 to vector<8x128xf32>
    %525 = arith.subf %524, %518 : vector<8x128xf32>
    %526 = arith.mulf %525, %523 : vector<8x128xf32>
    %527 = arith.mulf %518, %496 : vector<8x128xf32>
    %528 = arith.addf %526, %527 : vector<8x128xf32>
    %c56_173 = arith.constant 56 : index
    %c0_174 = arith.constant 0 : index
    %529 = vector.load %arg13[%c56_173, %c0_174] : memref<64x128xf32, #tpu.memory_space<vmem>>, vector<8x128xf32>
    tpu.vector_store %arg13[%c56_173, %c0_174], %528 {strides = array<i32>} : memref<64x128xf32, #tpu.memory_space<vmem>>, vector<8x128xf32>,
    %c0_175 = arith.constant 0 : index
    %c0_176 = arith.constant 0 : index
    %530 = vector.load %arg13[%c0_175, %c0_176] : memref<64x128xf32, #tpu.memory_space<vmem>>, vector<64x128xf32>
    %c0_177 = arith.constant 0 : index
    %c0_178 = arith.constant 0 : index
    %531 = vector.load %arg9[%c0_177, %c0_178] : memref<128x128xf32, #tpu.memory_space<vmem>>, vector<128x128xf32>
    %cst_179 = arith.constant dense<0.000000e+00> : vector<64x128xf32>
    %532 = tpu.matmul %530, %531, %cst_179 {dimension_numbers = #tpu.dot_dimension_numbers<[1], [0], [0], [1], [0, 0, 1, 1], [], []>} : vector<64x128xf32>, vector<128x128xf32>, vector<64x128xf32> -> vector<64x128xf32>
    %c0_180 = arith.constant 0 : index
    %c0_181 = arith.constant 0 : index
    %533 = vector.load %arg10[%c0_180, %c0_181] : memref<1x128xf32, #tpu.memory_space<vmem>>, vector<1x128xf32>
    %534 = vector.broadcast %533 : vector<1x128xf32> to vector<64x128xf32>
    %535 = arith.addf %532, %534 : vector<64x128xf32>
    %c0_182 = arith.constant 0 : index
    %c0_183 = arith.constant 0 : index
    %536 = vector.load %arg11[%c0_182, %c0_183] : memref<64x128xf32, #tpu.memory_space<vmem>>, vector<64x128xf32>
    tpu.vector_store %arg11[%c0_182, %c0_183], %535 {strides = array<i32>} : memref<64x128xf32, #tpu.memory_space<vmem>>, vector<64x128xf32>,
    return
  }
}

</mosaic_0001>

<bundles_post_ra>
// kernel: reg_gru_forward.1
= control target key start
LH: loop header
LB: loop body
LE: loop exit
PB: predicated region body
PF: predicated region fallthrough
CT: control target
= control target key end

     0   :  { %16 = vsyncpa [#allocation5], 0  ;;  %s5140_s0 = inlined_call_operand.vmem [shape: f32[64,4], index: 0, kind: input, shape index: {}]   ;;  %s5141_s1 = inlined_call_operand.vmem [shape: f32[4,384], index: 1, kind: input, shape index: {}]   ;;  %s5142_s2 = inlined_call_operand.hbm [shape: f32[128,384], index: 2, kind: input, shape index: {}]   ;;  %s5143_s3 = inlined_call_operand.vmem [shape: f32[1,384], index: 3, kind: input, shape index: {}]   ;;  %s5144_s4 = inlined_call_operand.vmem [shape: f32[1,384], index: 4, kind: input, shape index: {}]   ;;  %s5145_s5 = inlined_call_operand.hbm [shape: f32[128,384], index: 5, kind: input, shape index: {}]   ;;  %s5146_s6 = inlined_call_operand.hbm [shape: f32[128,384], index: 6, kind: input, shape index: {}]   ;;  %s5147_s7 = inlined_call_operand.vmem [shape: f32[1,384], index: 7, kind: input, shape index: {}]   ;;  %s5148_s8 = inlined_call_operand.vmem [shape: f32[1,384], index: 8, kind: input, shape index: {}]   ;;  %s5149_s9 = inlined_call_operand.hbm [shape: f32[128,128], index: 9, kind: input, shape index: {}]   ;;  %s5150_s10 = inlined_call_operand.vmem [shape: f32[1,128], index: 10, kind: input, shape index: {}]   ;;  %s5151_s11 = inlined_call_operand.vmem [shape: f32[64,128], index: 11, kind: output, shape index: {}]  }
   0x1   :  { %17 = vsyncpa [#allocation7], 0 }
   0x2   :  { %18 = vsyncpa [#allocation10], 0  ;;  %s44_s19 = sshll.u32 %s5145_s5, 4  ;;  %s3493_s20 = smov [#allocation6]   ;;  %s45_s19 = int_to_ptr.hbm [resolvable:$true] %s44_s19 }
   0x3   :  { %s46_s21 = sshll.u32 %s3493_s20, 4  ;;  %s27_s24 = sshll.u32 %s5142_s2, 4  ;;  %s47_s21 = int_to_ptr.vmem [resolvable:$true] %s46_s21  ;;  %s28_s24 = int_to_ptr.hbm [resolvable:$true] %s27_s24 }
   0x4   :  { %s3494_s25 = smov 384   ;;  %s3495_s26 = smov 24  }
   0x5   :  { %52 = dma.hbm_to_vmem [thread:$0]  %s45_s19, 6144, %s47_s21, [#allocation7], %s3494_s25, %s3494_s25, %s3495_s26  }
   0x6   :  { %s3496_s27 = smov [#allocation4]   ;;  %s57_s12 = sshll.u32 %s5146_s6, 4  ;;  %s58_s12 = int_to_ptr.hbm [resolvable:$true] %s57_s12 }
   0x7   :  { %s29_s28 = sshll.u32 %s3496_s27, 4  ;;  %s74_s14 = sshll.u32 %s5149_s9, 4  ;;  %s30_s28 = int_to_ptr.vmem [resolvable:$true] %s29_s28  ;;  %s75_s14 = int_to_ptr.hbm [resolvable:$true] %s74_s14 }
   0x8   :  { %35 = dma.hbm_to_vmem [thread:$0]  %s28_s24, 6144, %s30_s28, [#allocation5], %s3494_s25, %s3494_s25, %s3495_s26  }
   0x9   :  { %s3497_s15 = smov [#allocation8]   ;;  %s3498_s2 = smov [#allocation9]  }
   0xa   :  { %s59_s16 = sshll.u32 %s3497_s15, 4  ;;  %s76_s17 = sshll.u32 %s3498_s2, 4  ;;  %s60_s16 = int_to_ptr.vmem [resolvable:$true] %s59_s16  ;;  %s77_s17 = int_to_ptr.vmem [resolvable:$true] %s76_s17 }
   0xb   :  { %65 = dma.hbm_to_vmem [thread:$0]  %s58_s12, 6144, %s60_s16, [#allocation7], %s3494_s25, %s3494_s25, %s3495_s26  }
   0xc   :  { %s3499_s18 = smov 128   ;;  %s3500_s19 = smov 8  }
   0xd   :  { %82 = dma.hbm_to_vmem [thread:$0]  %s75_s14, 2048, %s77_s17, [#allocation10], %s3499_s18, %s3499_s18, %s3500_s19  }
   0xe   :  { %3487 = dma.done.wait [#allocation5], 6144  }
   0xf   :  { %3488 = vsyncadd [#allocation5], 4294961152 }
  0x10   :  { %3489 = dma.done.wait [#allocation7], 12288  }
  0x11   :  { %3490 = vsyncadd [#allocation7], 4294955008 }
  0x12   :  { %3491 = dma.done.wait [#allocation10], 2048  }
  0x13   :  { %3492 = vsyncadd [#allocation10], 4294965248  ;;  %v3574_v0 = vld [vmem:[#allocation4 + $0x168] sm:$0xff]  ;;  %v3576_v1 = vld [vmem:[#allocation4 + $0x150] sm:$0xff]  ;;  %vm152_vm0 = vcmask 1043456   ;;  %vm127_vm1 = vcmask 31744  }
  0x14   :  { %365 = vmatpush.msra.mxu3 %v3574_v0  ;;  %v110_v2 = vld [vmem:[%s5141_s1 + $0x8] sm:$0xf]  ;;  %v3582_v3 = vld [vmem:[#allocation4 + $0x138] sm:$0xff]  ;;  %v3588_v5 = vld [vmem:[#allocation4 + $0x108] sm:$0xff]  ;;  %v5152_v42 = vmov 0.0  }
  0x15   :  { %123 = vst [vmem:[#allocation1 + $0x10] ss:$2 sm:$0xff] %v110_v2  ;;  %v3585_v4 = vld [vmem:[#allocation4 + $0x120] sm:$0xff]  ;;  %v3594_v6 = vld [vmem:[%s5140_s0] sm:$0xff]  ;;  %v3596_v7 = vld [vmem:[#allocation4 + $0xf0] sm:$0xff] }
  0x16   :  { %366 = vmatpush.msra.mxu3 %v3576_v1  ;;  %v3599_v9 = vld [vmem:[#allocation4 + $0x178] sm:$0xff]  ;;  %v3610_v12 = vld [vmem:[#allocation4 + $0x160] sm:$0xff]  ;;  %v3616_v14 = vld [vmem:[#allocation4 + $0x148] sm:$0xff] }
  0x17   :  { %v109_v10 = vld [vmem:[%s5141_s1] sm:$0xff]  ;;  %v3612_v13 = vld [vmem:[#allocation4 + $0xc0] sm:$0xff]  ;;  %v3618_v15 = vld [vmem:[#allocation4 + $0xa8] sm:$0xff] }
  0x18   :  { %367 = vmatpush.msra.mxu3 %v3582_v3  ;;  %v3605_v11 = vld [vmem:[#allocation4 + $0xd8] sm:$0xff]  ;;  %121 = vst [vmem:[#allocation1] ss:$2 sm:$0xff] %v109_v10  ;;  %v3622_v16 = vld [vmem:[#allocation4 + $0x130] sm:$0xff]  ;;  %v3627_v17 = vld [vmem:[%s5140_s0 + $0x8] sm:$0xff] }
  0x19   :  { %v3629_v18 = vld [vmem:[#allocation4 + $0x90] sm:$0xff]  ;;  %v3633_v20 = vld [vmem:[#allocation4 + $0x118] sm:$0xff]  ;;  %v3647_v24 = vld [vmem:[#allocation4 + $0x100] sm:$0xff] }
  0x1a   :  { %368 = vmatpush.msra.mxu3 %v3585_v4  ;;  %v3638_v21 = vld [vmem:[%s5140_s0 + $0x20] sm:$0xff]  ;;  %v3649_v25 = vld [vmem:[#allocation4 + $0x60] sm:$0xff]  ;;  %v3656_v26 = vld [vmem:[#allocation4 + $0xe8] sm:$0xff] }
  0x1b   :  { %v3640_v22 = vld [vmem:[#allocation4 + $0x78] sm:$0xff]  ;;  %v3658_v27 = vld [vmem:[#allocation4 + $0x48] sm:$0xff]  ;;  %v3665_v28 = vld [vmem:[#allocation4 + $0xd0] sm:$0xff] }
  0x1c   :  { %v126_v8 = vld.sshfl [vmem:[#allocation1 + $0x10] sm:$0xff pattern:$0x75316420]  ;;  %369 = vmatpush.msra.mxu3 %v3588_v5  ;;  %v3672_v30 = vld [vmem:[#allocation4 + $0x30] sm:$0xff]  ;;  %v3680_v31 = vld [vmem:[%s5140_s0 + $0x28] sm:$0xff] }
  0x1d   :  { %3179 = vmatpush.msk.msra.mxu2 %vm152_vm0, %v126_v8  ;;  %v3670_v29 = vld [vmem:[%s5140_s0 + $0x10] sm:$0xff]  ;;  %v3682_v32 = vld [vmem:[#allocation4 + $0xb8] sm:$0xff]  ;;  %v3692_v34 = vld [vmem:[#allocation4 + $0xa0] sm:$0xff] }
  0x1e   :  { %3180 = vmatmul.msk.f32.vlgmr.msra.gmra.mxu2 %vm127_vm1, %v3594_v6  ;;  %370 = vmatpush.msra.mxu3 %v3596_v7  ;;  %v3685_v33 = vld [vmem:[#allocation4 + $0x18] sm:$0xff]  ;;  %v3694_v35 = vld [vmem:[#allocation4] sm:$0xff]  ;;  %v3700_v36 = vld [vmem:[#allocation4 + $0x170] sm:$0xff] }
  0x1f   :  { %405 = vmatpush.msrb.mxu2 %v3599_v9  ;;  %v124_v19 = vld.sshfl [vmem:[#allocation1] sm:$0xff pattern:$0x75316420]  ;;  %v125_v23 = vld.sshfl [vmem:[#allocation1 + $0x8] sm:$0xff pattern:$0x75316420] }
  0x20   :  { %371 = vmatpush.msra.mxu3 %v3605_v11  ;;  %3220 = vmatpush.msk.msra.mxu1 %vm152_vm0, %v124_v19  ;;  %v3702_v37 = vld [vmem:[#allocation4 + $0x88] sm:$0xff]  ;;  %v3708_v38 = vld [vmem:[#allocation4 + $0x158] sm:$0xff]  ;;  %v3710_v39 = vld [vmem:[#allocation4 + $0x70] sm:$0xff] }
  0x21   :  { %406 = vmatpush.msrb.mxu2 %v3610_v12  ;;  %3166 = vmatmul.msk.f32.vlgmr.msra.gmra.mxu1 %vm127_vm1, %v3638_v21  ;;  %v3717_v40 = vld [vmem:[%s5140_s0 + $0x18] sm:$0xff]  ;;  %v3720_v41 = vld [vmem:[#allocation4 + $0x140] sm:$0xff]  ;;  %v3726_v43 = vld [vmem:[%s5140_s0 + $0x30] sm:$0xff] }
  0x22   :  { %372 = vmatpush.msra.mxu3 %v3612_v13  ;;  %3170 = vmatpush.msk.msrb.mxu1 %vm152_vm0, %v125_v23  ;;  %v3733_v44 = vld [vmem:[#allocation4 + $0x128] sm:$0xff]  ;;  %v3735_v45 = vld [vmem:[#allocation4 + $0x58] sm:$0xff]  ;;  %v3741_v46 = vld [vmem:[#allocation4 + $0x40] sm:$0xff] }
  0x23   :  { %407 = vmatpush.msrb.mxu2 %v3616_v14  ;;  %3161 = vmatpush.msk.msra.mxu0 %vm152_vm0, %v124_v19  ;;  %v3743_v47 = vld [vmem:[#allocation4 + $0x110] sm:$0xff]  ;;  %v3748_v48 = vld [vmem:[#allocation4 + $0x28] sm:$0xff]  ;;  %v3752_v49 = vld [vmem:[#allocation4 + $0xf8] sm:$0xff] }
  0x24   :  { %373 = vmatpush.msra.mxu3 %v3618_v15  ;;  %3162 = vmatmul.msk.f32.vlgmr.msra.gmra.mxu0 %vm127_vm1, %v3594_v6  ;;  %v3758_v50 = vld [vmem:[#allocation4 + $0xe0] sm:$0xff]  ;;  %v3763_v51 = vld [vmem:[%s5140_s0 + $0x38] sm:$0xff]  ;;  %v3773_v53 = vld [vmem:[#allocation4 + $0xc8] sm:$0xff] }
  0x25   :  { %408 = vmatpush.msrb.mxu2 %v3622_v16  ;;  %524 = vmatpush.msra.mxu1 %v3574_v0  ;;  %v3768_v52 = vld [vmem:[#allocation4 + $0x10] sm:$0xff]  ;;  %v3785_v55 = vld [vmem:[#allocation4 + $0x98] sm:$0xff]  ;;  %v3791_v56 = vld [vmem:[#allocation4 + $0x80] sm:$0xff] }
  0x26   :  { %3181 = vmatmul.msk.f32.gmra.mxu2 %vm127_vm1, %v3627_v17  ;;  %374 = vmatpush.msra.mxu3 %v3629_v18  ;;  %v3779_v54 = vld [vmem:[#allocation4 + $0xb0] sm:$0xff]  ;;  %v3799_v57 = vld [vmem:[#allocation4 + $0x68] sm:$0xff]  ;;  %v3811_v59 = vld [vmem:[#allocation4 + $0x38] sm:$0xff] }
  0x27   :  { %409 = vmatpush.msrb.mxu2 %v3633_v20  ;;  %683 = vmatpush.msrb.mxu0 %v3574_v0  ;;  %v3805_v58 = vld [vmem:[#allocation4 + $0x50] sm:$0xff]  ;;  %v314_v60 = vld [vmem:[#allocation4 + $0x20] sm:$0xff]  ;;  %v311_v61 = vld [vmem:[#allocation4 + $0x8] sm:$0xff] }
  0x28   :  { %375 = vmatpush.msra.mxu3 %v3640_v22  ;;  %525 = vmatpush.msra.mxu1 %v3576_v1  ;;  %v306_v2 = vld [vmem:[%s5144_s4] sm:$0x7] }
  0x29   :  { %410 = vmatpush.msrb.mxu2 %v3647_v24  ;;  %3167 = vmatmul.msk.f32.gmra.mxu1 %vm127_vm1, %v3680_v31 }
  0x2a   :  { %376 = vmatpush.msra.mxu3 %v3649_v25  ;;  %526 = vmatpush.msra.mxu1 %v3582_v3 }
  0x2b   :  { %411 = vmatpush.msrb.mxu2 %v3656_v26  ;;  %684 = vmatpush.msrb.mxu0 %v3576_v1 }
  0x2c   :  { %377 = vmatpush.msra.mxu3 %v3658_v27  ;;  %527 = vmatpush.msra.mxu1 %v3585_v4 }
  0x2d   :  { %412 = vmatpush.msrb.mxu2 %v3665_v28  ;;  %3163 = vmatmul.msk.f32.gmra.mxu0 %vm127_vm1, %v3627_v17 }
  0x2e   :  { %3182 = vmatmul.msk.f32.gmra.mxu2 %vm127_vm1, %v3670_v29  ;;  %378 = vmatpush.msra.mxu3 %v3672_v30 }
  0x2f   :  { %413 = vmatpush.msrb.mxu2 %v3682_v32  ;;  %528 = vmatpush.msra.mxu1 %v3588_v5 }
  0x30   :  { %379 = vmatpush.msra.mxu3 %v3685_v33  ;;  %685 = vmatpush.msrb.mxu0 %v3582_v3  ;;  %v111_v3 = vld [vmem:[%s5143_s3] sm:$0x7] }
  0x31   :  { %414 = vmatpush.msrb.mxu2 %v3692_v34  ;;  %529 = vmatpush.msra.mxu1 %v3596_v7 }
  0x32   :  { %380 = vmatpush.msra.mxu3 %v3694_v35  ;;  %3168 = vmatmul.msk.f32.gmra.mxu1 %vm127_vm1, %v3726_v43 }
  0x33   :  { %415 = vmatpush.msrb.mxu2 %v3702_v37  ;;  %381 = vmatmul.f32.vlgmr.msra.gmra.mxu3 %v5152_v42 }
  0x34   :  { %385 = vmatpush.msrb.mxu3 %v3700_v36  ;;  %530 = vmatpush.msra.mxu1 %v3605_v11 }
  0x35   :  { %416 = vmatpush.msrb.mxu2 %v3710_v39  ;;  %686 = vmatpush.msrb.mxu0 %v3585_v4 }
  0x36   :  { %386 = vmatpush.msrb.mxu3 %v3708_v38  ;;  %3183 = vmatmul.msk.f32.gmra.mxu2 %vm127_vm1, %v3717_v40 }
  0x37   :  { %417 = vmatpush.msrb.mxu2 %v3735_v45  ;;  %531 = vmatpush.msra.mxu1 %v3612_v13 }
  0x38   :  { %387 = vmatpush.msrb.mxu3 %v3720_v41  ;;  %687 = vmatpush.msrb.mxu0 %v3588_v5 }
  0x39   :  { %418 = vmatpush.msrb.mxu2 %v3741_v46  ;;  %532 = vmatpush.msra.mxu1 %v3618_v15 }
  0x3a   :  { %388 = vmatpush.msrb.mxu3 %v3733_v44  ;;  %3169 = vmatmul.msk.f32.gmra.mxu1 %vm127_vm1, %v3763_v51 }
  0x3b   :  { %419 = vmatpush.msrb.mxu2 %v3748_v48  ;;  %533 = vmatpush.msra.mxu1 %v3629_v18 }
  0x3c   :  { %389 = vmatpush.msrb.mxu3 %v3743_v47  ;;  %688 = vmatpush.msrb.mxu0 %v3596_v7  ;;  %v3933_v7 = vperm.slane %v306_v2, 0 }
  0x3d   :  { %420 = vmatpush.msrb.mxu2 %v3768_v52  ;;  %534 = vmatpush.msra.mxu1 %v3640_v22 }
  0x3e   :  { %390 = vmatpush.msrb.mxu3 %v3752_v49  ;;  %3184 = vmatmul.msk.f32.gmra.mxu2 %vm127_vm1, %v3638_v21 }
  0x3f   :  { %544 = vmatpush.msra.mxu2 %v3700_v36  ;;  %535 = vmatpush.msra.mxu1 %v3649_v25 }
  0x40   :  { %391 = vmatpush.msrb.mxu3 %v3758_v50  ;;  %689 = vmatpush.msrb.mxu0 %v3605_v11 }
  0x41   :  { %545 = vmatpush.msra.mxu2 %v3708_v38  ;;  %536 = vmatpush.msra.mxu1 %v3658_v27 }
  0x42   :  { %392 = vmatpush.msrb.mxu3 %v3773_v53  ;;  %3171 = vmatmul.msk.f32.vlgmr.msrb.gmra.mxu1 %vm127_vm1, %v3594_v6  ;;  %v3931_v6 = vperm.slane %v111_v3, 0 }
  0x43   :  { %546 = vmatpush.msra.mxu2 %v3720_v41  ;;  %537 = vmatpush.msra.mxu1 %v3672_v30 }
  0x44   :  { %393 = vmatpush.msrb.mxu3 %v3779_v54  ;;  %690 = vmatpush.msrb.mxu0 %v3612_v13 }
  0x45   :  { %547 = vmatpush.msra.mxu2 %v3733_v44  ;;  %538 = vmatpush.msra.mxu1 %v3685_v33 }
  0x46   :  { %394 = vmatpush.msrb.mxu3 %v3785_v55  ;;  %3185 = vmatmul.msk.f32.gmra.mxu2 %vm127_vm1, %v3680_v31 }
  0x47   :  { %548 = vmatpush.msra.mxu2 %v3743_v47  ;;  %539 = vmatpush.msra.mxu1 %v3694_v35 }
  0x48   :  { %395 = vmatpush.msrb.mxu3 %v3791_v56  ;;  %3164 = vmatmul.msk.f32.gmra.mxu0 %vm127_vm1, %v3670_v29 }
  0x49   :  { %703 = vmatpush.msrb.mxu1 %v3700_v36  ;;  %549 = vmatpush.msra.mxu2 %v3752_v49 }
  0x4a   :  { %396 = vmatpush.msrb.mxu3 %v3799_v57  ;;  %3172 = vmatmul.msk.f32.gmra.mxu1 %vm127_vm1, %v3627_v17 }
  0x4b   :  { %704 = vmatpush.msrb.mxu1 %v3708_v38  ;;  %550 = vmatpush.msra.mxu2 %v3758_v50 }
  0x4c   :  { %397 = vmatpush.msrb.mxu3 %v3805_v58  ;;  %691 = vmatpush.msrb.mxu0 %v3618_v15  ;;  %v3941_v15 = vperm.slane %v111_v3, 2 }
  0x4d   :  { %705 = vmatpush.msrb.mxu1 %v3720_v41  ;;  %551 = vmatpush.msra.mxu2 %v3773_v53 }
  0x4e   :  { %398 = vmatpush.msrb.mxu3 %v3811_v59  ;;  %3186 = vmatmul.msk.f32.gmra.mxu2 %vm127_vm1, %v3726_v43 }
  0x4f   :  { %706 = vmatpush.msrb.mxu1 %v3733_v44  ;;  %552 = vmatpush.msra.mxu2 %v3779_v54 }
  0x50   :  { %399 = vmatpush.msrb.mxu3 %v314_v60  ;;  %692 = vmatpush.msrb.mxu0 %v3629_v18 }
  0x51   :  { %707 = vmatpush.msrb.mxu1 %v3743_v47  ;;  %553 = vmatpush.msra.mxu2 %v3785_v55 }
  0x52   :  { %400 = vmatpush.msrb.mxu3 %v311_v61  ;;  %693 = vmatpush.msrb.mxu0 %v3640_v22 }
  0x53   :  { %401 = vmatmul.f32.vlgmr.msrb.gmra.mxu3 %v5152_v42  ;;  %3173 = vmatmul.msk.f32.gmra.mxu1 %vm127_vm1, %v3670_v29 }
  0x54   :  { %564 = vmatpush.msra.mxu3 %v3599_v9  ;;  %708 = vmatpush.msrb.mxu1 %v3752_v49 }
  0x55   :  { %694 = vmatpush.msrb.mxu0 %v3649_v25  ;;  %554 = vmatpush.msra.mxu2 %v3791_v56  ;;  %v3951_v25 = vperm.slane %v111_v3, 1 }
  0x56   :  { %565 = vmatpush.msra.mxu3 %v3610_v12  ;;  %3187 = vmatmul.msk.f32.gmra.mxu2 %vm127_vm1, %v3763_v51 }
  0x57   :  { %709 = vmatpush.msrb.mxu1 %v3758_v50  ;;  %3165 = vmatmul.msk.f32.gmra.mxu0 %vm127_vm1, %v3717_v40 }
  0x58   :  { %566 = vmatpush.msra.mxu3 %v3616_v14  ;;  %555 = vmatpush.msra.mxu2 %v3799_v57 }
  0x59   :  { %710 = vmatpush.msrb.mxu1 %v3773_v53  ;;  %695 = vmatpush.msrb.mxu0 %v3658_v27 }
  0x5a   :  { %567 = vmatpush.msra.mxu3 %v3622_v16  ;;  %556 = vmatpush.msra.mxu2 %v3805_v58 }
  0x5b   :  { %711 = vmatpush.msrb.mxu1 %v3779_v54  ;;  %696 = vmatpush.msrb.mxu0 %v3672_v30 }
  0x5c   :  { %568 = vmatpush.msra.mxu3 %v3633_v20  ;;  %3174 = vmatmul.msk.f32.gmra.mxu1 %vm127_vm1, %v3717_v40 }
  0x5d   :  { %712 = vmatpush.msrb.mxu1 %v3785_v55  ;;  %557 = vmatpush.msra.mxu2 %v3811_v59 }
  0x5e   :  { %569 = vmatpush.msra.mxu3 %v3647_v24  ;;  %421 = vmatmul.f32.vlgmr.msrb.gmra.mxu2 %v5152_v42 }
  0x5f   :  { %713 = vmatpush.msrb.mxu1 %v3791_v56  ;;  %697 = vmatpush.msrb.mxu0 %v3685_v33  ;;  %v3956_v33 = vperm.slane %v306_v2, 1 }
  0x60   :  { %570 = vmatpush.msra.mxu3 %v3656_v26  ;;  %558 = vmatpush.msra.mxu2 %v314_v60 }
  0x61   :  { %714 = vmatpush.msrb.mxu1 %v3799_v57  ;;  %698 = vmatpush.msrb.mxu0 %v3694_v35  ;;  %5167 = vst [vmem:[#allocation20_spill] sm:$0xff] %v3956_v33 }
  0x62   :  { %571 = vmatpush.msra.mxu3 %v3665_v28  ;;  %559 = vmatpush.msra.mxu2 %v311_v61 }
  0x63   :  { %715 = vmatpush.msrb.mxu1 %v3805_v58  ;;  %862 = vmatpush.msra.mxu0 %v3700_v36 }
  0x64   :  { %572 = vmatpush.msra.mxu3 %v3682_v32  ;;  %3175 = vmatmul.msk.f32.gmra.mxu1 %vm127_vm1, %v3638_v21 }
  0x65   :  { %723 = vmatpush.msrb.mxu2 %v3599_v9  ;;  %716 = vmatpush.msrb.mxu1 %v3811_v59 }
  0x66   :  { %573 = vmatpush.msra.mxu3 %v3692_v34  ;;  %863 = vmatpush.msra.mxu0 %v3708_v38 }
  0x67   :  { %724 = vmatpush.msrb.mxu2 %v3610_v12  ;;  %717 = vmatpush.msrb.mxu1 %v314_v60 }
  0x68   :  { %574 = vmatpush.msra.mxu3 %v3702_v37  ;;  %864 = vmatpush.msra.mxu0 %v3720_v41 }
  0x69   :  { %725 = vmatpush.msrb.mxu2 %v3616_v14  ;;  %718 = vmatpush.msrb.mxu1 %v311_v61 }
  0x6a   :  { %575 = vmatpush.msra.mxu3 %v3710_v39  ;;  %865 = vmatpush.msra.mxu0 %v3733_v44 }
  0x6b   :  { %726 = vmatpush.msrb.mxu2 %v3622_v16 }
  0x6c   :  { %576 = vmatpush.msra.mxu3 %v3735_v45  ;;  %3176 = vmatmul.msk.f32.gmra.mxu1 %vm127_vm1, %v3680_v31 }
  0x6d   :  { %727 = vmatpush.msrb.mxu2 %v3633_v20  ;;  %866 = vmatpush.msra.mxu0 %v3743_v47 }
  0x6e   :  { %577 = vmatpush.msra.mxu3 %v3741_v46 }
  0x6f   :  { %728 = vmatpush.msrb.mxu2 %v3647_v24  ;;  %867 = vmatpush.msra.mxu0 %v3752_v49 }
  0x70   :  { %578 = vmatpush.msra.mxu3 %v3748_v48 }
  0x71   :  { %729 = vmatpush.msrb.mxu2 %v3656_v26  ;;  %868 = vmatpush.msra.mxu0 %v3758_v50 }
  0x72   :  { %579 = vmatpush.msra.mxu3 %v3768_v52 }
  0x73   :  { %730 = vmatpush.msrb.mxu2 %v3665_v28  ;;  %869 = vmatpush.msra.mxu0 %v3773_v53  ;;  %v3963_v53 = vperm.slane %v306_v2, 2 }
  0x74   :  { %3177 = vmatmul.msk.f32.gmra.mxu1 %vm127_vm1, %v3726_v43 }
  0x75   :  { %731 = vmatpush.msrb.mxu2 %v3682_v32  ;;  %870 = vmatpush.msra.mxu0 %v3779_v54 }
  0x77   :  { %732 = vmatpush.msrb.mxu2 %v3692_v34  ;;  %871 = vmatpush.msra.mxu0 %v3785_v55 }
  0x79   :  { %733 = vmatpush.msrb.mxu2 %v3702_v37  ;;  %872 = vmatpush.msra.mxu0 %v3791_v56 }
  0x7b   :  { %734 = vmatpush.msrb.mxu2 %v3710_v39  ;;  %873 = vmatpush.msra.mxu0 %v3799_v57 }
  0x7c   :  { %3178 = vmatmul.msk.f32.gmra.mxu1 %vm127_vm1, %v3763_v51 }
  0x7d   :  { %735 = vmatpush.msrb.mxu2 %v3735_v45 }
  0x7f   :  { %736 = vmatpush.msrb.mxu2 %v3741_v46 }
  0x81   :  { %737 = vmatpush.msrb.mxu2 %v3748_v48 }
  0x83   :  { %738 = vmatpush.msrb.mxu2 %v3768_v52 }
  0x9e   :  { %v3919_v0 = vpop.f32.mrf.mxu1 }
  0xa1   :  { %v258_v62 = vpop.f32.mrf.mxu2  ;;  %v176_v5 = vpop.f32.mrf.mxu0 }
  0xa2   :  { %v177_v8 = vadd.f32 %v176_v5, %v3931_v6 }
  0xa6   :  { %v3929_v4 = vpop.f32.mrf.mxu1 }
  0xa7   :  { %5161 = vst [vmem:[#allocation14_spill] sm:$0xff] %v3929_v4 }
  0xa9   :  { %v3917_v63 = vpop.f32.mrf.mxu2 }
  0xaf   :  { %v3939_v14 = vpop.f32.mrf.mxu1 }
  0xb0   :  { %5162 = vst [vmem:[#allocation15_spill] sm:$0xff] %v3939_v14  ;;  %v4217_v14 = vld [vmem:[#allocation4 + $0x58] sm:$0xff] }
  0xb1   :  { %v3921_v1 = vpop.f32.mrf.mxu2 }
  0xb6   :  { %v382_v9 = vpop.f32.mrf.mxu3 }
  0xb7   :  { %v383_v10 = vadd.f32 %v382_v9, %v3933_v7  ;;  %v3946_v19 = vpop.f32.mrf.mxu1  ;;  %v259_v9 = vadd.f32 %v258_v62, %v3941_v15 }
  0xb8   :  { %5164 = vst [vmem:[#allocation17_spill] sm:$0xff] %v3946_v19 }
  0xb9   :  { %v3937_v11 = vpop.f32.mrf.mxu2  ;;  %v425_v12 = vadd.f32 %v383_v10, %v177_v8 }
  0xbb   :  { %v3188_v13 = vmul.f32 -1.442695, %v425_v12 }
  0xbd   :  { %3231 = vpow2.f32 %v3188_v13 }
  0xbf   :  { %v217_v29 = vpop.f32.mrf.mxu1 }
  0xc0   :  { %v218_v35 = vadd.f32 %v217_v29, %v3951_v25 }
  0xc1   :  { %v270_v16 = vpop.f32.mrf.mxu2 }
  0xc2   :  { %v3944_v17 = vadd.f32 %v270_v16, %v3941_v15 }
  0xc3   :  { %v3232_v18 = vpop.eup %3231 }
  0xc4   :  { %5163 = vst [vmem:[#allocation16_spill] sm:$0xff] %v3944_v17  ;;  %v429_v21 = vadd.f32 1.0, %v3232_v18 }
  0xc6   :  { %3233 = vrcp.f32 %v429_v21  ;;  %vm435_vm2 = vweird.f32 %v429_v21  ;;  %v441_v51 = vand.u32 2147483648, %v429_v21  ;;  %v439_v55 = vand.u32 2147483647, %v429_v21 }
  0xc8   :  { %v442_v59 = vor.u32 1.1754944e-38, %v441_v51  ;;  %vm440_vm5 = vcmp.eq.f32.partialorder %v439_v55, 8.507059e+37 }
  0xc9   :  { %v273_v22 = vpop.f32.mrf.mxu2 }
  0xca   :  { %v3949_v23 = vadd.f32 %v273_v22, %v3941_v15 }
  0xcc   :  { %5165 = vst [vmem:[#allocation18_spill] sm:$0xff] %v3949_v23  ;;  %v3234_v30 = vpop.eup %3233 }
  0xcd   :  { %v431_v38 = vmul.f32 %v3234_v30, %v429_v21  ;;  %vm436_vm3 = vweird.f32 %v3234_v30 }
  0xce   :  { %vm437_vm4 = vmor %vm435_vm2, %vm436_vm3 }
  0xcf   :  { %v432_v44 = vsub.f32 1.0, %v431_v38 }
  0xd1   :  { %v276_v27 = vpop.f32.mrf.mxu2  ;;  %v433_v50 = vmul.f32 %v3234_v30, %v432_v44 }
  0xd2   :  { %v3954_v31 = vadd.f32 %v276_v27, %v3941_v15 }
  0xd3   :  { %v434_v54 = vadd.f32 %v3234_v30, %v433_v50 }
  0xd4   :  { %5166 = vst [vmem:[#allocation19_spill] sm:$0xff] %v3954_v31  ;;  %v4199_v31 = vld [vmem:[#allocation4 + $0xa0] sm:$0xff] }
  0xd5   :  { %v438_v61 = vsel %vm437_vm4, %v3234_v30, %v434_v54  ;;  %v179_v54 = vpop.f32.mrf.mxu0 }
  0xd6   :  { %v402_v36 = vpop.f32.mrf.mxu3  ;;  %v443_v3 = vsel %vm440_vm5, %v442_v59, %v438_v61  ;;  %v180_v55 = vadd.f32 %v179_v54, %v3931_v6 }
  0xd7   :  { %v403_v40 = vadd.f32 %v402_v36, %v3956_v33 }
  0xd9   :  { %v445_v41 = vadd.f32 %v403_v40, %v218_v35  ;;  %v279_v43 = vpop.f32.mrf.mxu2  ;;  %v220_v40 = vpop.f32.mrf.mxu1 }
  0xda   :  { %v3961_v49 = vadd.f32 %v279_v43, %v3941_v15  ;;  %v221_v61 = vadd.f32 %v220_v40, %v3951_v25 }
  0xdb   :  { %v3189_v47 = vmul.f32 -1.442695, %v445_v41 }
  0xdc   :  { %5168 = vst [vmem:[#allocation21_spill] sm:$0xff] %v3961_v49 }
  0xdd   :  { %3235 = vpow2.f32 %v3189_v47 }
  0xe1   :  { %v422_v57 = vpop.f32.mrf.mxu2  ;;  %v3972_v41 = vpop.f32.mrf.mxu1 }
  0xe2   :  { %v423_v60 = vadd.f32 %v422_v57, %v3963_v53 }
  0xe3   :  { %v3236_v56 = vpop.eup %3235 }
  0xe4   :  { %v449_v58 = vadd.f32 1.0, %v3236_v56  ;;  %v465_v5 = vmul.f32 %v443_v3, %v423_v60 }
  0xe6   :  { %3237 = vrcp.f32 %v449_v58  ;;  %v466_v2 = vadd.f32 %v465_v5, %v259_v9  ;;  %v461_v13 = vand.u32 2147483648, %v449_v58  ;;  %v459_v18 = vand.u32 2147483647, %v449_v58 }
  0xe7   :  { %vm455_vm7 = vweird.f32 %v449_v58 }
  0xe8   :  { %3239 = vtanh.f32 %v466_v2  ;;  %v462_v22 = vor.u32 1.1754944e-38, %v461_v13  ;;  %vm460_vm9 = vcmp.eq.f32.partialorder %v459_v18, 8.507059e+37 }
  0xe9   :  { %v3974_v43 = vpop.f32.mrf.mxu1 }
  0xec   :  { %v3238_v8 = vpop.eup %3237 }
  0xed   :  { %v451_v10 = vmul.f32 %v3238_v8, %v449_v58  ;;  %vm456_vm6 = vweird.f32 %v3238_v8 }
  0xee   :  { %vm457_vm8 = vmor %vm455_vm7, %vm456_vm6  ;;  %v3240_v35 = vpop.eup %3239 }
  0xef   :  { %v452_v12 = vsub.f32 1.0, %v451_v10 }
  0xf1   :  { %v453_v16 = vmul.f32 %v3238_v8, %v452_v12  ;;  %v3976_v44 = vpop.f32.mrf.mxu1 }
  0xf3   :  { %v454_v21 = vadd.f32 %v3238_v8, %v453_v16 }
  0xf5   :  { %v458_v27 = vsel %vm457_vm8, %v3238_v8, %v454_v21 }
  0xf6   :  { %v463_v29 = vsel %vm460_vm9, %v462_v22, %v458_v27 }
  0xf7   :  { %v468_v30 = vsub.f32 1.0, %v463_v29  ;;  %v470_v38 = vmul.f32 0.0, %v463_v29 }
  0xf9   :  { %v469_v36 = vmul.f32 %v3240_v35, %v468_v30  ;;  %v3978_v47 = vpop.f32.mrf.mxu1 }
  0xfa   :  { %5170 = vst [vmem:[#allocation23_spill] sm:$0xff] %v3978_v47 }
  0xfb   :  { %v3967_v62 = vadd.f32 %v470_v38, %v469_v36 }
  0xfd   :  { %5169 = vst [vmem:[#allocation22_spill] sm:$0xff] %v3967_v62  ;;  %540 = vmatmul.f32.vlgmr.msra.gmra.mxu1 %v3967_v62  ;;  %560 = vmatmul.f32.vlgmr.msra.gmra.mxu2 %v3967_v62 }
  0xfe   :  { %580 = vmatmul.f32.vlgmr.msra.gmra.mxu3 %v3967_v62 }
 0x101   :  { %v3980_v50 = vpop.f32.mrf.mxu1 }
 0x102   :  { %5171 = vst [vmem:[#allocation24_spill] sm:$0xff] %v3980_v50  ;;  %v4209_v50 = vld [vmem:[#allocation4 + $0x68] sm:$0xff] }
 0x109   :  { %v3982_v51 = vpop.f32.mrf.mxu1 }
 0x10a   :  { %5172 = vst [vmem:[#allocation25_spill] sm:$0xff] %v3982_v51  ;;  %v4197_v51 = vld [vmem:[#allocation4 + $0x98] sm:$0xff] }
 0x17a   :  { %v541_v56 = vpop.f32.mrf.mxu1 }
 0x17b   :  { %v542_v57 = vadd.f32 %v541_v56, %v3933_v7  ;;  %v262_v56 = vadd.f32 %v3917_v63, %v3941_v15 }
 0x17d   :  { %v584_v58 = vadd.f32 %v542_v57, %v180_v55 }
 0x17f   :  { %v3190_v59 = vmul.f32 -1.442695, %v584_v58 }
 0x180   :  { %v561_v60 = vpop.f32.mrf.mxu2 }
 0x181   :  { %3241 = vpow2.f32 %v3190_v59  ;;  %v562_v3 = vadd.f32 %v561_v60, %v3956_v33  ;;  %v581_v30 = vpop.f32.mrf.mxu3 }
 0x182   :  { %v582_v54 = vadd.f32 %v581_v30, %v3963_v53  ;;  %v4010_v30 = vld [vmem:[#allocation4 + $0x138] sm:$0xff] }
 0x183   :  { %v604_v5 = vadd.f32 %v562_v3, %v221_v61 }
 0x185   :  { %v3191_v8 = vmul.f32 -1.442695, %v604_v5 }
 0x187   :  { %v3242_v9 = vpop.eup %3241  ;;  %3243 = vpow2.f32 %v3191_v8 }
 0x188   :  { %v588_v10 = vadd.f32 1.0, %v3242_v9 }
 0x18a   :  { %3245 = vrcp.f32 %v588_v10  ;;  %v600_v21 = vand.u32 2147483648, %v588_v10  ;;  %v598_v27 = vand.u32 2147483647, %v588_v10  ;;  %vm594_vm11 = vweird.f32 %v588_v10 }
 0x18c   :  { %v601_v38 = vor.u32 1.1754944e-38, %v600_v21  ;;  %vm599_vm13 = vcmp.eq.f32.partialorder %v598_v27, 8.507059e+37  ;;  %v3997_v21 = vld [vmem:[#allocation4 + $0x168] sm:$0xff]  ;;  %v4003_v27 = vld [vmem:[#allocation4 + $0x150] sm:$0xff] }
 0x18d   :  { %v3244_v2 = vpop.eup %3243  ;;  %842 = vmatpush.msrb.mxu3 %v3997_v21  ;;  %1001 = vmatpush.msra.mxu2 %v3997_v21 }
 0x18e   :  { %v608_v12 = vadd.f32 1.0, %v3244_v2 }
 0x18f   :  { %843 = vmatpush.msrb.mxu3 %v4003_v27  ;;  %1002 = vmatpush.msra.mxu2 %v4003_v27 }
 0x190   :  { %v3246_v13 = vpop.eup %3245  ;;  %3247 = vrcp.f32 %v608_v12  ;;  %v620_v59 = vand.u32 2147483648, %v608_v12  ;;  %v618_v61 = vand.u32 2147483647, %v608_v12  ;;  %vm614_vm15 = vweird.f32 %v608_v12 }
 0x191   :  { %v590_v16 = vmul.f32 %v3246_v13, %v588_v10  ;;  %vm595_vm10 = vweird.f32 %v3246_v13  ;;  %844 = vmatpush.msrb.mxu3 %v4010_v30  ;;  %1003 = vmatpush.msra.mxu2 %v4010_v30 }
 0x192   :  { %vm596_vm12 = vmor %vm594_vm11, %vm595_vm10  ;;  %v621_v8 = vor.u32 1.1754944e-38, %v620_v59  ;;  %vm619_vm1 = vcmp.eq.f32.partialorder %v618_v61, 8.507059e+37 }
 0x193   :  { %v591_v18 = vsub.f32 1.0, %v590_v16 }
 0x195   :  { %v592_v22 = vmul.f32 %v3246_v13, %v591_v18 }
 0x196   :  { %v3248_v29 = vpop.eup %3247 }
 0x197   :  { %v610_v35 = vmul.f32 %v3248_v29, %v608_v12  ;;  %v593_v36 = vadd.f32 %v3246_v13, %v592_v22  ;;  %vm615_vm14 = vweird.f32 %v3248_v29  ;;  %v182_v12 = vpop.f32.mrf.mxu0  ;;  %v3999_v22 = vld [vmem:[#allocation4 + $0x178] sm:$0xff] }
 0x198   :  { %vm616_vm0 = vmor %vm614_vm15, %vm615_vm14  ;;  %882 = vmatpush.msra.mxu1 %v3999_v22  ;;  %v183_v59 = vadd.f32 %v182_v12, %v3931_v6  ;;  %v4094_v12 = vld [vmem:[#allocation4] sm:$0xff] }
 0x199   :  { %v611_v40 = vsub.f32 1.0, %v610_v35  ;;  %v597_v55 = vsel %vm596_vm12, %v3246_v13, %v593_v36  ;;  %v4012_v35 = vld [vmem:[#allocation4 + $0x148] sm:$0xff] }
 0x19a   :  { %v602_v57 = vsel %vm599_vm13, %v601_v38, %v597_v55  ;;  %v4019_v38 = vld [vmem:[#allocation4 + $0x120] sm:$0xff]  ;;  %v4031_v55 = vld [vmem:[#allocation4 + $0xf0] sm:$0xff] }
 0x19b   :  { %v612_v58 = vmul.f32 %v3248_v29, %v611_v40  ;;  %v624_v60 = vmul.f32 %v602_v57, %v582_v54  ;;  %v4021_v40 = vld [vmem:[#allocation4 + $0x130] sm:$0xff]  ;;  %845 = vmatpush.msrb.mxu3 %v4019_v38  ;;  %v4026_v54 = vld [vmem:[#allocation4 + $0x108] sm:$0xff]  ;;  %1004 = vmatpush.msra.mxu2 %v4019_v38  ;;  %v4041_v57 = vld [vmem:[#allocation4 + $0xc0] sm:$0xff] }
 0x19d   :  { %v613_v3 = vadd.f32 %v3248_v29, %v612_v58  ;;  %v625_v5 = vadd.f32 %v624_v60, %v262_v56  ;;  %846 = vmatpush.msrb.mxu3 %v4026_v54  ;;  %1005 = vmatpush.msra.mxu2 %v4026_v54  ;;  %v4036_v56 = vld [vmem:[#allocation4 + $0xd8] sm:$0xff] }
 0x19f   :  { %v617_v9 = vsel %vm616_vm0, %v3248_v29, %v613_v3  ;;  %3249 = vtanh.f32 %v625_v5  ;;  %v4005_v29 = vld [vmem:[#allocation4 + $0x160] sm:$0xff]  ;;  %v4015_v36 = vpop.f32.mrf.mxu0  ;;  %847 = vmatpush.msrb.mxu3 %v4031_v55  ;;  %1006 = vmatpush.msra.mxu2 %v4031_v55 }
 0x1a0   :  { %v622_v10 = vsel %vm619_vm1, %v621_v8, %v617_v9  ;;  %883 = vmatpush.msra.mxu1 %v4005_v29  ;;  %v4061_v9 = vld [vmem:[#allocation4 + $0x78] sm:$0xff] }
 0x1a1   :  { %v627_v2 = vsub.f32 1.0, %v622_v10  ;;  %v629_v63 = vmul.f32 %v622_v10, %v3967_v62  ;;  %848 = vmatpush.msrb.mxu3 %v4036_v56  ;;  %1007 = vmatpush.msra.mxu2 %v4036_v56  ;;  %v4073_v10 = vld [vmem:[#allocation4 + $0x50] sm:$0xff] }
 0x1a2   :  { %884 = vmatpush.msra.mxu1 %v4012_v35  ;;  %874 = vmatpush.msra.mxu0 %v4073_v10  ;;  %v4238_v62 = vld [vmem:[#allocation4 + $0x10] sm:$0xff] }
 0x1a3   :  { %849 = vmatpush.msrb.mxu3 %v4041_v57  ;;  %1008 = vmatpush.msra.mxu2 %v4041_v57 }
 0x1a4   :  { %885 = vmatpush.msra.mxu1 %v4021_v40 }
 0x1a5   :  { %v3250_v13 = vpop.eup %3249 }
 0x1a6   :  { %v628_v16 = vmul.f32 %v3250_v13, %v627_v2  ;;  %886 = vmatpush.msra.mxu1 %v3633_v20  ;;  %v4081_v2 = vld [vmem:[#allocation4 + $0x38] sm:$0xff] }
 0x1a7   :  { %875 = vmatpush.msra.mxu0 %v4081_v2  ;;  %v4087_v13 = vld [vmem:[#allocation4 + $0x18] sm:$0xff] }
 0x1a8   :  { %v3992_v18 = vadd.f32 %v629_v63, %v628_v16  ;;  %887 = vmatpush.msra.mxu1 %v3647_v24  ;;  %v224_v24 = vadd.f32 %v3972_v41, %v3951_v25  ;;  %v4089_v16 = vld [vmem:[#allocation4 + $0x20] sm:$0xff] }
 0x1a9   :  { %876 = vmatpush.msra.mxu0 %v4089_v16 }
 0x1aa   :  { %5173 = vst [vmem:[#allocation26_spill] sm:$0xff] %v3992_v18  ;;  %699 = vmatmul.f32.vlgmr.msrb.gmra.mxu0 %v3992_v18  ;;  %719 = vmatmul.f32.vlgmr.msrb.gmra.mxu1 %v3992_v18 }
 0x1ab   :  { %739 = vmatmul.f32.vlgmr.msrb.gmra.mxu2 %v3992_v18  ;;  %888 = vmatpush.msra.mxu1 %v3656_v26  ;;  %v4051_v26 = vld [vmem:[#allocation4 + $0xa8] sm:$0xff] }
 0x1ac   :  { %850 = vmatpush.msrb.mxu3 %v4051_v26  ;;  %1009 = vmatpush.msra.mxu2 %v4051_v26 }
 0x1ad   :  { %889 = vmatpush.msra.mxu1 %v3665_v28  ;;  %v4056_v28 = vld [vmem:[#allocation4 + $0x90] sm:$0xff] }
 0x1ae   :  { %851 = vmatpush.msrb.mxu3 %v4056_v28  ;;  %1010 = vmatpush.msra.mxu2 %v4056_v28 }
 0x1af   :  { %890 = vmatpush.msra.mxu1 %v3682_v32  ;;  %v4066_v32 = vld [vmem:[#allocation4 + $0x60] sm:$0xff] }
 0x1b0   :  { %852 = vmatpush.msrb.mxu3 %v4061_v9  ;;  %1011 = vmatpush.msra.mxu2 %v4061_v9 }
 0x1b1   :  { %891 = vmatpush.msra.mxu1 %v3692_v34  ;;  %v4071_v34 = vld [vmem:[#allocation4 + $0x48] sm:$0xff] }
 0x1b2   :  { %853 = vmatpush.msrb.mxu3 %v4066_v32  ;;  %1012 = vmatpush.msra.mxu2 %v4066_v32 }
 0x1b3   :  { %892 = vmatpush.msra.mxu1 %v3702_v37  ;;  %v4079_v37 = vld [vmem:[#allocation4 + $0x30] sm:$0xff] }
 0x1b4   :  { %854 = vmatpush.msrb.mxu3 %v4071_v34  ;;  %1013 = vmatpush.msra.mxu2 %v4071_v34 }
 0x1b5   :  { %893 = vmatpush.msra.mxu1 %v3710_v39 }
 0x1b6   :  { %855 = vmatpush.msrb.mxu3 %v4079_v37  ;;  %1014 = vmatpush.msra.mxu2 %v4079_v37 }
 0x1b7   :  { %894 = vmatpush.msra.mxu1 %v3735_v45 }
 0x1b8   :  { %856 = vmatpush.msrb.mxu3 %v4087_v13  ;;  %1015 = vmatpush.msra.mxu2 %v4087_v13 }
 0x1b9   :  { %895 = vmatpush.msra.mxu1 %v3741_v46 }
 0x1ba   :  { %857 = vmatpush.msrb.mxu3 %v4094_v12  ;;  %1016 = vmatpush.msra.mxu2 %v4094_v12 }
 0x1bb   :  { %896 = vmatpush.msra.mxu1 %v3748_v48 }
 0x1bd   :  { %897 = vmatpush.msra.mxu1 %v3768_v52 }
 0x1bf   :  { %1160 = vmatpush.msrb.mxu1 %v3997_v21 }
 0x1c1   :  { %1161 = vmatpush.msrb.mxu1 %v4003_v27 }
 0x1c3   :  { %1162 = vmatpush.msrb.mxu1 %v4010_v30 }
 0x1c5   :  { %1163 = vmatpush.msrb.mxu1 %v4019_v38 }
 0x1c7   :  { %1164 = vmatpush.msrb.mxu1 %v4026_v54 }
 0x1c9   :  { %1165 = vmatpush.msrb.mxu1 %v4031_v55 }
 0x1cb   :  { %1166 = vmatpush.msrb.mxu1 %v4036_v56 }
 0x1cd   :  { %1167 = vmatpush.msrb.mxu1 %v4041_v57 }
 0x1cf   :  { %1168 = vmatpush.msrb.mxu1 %v4051_v26 }
 0x1d1   :  { %1169 = vmatpush.msrb.mxu1 %v4056_v28 }
 0x1d3   :  { %1170 = vmatpush.msrb.mxu1 %v4061_v9 }
 0x1d5   :  { %1171 = vmatpush.msrb.mxu1 %v4066_v32 }
 0x1d7   :  { %1172 = vmatpush.msrb.mxu1 %v4071_v34 }
 0x1d9   :  { %1173 = vmatpush.msrb.mxu1 %v4079_v37 }
 0x1db   :  { %1174 = vmatpush.msrb.mxu1 %v4087_v13 }
 0x1dd   :  { %1175 = vmatpush.msrb.mxu1 %v4094_v12 }
 0x227   :  { %v700_v20 = vpop.f32.mrf.mxu0  ;;  %v720_v58 = vpop.f32.mrf.mxu1 }
 0x228   :  { %v701_v60 = vadd.f32 %v700_v20, %v3933_v7  ;;  %v721_v61 = vadd.f32 %v720_v58, %v3956_v33  ;;  %v4096_v20 = vld [vmem:[#allocation4 + $0x8] sm:$0xff] }
 0x229   :  { %877 = vmatpush.msra.mxu0 %v4096_v20 }
 0x22a   :  { %v743_v3 = vadd.f32 %v701_v60, %v183_v59  ;;  %v763_v5 = vadd.f32 %v721_v61, %v224_v24 }
 0x22b   :  { %1041 = vmatpush.msrb.mxu0 %v3999_v22 }
 0x22c   :  { %v3192_v41 = vmul.f32 -1.442695, %v743_v3  ;;  %v3193_v8 = vmul.f32 -1.442695, %v763_v5 }
 0x22d   :  { %1042 = vmatpush.msrb.mxu0 %v4005_v29 }
 0x22e   :  { %3251 = vpow2.f32 %v3192_v41 }
 0x22f   :  { %3253 = vpow2.f32 %v3193_v8  ;;  %1043 = vmatpush.msrb.mxu0 %v4012_v35  ;;  %v740_v8 = vpop.f32.mrf.mxu2 }
 0x230   :  { %v741_v42 = vadd.f32 %v740_v8, %v3963_v53  ;;  %v4142_v8 = vld [vmem:[#allocation4 + $0x140] sm:$0xff] }
 0x231   :  { %1044 = vmatpush.msrb.mxu0 %v4021_v40 }
 0x234   :  { %v3252_v39 = vpop.eup %3251 }
 0x235   :  { %v3254_v45 = vpop.eup %3253  ;;  %v747_v63 = vadd.f32 1.0, %v3252_v39 }
 0x236   :  { %v767_v58 = vadd.f32 1.0, %v3254_v45 }
 0x237   :  { %3255 = vrcp.f32 %v747_v63  ;;  %v759_v61 = vand.u32 2147483648, %v747_v63  ;;  %v757_v5 = vand.u32 2147483647, %v747_v63  ;;  %vm753_vm3 = vweird.f32 %v747_v63 }
 0x238   :  { %3257 = vrcp.f32 %v767_v58  ;;  %vm773_vm7 = vweird.f32 %v767_v58 }
 0x239   :  { %v760_v45 = vor.u32 1.1754944e-38, %v759_v61  ;;  %vm758_vm5 = vcmp.eq.f32.partialorder %v757_v5, 8.507059e+37 }
 0x23d   :  { %v3256_v46 = vpop.eup %3255 }
 0x23e   :  { %v3258_v48 = vpop.eup %3257  ;;  %v749_v24 = vmul.f32 %v3256_v46, %v747_v63  ;;  %vm754_vm2 = vweird.f32 %v3256_v46  ;;  %v777_v63 = vand.u32 2147483647, %v767_v58 }
 0x23f   :  { %v769_v52 = vmul.f32 %v3258_v48, %v767_v58  ;;  %vm755_vm4 = vmor %vm753_vm3, %vm754_vm2  ;;  %vm774_vm6 = vweird.f32 %v3258_v48 }
 0x240   :  { %v750_v59 = vsub.f32 1.0, %v749_v24  ;;  %vm775_vm8 = vmor %vm773_vm7, %vm774_vm6  ;;  %vm778_vm9 = vcmp.eq.f32.partialorder %v777_v63, 8.507059e+37  ;;  %v4162_v63 = vld [vmem:[#allocation4 + $0xf8] sm:$0xff] }
 0x241   :  { %v770_v60 = vsub.f32 1.0, %v769_v52 }
 0x242   :  { %v751_v3 = vmul.f32 %v3256_v46, %v750_v59  ;;  %v265_v59 = vadd.f32 %v3921_v1, %v3941_v15 }
 0x243   :  { %v771_v41 = vmul.f32 %v3258_v48, %v770_v60  ;;  %v779_v60 = vand.u32 2147483648, %v767_v58 }
 0x244   :  { %v752_v39 = vadd.f32 %v3256_v46, %v751_v3 }
 0x245   :  { %v772_v49 = vadd.f32 %v3258_v48, %v771_v41 }
 0x246   :  { %v756_v24 = vsel %vm755_vm4, %v3256_v46, %v752_v39  ;;  %v780_v46 = vor.u32 1.1754944e-38, %v779_v60  ;;  %v4147_v39 = vld [vmem:[#allocation4 + $0x128] sm:$0xff] }
 0x247   :  { %v761_v52 = vsel %vm758_vm5, %v760_v45, %v756_v24  ;;  %v776_v3 = vsel %vm775_vm8, %v3258_v48, %v772_v49  ;;  %v4133_v49 = vld [vmem:[#allocation4 + $0x170] sm:$0xff]  ;;  %v4137_v48 = vld [vmem:[#allocation4 + $0x158] sm:$0xff] }
 0x248   :  { %v783_v19 = vmul.f32 %v761_v52, %v741_v42  ;;  %v781_v5 = vsel %vm778_vm9, %v780_v46, %v776_v3  ;;  %1021 = vmatpush.msra.mxu3 %v4133_v49  ;;  %1180 = vmatpush.msrb.mxu2 %v4133_v49  ;;  %v4152_v45 = vld [vmem:[#allocation4 + $0x110] sm:$0xff]  ;;  %v4154_v24 = vld [vmem:[#allocation4 + $0x118] sm:$0xff]  ;;  %v4170_v46 = vld [vmem:[#allocation4 + $0xe0] sm:$0xff] }
 0x249   :  { %v786_v1 = vsub.f32 1.0, %v781_v5  ;;  %v788_v41 = vmul.f32 %v781_v5, %v3992_v18  ;;  %1045 = vmatpush.msrb.mxu0 %v4154_v24  ;;  %v4172_v5 = vld [vmem:[#allocation4 + $0xe8] sm:$0xff]  ;;  %v4225_v18 = vld [vmem:[#allocation4 + $0x40] sm:$0xff] }
 0x24a   :  { %v784_v61 = vadd.f32 %v783_v19, %v265_v59  ;;  %1022 = vmatpush.msra.mxu3 %v4137_v48  ;;  %1181 = vmatpush.msrb.mxu2 %v4137_v48  ;;  %v227_v59 = vadd.f32 %v3974_v43, %v3951_v25 }
 0x24c   :  { %3259 = vtanh.f32 %v784_v61  ;;  %1023 = vmatpush.msra.mxu3 %v4142_v8  ;;  %1182 = vmatpush.msrb.mxu2 %v4142_v8  ;;  %v4164_v61 = vld [vmem:[#allocation4 + $0x100] sm:$0xff] }
 0x24d   :  { %1046 = vmatpush.msrb.mxu0 %v4164_v61 }
 0x24e   :  { %1024 = vmatpush.msra.mxu3 %v4147_v39  ;;  %1183 = vmatpush.msrb.mxu2 %v4147_v39 }
 0x24f   :  { %1047 = vmatpush.msrb.mxu0 %v4172_v5 }
 0x250   :  { %1025 = vmatpush.msra.mxu3 %v4152_v45  ;;  %1184 = vmatpush.msrb.mxu2 %v4152_v45 }
 0x252   :  { %v3260_v42 = vpop.eup %3259  ;;  %1026 = vmatpush.msra.mxu3 %v4162_v63  ;;  %1185 = vmatpush.msrb.mxu2 %v4162_v63 }
 0x253   :  { %v787_v58 = vmul.f32 %v3260_v42, %v786_v1  ;;  %v4178_v1 = vld [vmem:[#allocation4 + $0xc8] sm:$0xff]  ;;  %v4180_v42 = vld [vmem:[#allocation4 + $0xd0] sm:$0xff] }
 0x254   :  { %1027 = vmatpush.msra.mxu3 %v4170_v46  ;;  %1186 = vmatpush.msrb.mxu2 %v4170_v46 }
 0x255   :  { %v4126_v19 = vadd.f32 %v788_v41, %v787_v58  ;;  %1048 = vmatpush.msrb.mxu0 %v4180_v42  ;;  %v186_v41 = vadd.f32 %v4015_v36, %v3931_v6 }
 0x256   :  { %1028 = vmatpush.msra.mxu3 %v4178_v1  ;;  %1187 = vmatpush.msrb.mxu2 %v4178_v1 }
 0x257   :  { %858 = vmatmul.f32.vlgmr.msrb.gmra.mxu3 %v4126_v19  ;;  %878 = vmatmul.f32.vlgmr.msra.gmra.mxu0 %v4126_v19 }
 0x258   :  { %898 = vmatmul.f32.vlgmr.msra.gmra.mxu1 %v4126_v19 }
 0x259   :  { %1339 = vmatpush.msra.mxu1 %v4133_v49 }
 0x25b   :  { %1340 = vmatpush.msra.mxu1 %v4137_v48 }
 0x25d   :  { %1341 = vmatpush.msra.mxu1 %v4142_v8 }
 0x25f   :  { %1342 = vmatpush.msra.mxu1 %v4147_v39 }
 0x261   :  { %1343 = vmatpush.msra.mxu1 %v4152_v45 }
 0x263   :  { %1344 = vmatpush.msra.mxu1 %v4162_v63 }
 0x265   :  { %1345 = vmatpush.msra.mxu1 %v4170_v46 }
 0x267   :  { %1346 = vmatpush.msra.mxu1 %v4178_v1 }
 0x2d4   :  { %v879_v52 = vpop.f32.mrf.mxu0 }
 0x2d5   :  { %v880_v60 = vadd.f32 %v879_v52, %v3956_v33  ;;  %v899_v33 = vpop.f32.mrf.mxu1 }
 0x2d7   :  { %v922_v3 = vadd.f32 %v880_v60, %v227_v59  ;;  %v4189_v59 = vld [vmem:[#allocation4 + $0xb0] sm:$0xff]  ;;  %v4191_v60 = vld [vmem:[#allocation4 + $0xb8] sm:$0xff] }
 0x2d8   :  { %1029 = vmatpush.msra.mxu3 %v4189_v59  ;;  %1049 = vmatpush.msrb.mxu0 %v4191_v60 }
 0x2d9   :  { %v3195_v43 = vmul.f32 -1.442695, %v922_v3  ;;  %1188 = vmatpush.msrb.mxu2 %v4189_v59  ;;  %1347 = vmatpush.msra.mxu1 %v4189_v59 }
 0x2da   :  { %v859_v58 = vpop.f32.mrf.mxu3  ;;  %1030 = vmatpush.msra.mxu3 %v4197_v51  ;;  %1050 = vmatpush.msrb.mxu0 %v4199_v31 }
 0x2db   :  { %3261 = vpow2.f32 %v3195_v43  ;;  %v860_v52 = vadd.f32 %v859_v58, %v3933_v7  ;;  %v4205_v43 = vld [vmem:[#allocation4 + $0x80] sm:$0xff]  ;;  %v4207_v58 = vld [vmem:[#allocation4 + $0x88] sm:$0xff]  ;;  %1189 = vmatpush.msrb.mxu2 %v4197_v51  ;;  %1348 = vmatpush.msra.mxu1 %v4197_v51 }
 0x2dc   :  { %1031 = vmatpush.msra.mxu3 %v4205_v43  ;;  %1051 = vmatpush.msrb.mxu0 %v4207_v58 }
 0x2dd   :  { %v902_v3 = vadd.f32 %v860_v52, %v186_v41  ;;  %v4215_v41 = vld [vmem:[#allocation4 + $0x70] sm:$0xff]  ;;  %1190 = vmatpush.msrb.mxu2 %v4205_v43  ;;  %1349 = vmatpush.msra.mxu1 %v4205_v43 }
 0x2de   :  { %1032 = vmatpush.msra.mxu3 %v4209_v50  ;;  %1052 = vmatpush.msrb.mxu0 %v4215_v41 }
 0x2df   :  { %v3194_v36 = vmul.f32 -1.442695, %v902_v3  ;;  %1191 = vmatpush.msrb.mxu2 %v4209_v50  ;;  %1350 = vmatpush.msra.mxu1 %v4209_v50 }
 0x2e0   :  { %1033 = vmatpush.msra.mxu3 %v4073_v10  ;;  %1053 = vmatpush.msrb.mxu0 %v4217_v14 }
 0x2e1   :  { %v3262_v52 = vpop.eup %3261  ;;  %3263 = vpow2.f32 %v3194_v36  ;;  %v4232_v36 = vld [vmem:[#allocation4 + $0x28] sm:$0xff]  ;;  %1192 = vmatpush.msrb.mxu2 %v4073_v10  ;;  %1351 = vmatpush.msra.mxu1 %v4073_v10 }
 0x2e2   :  { %v4221_v3 = vadd.f32 1.0, %v3262_v52  ;;  %1034 = vmatpush.msra.mxu3 %v4081_v2  ;;  %1054 = vmatpush.msrb.mxu0 %v4225_v18 }
 0x2e3   :  { %1193 = vmatpush.msrb.mxu2 %v4081_v2  ;;  %1352 = vmatpush.msra.mxu1 %v4081_v2 }
 0x2e4   :  { %3265 = vrcp.f32 %v4221_v3  ;;  %1035 = vmatpush.msra.mxu3 %v4089_v16  ;;  %1055 = vmatpush.msrb.mxu0 %v4232_v36  ;;  %vm932_vm15 = vweird.f32 %v4221_v3 }
 0x2e5   :  { %1194 = vmatpush.msrb.mxu2 %v4089_v16  ;;  %1353 = vmatpush.msra.mxu1 %v4089_v16 }
 0x2e6   :  { %1036 = vmatpush.msra.mxu3 %v4096_v20  ;;  %1056 = vmatpush.msrb.mxu0 %v4238_v62 }
 0x2e7   :  { %v3264_v52 = vpop.eup %3263  ;;  %1195 = vmatpush.msrb.mxu2 %v4096_v20  ;;  %1354 = vmatpush.msra.mxu1 %v4096_v20 }
 0x2e8   :  { %v906_v23 = vadd.f32 1.0, %v3264_v52  ;;  %1200 = vmatpush.msrb.mxu3 %v3999_v22  ;;  %1319 = vmatpush.msra.mxu0 %v3997_v21 }
 0x2ea   :  { %3267 = vrcp.f32 %v906_v23  ;;  %v3266_v10 = vpop.eup %3265  ;;  %1201 = vmatpush.msrb.mxu3 %v4005_v29  ;;  %1320 = vmatpush.msra.mxu0 %v4003_v27  ;;  %v918_v20 = vand.u32 2147483648, %v906_v23  ;;  %v916_v27 = vand.u32 2147483647, %v906_v23  ;;  %vm912_vm11 = vweird.f32 %v906_v23 }
 0x2eb   :  { %v928_v2 = vmul.f32 %v3266_v10, %v4221_v3  ;;  %vm933_vm14 = vweird.f32 %v3266_v10 }
 0x2ec   :  { %1202 = vmatpush.msrb.mxu3 %v4012_v35  ;;  %1321 = vmatpush.msra.mxu0 %v4010_v30  ;;  %vm917_vm13 = vcmp.eq.f32.partialorder %v916_v27, 8.507059e+37  ;;  %vm934_vm0 = vmor %vm932_vm15, %vm933_vm14 }
 0x2ed   :  { %v929_v47 = vsub.f32 1.0, %v928_v2  ;;  %v900_v2 = vadd.f32 %v899_v33, %v3963_v53  ;;  %v936_v33 = vand.u32 2147483647, %v4221_v3 }
 0x2ee   :  { %1203 = vmatpush.msrb.mxu3 %v4021_v40  ;;  %1322 = vmatpush.msra.mxu0 %v4019_v38  ;;  %v919_v38 = vor.u32 1.1754944e-38, %v918_v20 }
 0x2ef   :  { %v930_v17 = vmul.f32 %v3266_v10, %v929_v47  ;;  %vm937_vm1 = vcmp.eq.f32.partialorder %v936_v33, 8.507059e+37 }
 0x2f0   :  { %v3268_v16 = vpop.eup %3267  ;;  %1204 = vmatpush.msrb.mxu3 %v4154_v24  ;;  %1323 = vmatpush.msra.mxu0 %v4026_v54 }
 0x2f1   :  { %v908_v52 = vmul.f32 %v3268_v16, %v906_v23  ;;  %vm913_vm10 = vweird.f32 %v3268_v16  ;;  %v938_v23 = vand.u32 2147483648, %v4221_v3 }
 0x2f2   :  { %1205 = vmatpush.msrb.mxu3 %v4164_v61  ;;  %1324 = vmatpush.msra.mxu0 %v4031_v55  ;;  %vm914_vm12 = vmor %vm912_vm11, %vm913_vm10 }
 0x2f3   :  { %v909_v21 = vsub.f32 1.0, %v908_v52  ;;  %v931_v52 = vadd.f32 %v3266_v10, %v930_v17 }
 0x2f4   :  { %1206 = vmatpush.msrb.mxu3 %v4172_v5  ;;  %1325 = vmatpush.msra.mxu0 %v4036_v56 }
 0x2f5   :  { %v910_v4 = vmul.f32 %v3268_v16, %v909_v21  ;;  %v935_v56 = vsel %vm934_vm0, %v3266_v10, %v931_v52 }
 0x2f6   :  { %1207 = vmatpush.msrb.mxu3 %v4180_v42  ;;  %1326 = vmatpush.msra.mxu0 %v4041_v57  ;;  %v939_v57 = vor.u32 1.1754944e-38, %v938_v23  ;;  %v5175_v23 = vld [vmem:[#allocation16_spill] sm:$0xff] }
 0x2f7   :  { %v911_v30 = vadd.f32 %v3268_v16, %v910_v4  ;;  %v268_v4 = vadd.f32 %v3937_v11, %v3941_v15 }
 0x2f8   :  { %1208 = vmatpush.msrb.mxu3 %v4191_v60  ;;  %1327 = vmatpush.msra.mxu0 %v4051_v26  ;;  %v940_v11 = vsel %vm937_vm1, %v939_v57, %v935_v56 }
 0x2f9   :  { %v915_v54 = vsel %vm914_vm12, %v3268_v16, %v911_v30  ;;  %v945_v15 = vsub.f32 1.0, %v940_v11 }
 0x2fa   :  { %v920_v47 = vsel %vm917_vm13, %v919_v38, %v915_v54  ;;  %1209 = vmatpush.msrb.mxu3 %v4199_v31  ;;  %1328 = vmatpush.msra.mxu0 %v4056_v28  ;;  %v947_v28 = vmul.f32 %v940_v11, %v4126_v19 }
 0x2fb   :  { %v942_v55 = vmul.f32 %v920_v47, %v900_v2 }
 0x2fc   :  { %1210 = vmatpush.msrb.mxu3 %v4207_v58  ;;  %1329 = vmatpush.msra.mxu0 %v4061_v9 }
 0x2fd   :  { %v943_v17 = vadd.f32 %v942_v55, %v268_v4 }
 0x2fe   :  { %1211 = vmatpush.msrb.mxu3 %v4215_v41  ;;  %1330 = vmatpush.msra.mxu0 %v4066_v32  ;;  %v5174_v32 = vld [vmem:[#allocation20_spill] sm:$0xff] }
 0x2ff   :  { %3269 = vtanh.f32 %v943_v17 }
 0x300   :  { %1212 = vmatpush.msrb.mxu3 %v4217_v14  ;;  %1331 = vmatpush.msra.mxu0 %v4071_v34 }
 0x302   :  { %1213 = vmatpush.msrb.mxu3 %v4225_v18  ;;  %1332 = vmatpush.msra.mxu0 %v4079_v37 }
 0x304   :  { %1214 = vmatpush.msrb.mxu3 %v4232_v36  ;;  %1333 = vmatpush.msra.mxu0 %v4087_v13 }
 0x305   :  { %v3270_v26 = vpop.eup %3269 }
 0x306   :  { %v946_v3 = vmul.f32 %v3270_v26, %v945_v15  ;;  %1215 = vmatpush.msrb.mxu3 %v4238_v62  ;;  %1334 = vmatpush.msra.mxu0 %v4094_v12 }
 0x308   :  { %v4287_v9 = vadd.f32 %v947_v28, %v946_v3  ;;  %v1639_v3 = vld [vmem:[#allocation6 + $0x168] sm:$0xff] }
 0x30a   :  { %1017 = vmatmul.f32.vlgmr.msra.gmra.mxu2 %v4287_v9  ;;  %1037 = vmatmul.f32.vlgmr.msra.gmra.mxu3 %v4287_v9 }
 0x30b   :  { %1057 = vmatmul.f32.vlgmr.msrb.gmra.mxu0 %v4287_v9  ;;  %1359 = vmatpush.msra.mxu2 %v3999_v22 }
 0x30c   :  { %1498 = vmatpush.msrb.mxu0 %v4133_v49 }
 0x30d   :  { %1360 = vmatpush.msra.mxu2 %v4005_v29 }
 0x30e   :  { %1499 = vmatpush.msrb.mxu0 %v4137_v48 }
 0x30f   :  { %1361 = vmatpush.msra.mxu2 %v4012_v35  ;;  %v189_v35 = vadd.f32 %v3919_v0, %v3931_v6 }
 0x310   :  { %1500 = vmatpush.msrb.mxu0 %v4142_v8 }
 0x311   :  { %1362 = vmatpush.msra.mxu2 %v4021_v40 }
 0x312   :  { %1501 = vmatpush.msrb.mxu0 %v4147_v39 }
 0x313   :  { %1363 = vmatpush.msra.mxu2 %v4154_v24 }
 0x314   :  { %1502 = vmatpush.msrb.mxu0 %v4152_v45 }
 0x315   :  { %1364 = vmatpush.msra.mxu2 %v4164_v61 }
 0x316   :  { %1503 = vmatpush.msrb.mxu0 %v4162_v63 }
 0x317   :  { %1365 = vmatpush.msra.mxu2 %v4172_v5 }
 0x318   :  { %1504 = vmatpush.msrb.mxu0 %v4170_v46 }
 0x319   :  { %1366 = vmatpush.msra.mxu2 %v4180_v42 }
 0x31a   :  { %1505 = vmatpush.msrb.mxu0 %v4178_v1 }
 0x31b   :  { %1367 = vmatpush.msra.mxu2 %v4191_v60 }
 0x31c   :  { %1506 = vmatpush.msrb.mxu0 %v4189_v59 }
 0x31d   :  { %1368 = vmatpush.msra.mxu2 %v4199_v31 }
 0x31e   :  { %1507 = vmatpush.msrb.mxu0 %v4197_v51  ;;  %v230_v51 = vadd.f32 %v3976_v44, %v3951_v25 }
 0x31f   :  { %1369 = vmatpush.msra.mxu2 %v4207_v58 }
 0x320   :  { %1508 = vmatpush.msrb.mxu0 %v4205_v43 }
 0x321   :  { %1370 = vmatpush.msra.mxu2 %v4215_v41 }
 0x322   :  { %1509 = vmatpush.msrb.mxu0 %v4209_v50 }
 0x323   :  { %1371 = vmatpush.msra.mxu2 %v4217_v14 }
 0x325   :  { %1372 = vmatpush.msra.mxu2 %v4225_v18 }
 0x327   :  { %1373 = vmatpush.msra.mxu2 %v4232_v36 }
 0x329   :  { %1374 = vmatpush.msra.mxu2 %v4238_v62 }
 0x388   :  { %v1058_v16 = vpop.f32.mrf.mxu0 }
 0x389   :  { %v1059_v30 = vadd.f32 %v1058_v16, %v3963_v53 }
 0x38d   :  { %v1018_v22 = vpop.f32.mrf.mxu2  ;;  %v1038_v29 = vpop.f32.mrf.mxu3 }
 0x38e   :  { %v1019_v40 = vadd.f32 %v1018_v22, %v3933_v7  ;;  %v1039_v34 = vadd.f32 %v1038_v29, %v5174_v32  ;;  %v1636_v22 = vld [vmem:[#allocation6 + $0x150] sm:$0xff]  ;;  %v1633_v29 = vld [vmem:[#allocation6 + $0x138] sm:$0xff] }
 0x390   :  { %v1061_v37 = vadd.f32 %v1019_v40, %v189_v35  ;;  %v1081_v50 = vadd.f32 %v1039_v34, %v230_v51  ;;  %v1630_v35 = vld [vmem:[#allocation6 + $0x120] sm:$0xff] }
 0x391   :  { %v5176_v40 = vld [vmem:[#allocation14_spill] sm:$0xff] }
 0x392   :  { %v3196_v13 = vmul.f32 -1.442695, %v1061_v37  ;;  %v3197_v12 = vmul.f32 -1.442695, %v1081_v50  ;;  %v192_v34 = vadd.f32 %v5176_v40, %v3931_v6  ;;  %v1627_v50 = vld [vmem:[#allocation6 + $0x108] sm:$0xff] }
 0x394   :  { %3271 = vpow2.f32 %v3196_v13 }
 0x395   :  { %3273 = vpow2.f32 %v3197_v12  ;;  %v1624_v12 = vld [vmem:[#allocation6 + $0xf0] sm:$0xff] }
 0x39a   :  { %v3272_v49 = vpop.eup %3271 }
 0x39b   :  { %v3274_v48 = vpop.eup %3273  ;;  %v1065_v8 = vadd.f32 1.0, %v3272_v49 }
 0x39c   :  { %v1085_v39 = vadd.f32 1.0, %v3274_v48  ;;  %v1621_v48 = vld [vmem:[#allocation6 + $0xd8] sm:$0xff] }
 0x39d   :  { %3275 = vrcp.f32 %v1065_v8  ;;  %v1077_v1 = vand.u32 2147483648, %v1065_v8  ;;  %v1075_v10 = vand.u32 2147483647, %v1065_v8  ;;  %vm1071_vm3 = vweird.f32 %v1065_v8 }
 0x39e   :  { %3277 = vrcp.f32 %v1085_v39  ;;  %v1097_v47 = vand.u32 2147483648, %v1085_v39  ;;  %vm1091_vm7 = vweird.f32 %v1085_v39  ;;  %v1095_v4 = vand.u32 2147483647, %v1085_v39 }
 0x39f   :  { %v1078_v27 = vor.u32 1.1754944e-38, %v1077_v1  ;;  %vm1076_vm5 = vcmp.eq.f32.partialorder %v1075_v10, 8.507059e+37  ;;  %v1609_v10 = vld [vmem:[#allocation6 + $0x78] sm:$0xff] }
 0x3a0   :  { %v1098_v17 = vor.u32 1.1754944e-38, %v1097_v47  ;;  %vm1096_vm9 = vcmp.eq.f32.partialorder %v1095_v4, 8.507059e+37 }
 0x3a3   :  { %v3276_v0 = vpop.eup %3275 }
 0x3a4   :  { %v3278_v45 = vpop.eup %3277  ;;  %v1067_v63 = vmul.f32 %v3276_v0, %v1065_v8  ;;  %vm1072_vm2 = vweird.f32 %v3276_v0 }
 0x3a5   :  { %v1087_v44 = vmul.f32 %v3278_v45, %v1085_v39  ;;  %vm1073_vm4 = vmor %vm1071_vm3, %vm1072_vm2  ;;  %vm1092_vm6 = vweird.f32 %v3278_v45  ;;  %v5177_v39 = vld [vmem:[#allocation23_spill] sm:$0xff] }
 0x3a6   :  { %v1068_v46 = vsub.f32 1.0, %v1067_v63  ;;  %vm1093_vm8 = vmor %vm1091_vm7, %vm1092_vm6  ;;  %v1618_v63 = vld [vmem:[#allocation6 + $0xc0] sm:$0xff] }
 0x3a7   :  { %v1088_v59 = vsub.f32 1.0, %v1087_v44 }
 0x3a8   :  { %v1069_v43 = vmul.f32 %v3276_v0, %v1068_v46  ;;  %v1615_v46 = vld [vmem:[#allocation6 + $0xa8] sm:$0xff] }
 0x3a9   :  { %v1089_v21 = vmul.f32 %v3278_v45, %v1088_v59  ;;  %v1612_v59 = vld [vmem:[#allocation6 + $0x90] sm:$0xff] }
 0x3aa   :  { %v1070_v20 = vadd.f32 %v3276_v0, %v1069_v43 }
 0x3ab   :  { %v1090_v54 = vadd.f32 %v3278_v45, %v1089_v21  ;;  %v1606_v21 = vld [vmem:[#allocation6 + $0x60] sm:$0xff] }
 0x3ac   :  { %v1074_v38 = vsel %vm1073_vm4, %v3276_v0, %v1070_v20  ;;  %v233_v0 = vadd.f32 %v5177_v39, %v3951_v25  ;;  %v1603_v20 = vld [vmem:[#allocation6 + $0x48] sm:$0xff] }
 0x3ad   :  { %v1079_v2 = vsel %vm1076_vm5, %v1078_v27, %v1074_v38  ;;  %v1094_v33 = vsel %vm1093_vm8, %v3278_v45, %v1090_v54  ;;  %v1600_v27 = vld [vmem:[#allocation6 + $0x30] sm:$0xff]  ;;  %v1597_v38 = vld [vmem:[#allocation6 + $0x18] sm:$0xff]  ;;  %v1594_v54 = vld [vmem:[#allocation6] sm:$0xff] }
 0x3ae   :  { %v1101_v52 = vmul.f32 %v1079_v2, %v1059_v30  ;;  %v1099_v56 = vsel %vm1096_vm9, %v1098_v17, %v1094_v33 }
 0x3af   :  { %v1104_v57 = vsub.f32 1.0, %v1099_v56  ;;  %v1106_v26 = vmul.f32 %v1099_v56, %v4287_v9 }
 0x3b0   :  { %v1102_v55 = vadd.f32 %v1101_v52, %v5175_v23 }
 0x3b2   :  { %3279 = vtanh.f32 %v1102_v55 }
 0x3b8   :  { %v3280_v11 = vpop.eup %3279 }
 0x3b9   :  { %v1105_v15 = vmul.f32 %v3280_v11, %v1104_v57 }
 0x3bb   :  { %v4332_v28 = vadd.f32 %v1106_v26, %v1105_v15 }
 0x3bd   :  { %1176 = vmatmul.f32.vlgmr.msrb.gmra.mxu1 %v4332_v28  ;;  %1196 = vmatmul.f32.vlgmr.msrb.gmra.mxu2 %v4332_v28 }
 0x3be   :  { %1216 = vmatmul.f32.vlgmr.msrb.gmra.mxu3 %v4332_v28  ;;  %1650 = vmatpush.msrb.mxu2 %v1639_v3 }
 0x3c0   :  { %1651 = vmatpush.msrb.mxu2 %v1636_v22 }
 0x3c2   :  { %1652 = vmatpush.msrb.mxu2 %v1633_v29 }
 0x3c4   :  { %1653 = vmatpush.msrb.mxu2 %v1630_v35 }
 0x3c6   :  { %1654 = vmatpush.msrb.mxu2 %v1627_v50  ;;  %v5178_v50 = vld [vmem:[#allocation18_spill] sm:$0xff] }
 0x3c8   :  { %1655 = vmatpush.msrb.mxu2 %v1624_v12 }
 0x3ca   :  { %1656 = vmatpush.msrb.mxu2 %v1621_v48 }
 0x3cc   :  { %1657 = vmatpush.msrb.mxu2 %v1618_v63 }
 0x3ce   :  { %1658 = vmatpush.msrb.mxu2 %v1615_v46  ;;  %v5180_v46 = vld [vmem:[#allocation26_spill] sm:$0xff] }
 0x3d0   :  { %1659 = vmatpush.msrb.mxu2 %v1612_v59  ;;  %v1474_v59 = vld [vmem:[#allocation4 + $0x160] sm:$0xff] }
 0x3d2   :  { %1660 = vmatpush.msrb.mxu2 %v1609_v10  ;;  %v1472_v10 = vld [vmem:[#allocation4 + $0x150] sm:$0xff] }
 0x3d4   :  { %1661 = vmatpush.msrb.mxu2 %v1606_v21  ;;  %v1469_v21 = vld [vmem:[#allocation4 + $0x138] sm:$0xff] }
 0x3d6   :  { %1662 = vmatpush.msrb.mxu2 %v1603_v20  ;;  %v1468_v20 = vld [vmem:[#allocation4 + $0x130] sm:$0xff] }
 0x3d8   :  { %1663 = vmatpush.msrb.mxu2 %v1600_v27  ;;  %v4372_v27 = vld [vmem:[#allocation8 + $0x150] sm:$0xff] }
 0x3da   :  { %1664 = vmatpush.msrb.mxu2 %v1597_v38  ;;  %v1437_v38 = vld [vmem:[#allocation4 + $0x38] sm:$0xff] }
 0x3dc   :  { %1665 = vmatpush.msrb.mxu2 %v1594_v54  ;;  %v1433_v54 = vld [vmem:[#allocation4 + $0x18] sm:$0xff] }
 0x43a   :  { %v1177_v51 = vpop.f32.mrf.mxu1 }
 0x43b   :  { %v1178_v37 = vadd.f32 %v1177_v51, %v3933_v7 }
 0x43d   :  { %v1220_v13 = vadd.f32 %v1178_v37, %v192_v34 }
 0x43f   :  { %v3198_v49 = vmul.f32 -1.442695, %v1220_v13 }
 0x440   :  { %v1197_v8 = vpop.f32.mrf.mxu2 }
 0x441   :  { %3281 = vpow2.f32 %v3198_v49  ;;  %v1198_v45 = vadd.f32 %v1197_v8, %v5174_v32  ;;  %v1217_v56 = vpop.f32.mrf.mxu3 }
 0x442   :  { %v1218_v3 = vadd.f32 %v1217_v56, %v3963_v53  ;;  %v1637_v56 = vld [vmem:[#allocation6 + $0x158] sm:$0xff] }
 0x443   :  { %v1240_v44 = vadd.f32 %v1198_v45, %v233_v0 }
 0x445   :  { %v3199_v1 = vmul.f32 -1.442695, %v1240_v44  ;;  %v5179_v44 = vld [vmem:[#allocation22_spill] sm:$0xff] }
 0x447   :  { %v3282_v43 = vpop.eup %3281  ;;  %3283 = vpow2.f32 %v3199_v1  ;;  %v1477_v1 = vld [vmem:[#allocation4 + $0x178] sm:$0xff] }
 0x448   :  { %v1224_v16 = vadd.f32 1.0, %v3282_v43  ;;  %1518 = vmatpush.msrb.mxu1 %v1477_v1  ;;  %v1475_v43 = vld [vmem:[#allocation4 + $0x168] sm:$0xff] }
 0x449   :  { %1478 = vmatpush.msra.mxu3 %v1475_v43  ;;  %v1625_v43 = vld [vmem:[#allocation6 + $0xf8] sm:$0xff] }
 0x44a   :  { %3285 = vrcp.f32 %v1224_v16  ;;  %v1236_v23 = vand.u32 2147483648, %v1224_v16  ;;  %v1234_v33 = vand.u32 2147483647, %v1224_v16  ;;  %vm1230_vm11 = vweird.f32 %v1224_v16  ;;  %1519 = vmatpush.msrb.mxu1 %v1474_v59 }
 0x44b   :  { %1479 = vmatpush.msra.mxu3 %v1472_v10  ;;  %v1626_v10 = vld [vmem:[#allocation6 + $0x100] sm:$0xff] }
 0x44c   :  { %v1237_v15 = vor.u32 1.1754944e-38, %v1236_v23  ;;  %vm1235_vm13 = vcmp.eq.f32.partialorder %v1234_v33, 8.507059e+37  ;;  %v1431_v23 = vld [vmem:[#allocation4 + $0x8] sm:$0xff]  ;;  %v1641_v33 = vld [vmem:[#allocation6 + $0x178] sm:$0xff] }
 0x44d   :  { %v3284_v30 = vpop.eup %3283  ;;  %1480 = vmatpush.msra.mxu3 %v1469_v21  ;;  %v1622_v21 = vld [vmem:[#allocation6 + $0xe0] sm:$0xff] }
 0x44e   :  { %v1244_v2 = vadd.f32 1.0, %v3284_v30  ;;  %v1436_v30 = vld [vmem:[#allocation4 + $0x30] sm:$0xff] }
 0x450   :  { %v3286_v52 = vpop.eup %3285  ;;  %3287 = vrcp.f32 %v1244_v2  ;;  %v1256_v51 = vand.u32 2147483648, %v1244_v2  ;;  %v1254_v34 = vand.u32 2147483647, %v1244_v2  ;;  %vm1250_vm15 = vweird.f32 %v1244_v2 }
 0x451   :  { %v1226_v47 = vmul.f32 %v3286_v52, %v1224_v16  ;;  %vm1231_vm10 = vweird.f32 %v3286_v52  ;;  %v1471_v16 = vld [vmem:[#allocation4 + $0x148] sm:$0xff] }
 0x452   :  { %vm1232_vm12 = vmor %vm1230_vm11, %vm1231_vm10  ;;  %v1257_v12 = vor.u32 1.1754944e-38, %v1256_v51  ;;  %vm1255_vm1 = vcmp.eq.f32.partialorder %v1254_v34, 8.507059e+37  ;;  %1520 = vmatpush.msrb.mxu1 %v1471_v16  ;;  %v4402_v16 = vld [vmem:[#allocation8 + $0x90] sm:$0xff] }
 0x453   :  { %v1227_v4 = vsub.f32 1.0, %v1226_v47  ;;  %v4378_v47 = vld [vmem:[#allocation8 + $0x120] sm:$0xff] }
 0x454   :  { %1521 = vmatpush.msrb.mxu1 %v1468_v20  ;;  %v1623_v20 = vld [vmem:[#allocation6 + $0xe8] sm:$0xff] }
 0x455   :  { %v1228_v55 = vmul.f32 %v3286_v52, %v1227_v4  ;;  %v1430_v4 = vld [vmem:[#allocation4] sm:$0xff] }
 0x456   :  { %v3288_v17 = vpop.eup %3287  ;;  %1522 = vmatpush.msrb.mxu1 %v4154_v24  ;;  %v1466_v24 = vld [vmem:[#allocation4 + $0x120] sm:$0xff] }
 0x457   :  { %v1246_v57 = vmul.f32 %v3288_v17, %v1244_v2  ;;  %v1229_v11 = vadd.f32 %v3286_v52, %v1228_v55  ;;  %vm1251_vm14 = vweird.f32 %v3288_v17  ;;  %1481 = vmatpush.msra.mxu3 %v1466_v24  ;;  %v4375_v2 = vld [vmem:[#allocation8 + $0x138] sm:$0xff]  ;;  %v1640_v55 = vld [vmem:[#allocation6 + $0x170] sm:$0xff] }
 0x458   :  { %vm1252_vm0 = vmor %vm1250_vm15, %vm1251_vm14  ;;  %1523 = vmatpush.msrb.mxu1 %v4164_v61  ;;  %v1463_v61 = vld [vmem:[#allocation4 + $0x108] sm:$0xff]  ;;  %v4405_v24 = vld [vmem:[#allocation8 + $0x78] sm:$0xff] }
 0x459   :  { %v1247_v26 = vsub.f32 1.0, %v1246_v57  ;;  %v1233_v22 = vsel %vm1232_vm12, %v3286_v52, %v1229_v11  ;;  %1482 = vmatpush.msra.mxu3 %v1463_v61  ;;  %v1434_v52 = vld [vmem:[#allocation4 + $0x20] sm:$0xff]  ;;  %v4384_v11 = vld [vmem:[#allocation8 + $0xf0] sm:$0xff]  ;;  %v1619_v61 = vld [vmem:[#allocation6 + $0xc8] sm:$0xff] }
 0x45a   :  { %v1238_v29 = vsel %vm1235_vm13, %v1237_v15, %v1233_v22  ;;  %1524 = vmatpush.msrb.mxu1 %v4172_v5  ;;  %v1457_v5 = vld [vmem:[#allocation4 + $0xd8] sm:$0xff]  ;;  %v1638_v57 = vld [vmem:[#allocation6 + $0x160] sm:$0xff] }
 0x45b   :  { %v1248_v35 = vmul.f32 %v3288_v17, %v1247_v26  ;;  %v1260_v40 = vmul.f32 %v1238_v29, %v1218_v3  ;;  %v1634_v15 = vld [vmem:[#allocation6 + $0x140] sm:$0xff]  ;;  %v1635_v26 = vld [vmem:[#allocation6 + $0x148] sm:$0xff]  ;;  %v4387_v3 = vld [vmem:[#allocation8 + $0xd8] sm:$0xff] }
 0x45c   :  { %1525 = vmatpush.msrb.mxu1 %v4180_v42  ;;  %v1454_v42 = vld [vmem:[#allocation4 + $0xc0] sm:$0xff] }
 0x45d   :  { %v1249_v37 = vadd.f32 %v3288_v17, %v1248_v35  ;;  %v1261_v13 = vadd.f32 %v1260_v40, %v5178_v50  ;;  %v5181_v35 = vld [vmem:[#allocation15_spill] sm:$0xff]  ;;  %v5182_v40 = vld [vmem:[#allocation24_spill] sm:$0xff] }
 0x45e   :  { %1526 = vmatpush.msrb.mxu1 %v4191_v60  ;;  %v1451_v60 = vld [vmem:[#allocation4 + $0xa8] sm:$0xff]  ;;  %v195_v51 = vadd.f32 %v5181_v35, %v3931_v6  ;;  %v236_v34 = vadd.f32 %v5182_v40, %v3951_v25  ;;  %v1598_v35 = vld [vmem:[#allocation6 + $0x20] sm:$0xff] }
 0x45f   :  { %v1253_v49 = vsel %vm1252_vm0, %v3288_v17, %v1249_v37  ;;  %3289 = vtanh.f32 %v1261_v13  ;;  %v4381_v17 = vld [vmem:[#allocation8 + $0x108] sm:$0xff] }
 0x460   :  { %v1258_v48 = vsel %vm1255_vm1, %v1257_v12, %v1253_v49  ;;  %1527 = vmatpush.msrb.mxu1 %v4199_v31  ;;  %v1460_v31 = vld [vmem:[#allocation4 + $0xf0] sm:$0xff]  ;;  %v1631_v13 = vld [vmem:[#allocation6 + $0x128] sm:$0xff]  ;;  %v4396_v49 = vld [vmem:[#allocation8 + $0xc0] sm:$0xff] }
 0x461   :  { %v1263_v8 = vsub.f32 1.0, %v1258_v48  ;;  %v1265_v45 = vmul.f32 %v1258_v48, %v4332_v28  ;;  %1483 = vmatpush.msra.mxu3 %v1460_v31  ;;  %v1632_v12 = vld [vmem:[#allocation6 + $0x130] sm:$0xff] }
 0x462   :  { %1528 = vmatpush.msrb.mxu1 %v4207_v58  ;;  %v1442_v58 = vld [vmem:[#allocation4 + $0x60] sm:$0xff]  ;;  %v1620_v31 = vld [vmem:[#allocation6 + $0xd0] sm:$0xff] }
 0x463   :  { %1484 = vmatpush.msra.mxu3 %v1457_v5  ;;  %v4408_v5 = vld [vmem:[#allocation8 + $0x60] sm:$0xff] }
 0x464   :  { %1529 = vmatpush.msrb.mxu1 %v4215_v41  ;;  %v1439_v41 = vld [vmem:[#allocation4 + $0x48] sm:$0xff] }
 0x465   :  { %v3290_v39 = vpop.eup %3289  ;;  %1485 = vmatpush.msra.mxu3 %v1454_v42  ;;  %v1616_v42 = vld [vmem:[#allocation6 + $0xb0] sm:$0xff] }
 0x466   :  { %v1264_v0 = vmul.f32 %v3290_v39, %v1263_v8  ;;  %1530 = vmatpush.msrb.mxu1 %v4217_v14  ;;  %v1448_v14 = vld [vmem:[#allocation4 + $0x90] sm:$0xff] }
 0x467   :  { %1486 = vmatpush.msra.mxu3 %v1451_v60  ;;  %v1628_v39 = vld [vmem:[#allocation6 + $0x110] sm:$0xff]  ;;  %v1617_v60 = vld [vmem:[#allocation6 + $0xb8] sm:$0xff] }
 0x468   :  { %v4346_v63 = vadd.f32 %v1265_v45, %v1264_v0  ;;  %1531 = vmatpush.msrb.mxu1 %v4225_v18  ;;  %v1445_v18 = vld [vmem:[#allocation4 + $0x78] sm:$0xff]  ;;  %v4399_v45 = vld [vmem:[#allocation8 + $0xa8] sm:$0xff] }
 0x469   :  { %1487 = vmatpush.msra.mxu3 %v1448_v14  ;;  %v1629_v0 = vld [vmem:[#allocation6 + $0x118] sm:$0xff]  ;;  %v4411_v14 = vld [vmem:[#allocation8 + $0x48] sm:$0xff] }
 0x46a   :  { %1335 = vmatmul.f32.vlgmr.msra.gmra.mxu0 %v4346_v63  ;;  %1355 = vmatmul.f32.vlgmr.msra.gmra.mxu1 %v4346_v63 }
 0x46b   :  { %1375 = vmatmul.f32.vlgmr.msra.gmra.mxu2 %v4346_v63  ;;  %1532 = vmatpush.msrb.mxu1 %v4232_v36  ;;  %v1440_v36 = vld [vmem:[#allocation4 + $0x50] sm:$0xff] }
 0x46c   :  { %1488 = vmatpush.msra.mxu3 %v1445_v18  ;;  %1510 = vmatpush.msrb.mxu0 %v1440_v36  ;;  %v4414_v36 = vld [vmem:[#allocation8 + $0x30] sm:$0xff] }
 0x46d   :  { %1533 = vmatpush.msrb.mxu1 %v4238_v62  ;;  %v4369_v62 = vld [vmem:[#allocation8 + $0x168] sm:$0xff] }
 0x46e   :  { %1489 = vmatpush.msra.mxu3 %v1442_v58  ;;  %1511 = vmatpush.msrb.mxu0 %v1437_v38  ;;  %v1613_v58 = vld [vmem:[#allocation6 + $0x98] sm:$0xff] }
 0x46f   :  { %1856 = vmatpush.msra.mxu1 %v4369_v62 }
 0x470   :  { %1490 = vmatpush.msra.mxu3 %v1439_v41  ;;  %1512 = vmatpush.msrb.mxu0 %v1434_v52  ;;  %v1614_v41 = vld [vmem:[#allocation6 + $0xa0] sm:$0xff]  ;;  %v1611_v52 = vld [vmem:[#allocation6 + $0x88] sm:$0xff] }
 0x471   :  { %1857 = vmatpush.msra.mxu1 %v4372_v27 }
 0x472   :  { %1491 = vmatpush.msra.mxu3 %v1436_v30  ;;  %1513 = vmatpush.msrb.mxu0 %v1431_v23 }
 0x473   :  { %1666 = vmatmul.f32.vlgmr.msrb.gmra.mxu2 %v5179_v44  ;;  %1858 = vmatpush.msra.mxu1 %v4375_v2 }
 0x474   :  { %1492 = vmatpush.msra.mxu3 %v1433_v54  ;;  %1732 = vmatpush.msra.mxu0 %v1641_v33  ;;  %v1610_v54 = vld [vmem:[#allocation6 + $0x80] sm:$0xff]  ;;  %v1608_v33 = vld [vmem:[#allocation6 + $0x70] sm:$0xff] }
 0x475   :  { %1859 = vmatpush.msra.mxu1 %v4378_v47 }
 0x476   :  { %1493 = vmatpush.msra.mxu3 %v1430_v4  ;;  %1733 = vmatpush.msra.mxu0 %v1638_v57  ;;  %v4416_v4 = vld [vmem:[#allocation8 + $0x18] sm:$0xff]  ;;  %v1604_v57 = vld [vmem:[#allocation6 + $0x50] sm:$0xff] }
 0x477   :  { %1860 = vmatpush.msra.mxu1 %v4381_v17 }
 0x478   :  { %1691 = vmatpush.msrb.mxu3 %v1640_v55  ;;  %1734 = vmatpush.msra.mxu0 %v1635_v26  ;;  %v1607_v55 = vld [vmem:[#allocation6 + $0x68] sm:$0xff]  ;;  %v1601_v26 = vld [vmem:[#allocation6 + $0x38] sm:$0xff] }
 0x479   :  { %1861 = vmatpush.msra.mxu1 %v4384_v11 }
 0x47a   :  { %1692 = vmatpush.msrb.mxu3 %v1637_v56  ;;  %1735 = vmatpush.msra.mxu0 %v1632_v12  ;;  %v4419_v56 = vld [vmem:[#allocation8] sm:$0xff]  ;;  %v1596_v12 = vld [vmem:[#allocation6 + $0x10] sm:$0xff] }
 0x47b   :  { %1669 = vmatmul.f32.gmra.mxu2 %v5180_v46  ;;  %1862 = vmatpush.msra.mxu1 %v4387_v3 }
 0x47c   :  { %1693 = vmatpush.msrb.mxu3 %v1634_v15  ;;  %1736 = vmatpush.msra.mxu0 %v1629_v0  ;;  %v1605_v15 = vld [vmem:[#allocation6 + $0x58] sm:$0xff] }
 0x47d   :  { %1863 = vmatpush.msra.mxu1 %v4396_v49 }
 0x47e   :  { %1694 = vmatpush.msrb.mxu3 %v1631_v13  ;;  %1737 = vmatpush.msra.mxu0 %v1626_v10 }
 0x47f   :  { %1864 = vmatpush.msra.mxu1 %v4399_v45 }
 0x480   :  { %1695 = vmatpush.msrb.mxu3 %v1628_v39  ;;  %1738 = vmatpush.msra.mxu0 %v1623_v20 }
 0x481   :  { %1865 = vmatpush.msra.mxu1 %v4402_v16 }
 0x482   :  { %1696 = vmatpush.msrb.mxu3 %v1625_v43  ;;  %1739 = vmatpush.msra.mxu0 %v1620_v31 }
 0x483   :  { %1672 = vmatmul.f32.gmra.mxu2 %v4126_v19  ;;  %1866 = vmatpush.msra.mxu1 %v4405_v24 }
 0x484   :  { %1697 = vmatpush.msrb.mxu3 %v1622_v21  ;;  %1740 = vmatpush.msra.mxu0 %v1617_v60 }
 0x485   :  { %1867 = vmatpush.msra.mxu1 %v4408_v5 }
 0x486   :  { %1698 = vmatpush.msrb.mxu3 %v1619_v61  ;;  %1741 = vmatpush.msra.mxu0 %v1614_v41 }
 0x487   :  { %1868 = vmatpush.msra.mxu1 %v4411_v14 }
 0x488   :  { %1699 = vmatpush.msrb.mxu3 %v1616_v42  ;;  %1742 = vmatpush.msra.mxu0 %v1611_v52 }
 0x489   :  { %1869 = vmatpush.msra.mxu1 %v4414_v36 }
 0x48a   :  { %1700 = vmatpush.msrb.mxu3 %v1613_v58  ;;  %1743 = vmatpush.msra.mxu0 %v1608_v33  ;;  %v5183_v58 = vld [vmem:[#allocation19_spill] sm:$0xff] }
 0x48b   :  { %1675 = vmatmul.f32.gmra.mxu2 %v4287_v9  ;;  %1870 = vmatpush.msra.mxu1 %v4416_v4 }
 0x48c   :  { %1701 = vmatpush.msrb.mxu3 %v1610_v54  ;;  %1744 = vmatpush.msra.mxu0 %v1605_v15 }
 0x48d   :  { %1871 = vmatpush.msra.mxu1 %v4419_v56 }
 0x48e   :  { %1702 = vmatpush.msrb.mxu3 %v1607_v55 }
 0x490   :  { %1703 = vmatpush.msrb.mxu3 %v1604_v57 }
 0x492   :  { %1704 = vmatpush.msrb.mxu3 %v1601_v26  ;;  %v4428_v26 = vld [vmem:[#allocation8 + $0x170] sm:$0xff] }
 0x493   :  { %1678 = vmatmul.f32.gmra.mxu2 %v4332_v28 }
 0x494   :  { %1705 = vmatpush.msrb.mxu3 %v1598_v35  ;;  %v4448_v35 = vld [vmem:[#allocation8 + $0x110] sm:$0xff] }
 0x49b   :  { %1681 = vmatmul.f32.gmra.mxu2 %v4346_v63 }
 0x4e7   :  { %v1336_v22 = vpop.f32.mrf.mxu0  ;;  %v1356_v29 = vpop.f32.mrf.mxu1 }
 0x4e8   :  { %v1337_v37 = vadd.f32 %v1336_v22, %v3933_v7  ;;  %v1357_v50 = vadd.f32 %v1356_v29, %v5174_v32  ;;  %v1602_v22 = vld [vmem:[#allocation6 + $0x40] sm:$0xff] }
 0x4e9   :  { %1745 = vmatpush.msra.mxu0 %v1602_v22  ;;  %v4438_v22 = vld [vmem:[#allocation8 + $0x140] sm:$0xff] }
 0x4ea   :  { %v1379_v48 = vadd.f32 %v1337_v37, %v195_v51  ;;  %v1399_v8 = vadd.f32 %v1357_v50, %v236_v34  ;;  %v1599_v51 = vld [vmem:[#allocation6 + $0x28] sm:$0xff] }
 0x4eb   :  { %1746 = vmatpush.msra.mxu0 %v1599_v51  ;;  %v1595_v50 = vld [vmem:[#allocation6 + $0x8] sm:$0xff]  ;;  %v5184_v51 = vmov 0.0  }
 0x4ec   :  { %v3200_v1 = vmul.f32 -1.442695, %v1379_v48  ;;  %v3201_v59 = vmul.f32 -1.442695, %v1399_v8  ;;  %1706 = vmatpush.msrb.mxu3 %v1595_v50  ;;  %v1820_v50 = vld [vmem:[#allocation8 + $0x98] sm:$0xff] }
 0x4ed   :  { %1747 = vmatpush.msra.mxu0 %v1596_v12  ;;  %v1814_v12 = vld [vmem:[#allocation8 + $0x68] sm:$0xff] }
 0x4ee   :  { %3291 = vpow2.f32 %v3200_v1 }
 0x4ef   :  { %3293 = vpow2.f32 %v3201_v59  ;;  %v1376_v59 = vpop.f32.mrf.mxu2 }
 0x4f0   :  { %v1377_v21 = vadd.f32 %v1376_v59, %v3963_v53 }
 0x4f4   :  { %v3292_v18 = vpop.eup %3291 }
 0x4f5   :  { %v3294_v30 = vpop.eup %3293  ;;  %v1383_v38 = vadd.f32 1.0, %v3292_v18 }
 0x4f6   :  { %v1403_v23 = vadd.f32 1.0, %v3294_v30 }
 0x4f7   :  { %3295 = vrcp.f32 %v1383_v38  ;;  %v1395_v8 = vand.u32 2147483648, %v1383_v38  ;;  %v1393_v0 = vand.u32 2147483647, %v1383_v38  ;;  %vm1389_vm3 = vweird.f32 %v1383_v38 }
 0x4f8   :  { %3297 = vrcp.f32 %v1403_v23  ;;  %v1415_v42 = vand.u32 2147483648, %v1403_v23  ;;  %vm1409_vm7 = vweird.f32 %v1403_v23  ;;  %v1413_v18 = vand.u32 2147483647, %v1403_v23 }
 0x4f9   :  { %v1396_v10 = vor.u32 1.1754944e-38, %v1395_v8  ;;  %vm1394_vm5 = vcmp.eq.f32.partialorder %v1393_v0, 8.507059e+37  ;;  %v4481_v8 = vld [vmem:[#allocation8 + $0x178] sm:$0xff]  ;;  %v1802_v0 = vld [vmem:[#allocation8 + $0x8] sm:$0xff] }
 0x4fa   :  { %v1416_v54 = vor.u32 1.1754944e-38, %v1415_v42  ;;  %vm1414_vm9 = vcmp.eq.f32.partialorder %v1413_v18, 8.507059e+37  ;;  %1896 = vmatpush.msra.mxu2 %v4481_v8  ;;  %v4531_v42 = vld [vmem:[#allocation8 + $0x100] sm:$0xff]  ;;  %v4536_v18 = vld [vmem:[#allocation8 + $0xe8] sm:$0xff] }
 0x4fd   :  { %v3296_v29 = vpop.eup %3295 }
 0x4fe   :  { %v3298_v40 = vpop.eup %3297  ;;  %v1385_v34 = vmul.f32 %v3296_v29, %v1383_v38  ;;  %vm1390_vm2 = vweird.f32 %v3296_v29 }
 0x4ff   :  { %v1405_v37 = vmul.f32 %v3298_v40, %v1403_v23  ;;  %vm1391_vm4 = vmor %vm1389_vm3, %vm1390_vm2  ;;  %vm1410_vm6 = vweird.f32 %v3298_v40  ;;  %v4434_v23 = vld [vmem:[#allocation8 + $0x158] sm:$0xff] }
 0x500   :  { %v1386_v13 = vsub.f32 1.0, %v1385_v34  ;;  %vm1411_vm8 = vmor %vm1409_vm7, %vm1410_vm6  ;;  %v4459_v34 = vld [vmem:[#allocation8 + $0xe0] sm:$0xff] }
 0x501   :  { %v1406_v48 = vsub.f32 1.0, %v1405_v37  ;;  %v4464_v37 = vld [vmem:[#allocation8 + $0xc8] sm:$0xff] }
 0x502   :  { %v1387_v39 = vmul.f32 %v3296_v29, %v1386_v13  ;;  %v1817_v13 = vld [vmem:[#allocation8 + $0x80] sm:$0xff] }
 0x503   :  { %v1407_v1 = vmul.f32 %v3298_v40, %v1406_v48  ;;  %v1811_v48 = vld [vmem:[#allocation8 + $0x50] sm:$0xff] }
 0x504   :  { %v1388_v43 = vadd.f32 %v3296_v29, %v1387_v39  ;;  %v1805_v39 = vld [vmem:[#allocation8 + $0x20] sm:$0xff] }
 0x505   :  { %v1408_v31 = vadd.f32 %v3298_v40, %v1407_v1 }
 0x506   :  { %v1392_v20 = vsel %vm1391_vm4, %v3296_v29, %v1388_v43  ;;  %v4443_v29 = vld [vmem:[#allocation8 + $0x128] sm:$0xff] }
 0x507   :  { %v1397_v61 = vsel %vm1394_vm5, %v1396_v10, %v1392_v20  ;;  %v1412_v30 = vsel %vm1411_vm8, %v3298_v40, %v1408_v31  ;;  %v4455_v40 = vld [vmem:[#allocation8 + $0xf8] sm:$0xff]  ;;  %v4517_v43 = vld [vmem:[#allocation8 + $0x148] sm:$0xff]  ;;  %v4519_v10 = vld [vmem:[#allocation8 + $0x130] sm:$0xff] }
 0x508   :  { %v1419_v60 = vmul.f32 %v1397_v61, %v1377_v21  ;;  %v1417_v38 = vsel %vm1414_vm9, %v1416_v54, %v1412_v30  ;;  %v4523_v20 = vld [vmem:[#allocation8 + $0x118] sm:$0xff] }
 0x509   :  { %v1422_v52 = vsub.f32 1.0, %v1417_v38  ;;  %v1424_v57 = vmul.f32 %v1417_v38, %v4346_v63  ;;  %v4558_v38 = vld [vmem:[#allocation8 + $0xa0] sm:$0xff] }
 0x50a   :  { %v1420_v41 = vadd.f32 %v1419_v60, %v5183_v58  ;;  %v4541_v58 = vld [vmem:[#allocation8 + $0xd0] sm:$0xff] }
 0x50c   :  { %3299 = vtanh.f32 %v1420_v41  ;;  %v4546_v41 = vld [vmem:[#allocation8 + $0xb8] sm:$0xff] }
 0x512   :  { %v3300_v55 = vpop.eup %3299 }
 0x513   :  { %v1423_v33 = vmul.f32 %v3300_v55, %v1422_v52  ;;  %v4562_v55 = vld [vmem:[#allocation8 + $0x88] sm:$0xff] }
 0x515   :  { %v4426_v15 = vadd.f32 %v1424_v57, %v1423_v33  ;;  %v4567_v57 = vld [vmem:[#allocation8 + $0x70] sm:$0xff] }
 0x517   :  { %1494 = vmatmul.f32.vlgmr.msra.gmra.mxu3 %v4426_v15  ;;  %1514 = vmatmul.f32.vlgmr.msrb.gmra.mxu0 %v4426_v15 }
 0x518   :  { %1534 = vmatmul.f32.vlgmr.msrb.gmra.mxu1 %v4426_v15  ;;  %1684 = vmatmul.f32.gmra.mxu2 %v4426_v15 }
 0x519   :  { %1876 = vmatpush.msrb.mxu1 %v4428_v26  ;;  %2015 = vmatpush.msra.mxu3 %v4369_v62 }
 0x51a   :  { %2035 = vmatpush.msrb.mxu0 %v4428_v26 }
 0x51b   :  { %1877 = vmatpush.msrb.mxu1 %v4434_v23  ;;  %2016 = vmatpush.msra.mxu3 %v4372_v27 }
 0x51c   :  { %2036 = vmatpush.msrb.mxu0 %v4434_v23 }
 0x51d   :  { %1878 = vmatpush.msrb.mxu1 %v4438_v22  ;;  %2017 = vmatpush.msra.mxu3 %v4375_v2 }
 0x51e   :  { %2037 = vmatpush.msrb.mxu0 %v4438_v22 }
 0x51f   :  { %1879 = vmatpush.msrb.mxu1 %v4443_v29  ;;  %1707 = vmatmul.f32.vlgmr.msrb.gmra.mxu3 %v5179_v44 }
 0x520   :  { %1748 = vmatmul.f32.vlgmr.msra.gmra.mxu0 %v5179_v44  ;;  %1872 = vmatmul.f32.vlgmr.msra.gmra.mxu1 %v5184_v51  ;;  %v1823_v44 = vld [vmem:[#allocation8 + $0xb0] sm:$0xff] }
 0x521   :  { %1880 = vmatpush.msrb.mxu1 %v4448_v35  ;;  %2018 = vmatpush.msra.mxu3 %v4378_v47 }
 0x522   :  { %2038 = vmatpush.msrb.mxu0 %v4443_v29 }
 0x523   :  { %1881 = vmatpush.msrb.mxu1 %v4455_v40  ;;  %2019 = vmatpush.msra.mxu3 %v4381_v17 }
 0x524   :  { %2039 = vmatpush.msrb.mxu0 %v4448_v35 }
 0x525   :  { %1882 = vmatpush.msrb.mxu1 %v4459_v34  ;;  %2020 = vmatpush.msra.mxu3 %v4384_v11 }
 0x526   :  { %2040 = vmatpush.msrb.mxu0 %v4455_v40 }
 0x527   :  { %1883 = vmatpush.msrb.mxu1 %v4464_v37  ;;  %1710 = vmatmul.f32.gmra.mxu3 %v5180_v46 }
 0x528   :  { %1751 = vmatmul.f32.gmra.mxu0 %v5180_v46  ;;  %2021 = vmatpush.msra.mxu3 %v4387_v3  ;;  %v1808_v46 = vld [vmem:[#allocation8 + $0x38] sm:$0xff] }
 0x529   :  { %1884 = vmatpush.msrb.mxu1 %v1823_v44  ;;  %2041 = vmatpush.msrb.mxu0 %v4459_v34 }
 0x52a   :  { %2022 = vmatpush.msra.mxu3 %v4396_v49 }
 0x52b   :  { %1885 = vmatpush.msrb.mxu1 %v1820_v50  ;;  %2042 = vmatpush.msrb.mxu0 %v4464_v37 }
 0x52c   :  { %2023 = vmatpush.msra.mxu3 %v4399_v45 }
 0x52d   :  { %1886 = vmatpush.msrb.mxu1 %v1817_v13  ;;  %2043 = vmatpush.msrb.mxu0 %v1823_v44 }
 0x52e   :  { %2024 = vmatpush.msra.mxu3 %v4402_v16 }
 0x52f   :  { %1887 = vmatpush.msrb.mxu1 %v1814_v12  ;;  %1713 = vmatmul.f32.gmra.mxu3 %v4126_v19 }
 0x530   :  { %1754 = vmatmul.f32.gmra.mxu0 %v4126_v19  ;;  %2025 = vmatpush.msra.mxu3 %v4405_v24  ;;  %v4509_v19 = vld [vmem:[#allocation8 + $0x160] sm:$0xff] }
 0x531   :  { %1888 = vmatpush.msrb.mxu1 %v1811_v48  ;;  %2044 = vmatpush.msrb.mxu0 %v1820_v50 }
 0x532   :  { %2026 = vmatpush.msra.mxu3 %v4408_v5  ;;  %1897 = vmatpush.msra.mxu2 %v4509_v19 }
 0x533   :  { %1889 = vmatpush.msrb.mxu1 %v1808_v46  ;;  %2045 = vmatpush.msrb.mxu0 %v1817_v13 }
 0x534   :  { %2027 = vmatpush.msra.mxu3 %v4411_v14  ;;  %1898 = vmatpush.msra.mxu2 %v4517_v43 }
 0x535   :  { %1890 = vmatpush.msrb.mxu1 %v1805_v39  ;;  %2046 = vmatpush.msrb.mxu0 %v1814_v12 }
 0x536   :  { %2028 = vmatpush.msra.mxu3 %v4414_v36  ;;  %1899 = vmatpush.msra.mxu2 %v4519_v10 }
 0x537   :  { %1891 = vmatpush.msrb.mxu1 %v1802_v0  ;;  %1716 = vmatmul.f32.gmra.mxu3 %v4287_v9 }
 0x538   :  { %1892 = vmatmul.f32.vlgmr.msrb.gmra.mxu1 %v5184_v51  ;;  %1757 = vmatmul.f32.gmra.mxu0 %v4287_v9 }
 0x539   :  { %2055 = vmatpush.msra.mxu1 %v4481_v8  ;;  %2029 = vmatpush.msra.mxu3 %v4416_v4 }
 0x53a   :  { %2047 = vmatpush.msrb.mxu0 %v1811_v48  ;;  %1900 = vmatpush.msra.mxu2 %v4523_v20 }
 0x53b   :  { %2030 = vmatpush.msra.mxu3 %v4419_v56  ;;  %2056 = vmatpush.msra.mxu1 %v4509_v19 }
 0x53c   :  { %2048 = vmatpush.msrb.mxu0 %v1808_v46  ;;  %1901 = vmatpush.msra.mxu2 %v4531_v42 }
 0x53d   :  { %2194 = vmatpush.msrb.mxu3 %v4428_v26  ;;  %2057 = vmatpush.msra.mxu1 %v4517_v43  ;;  %v4572_v26 = vld [vmem:[#allocation8 + $0x58] sm:$0xff] }
 0x53e   :  { %2049 = vmatpush.msrb.mxu0 %v1805_v39  ;;  %1902 = vmatpush.msra.mxu2 %v4536_v18 }
 0x53f   :  { %2195 = vmatpush.msrb.mxu3 %v4434_v23  ;;  %2058 = vmatpush.msra.mxu1 %v4519_v10 }
 0x540   :  { %1719 = vmatmul.f32.gmra.mxu3 %v4332_v28  ;;  %1760 = vmatmul.f32.gmra.mxu0 %v4332_v28  ;;  %v5185_v28 = vld [vmem:[#allocation25_spill] sm:$0xff] }
 0x541   :  { %2196 = vmatpush.msrb.mxu3 %v4438_v22  ;;  %2050 = vmatpush.msrb.mxu0 %v1802_v0  ;;  %v4578_v22 = vld [vmem:[#allocation8 + $0x40] sm:$0xff] }
 0x542   :  { %2059 = vmatpush.msra.mxu1 %v4523_v20  ;;  %1903 = vmatpush.msra.mxu2 %v4541_v58 }
 0x543   :  { %2214 = vmatpush.msra.mxu0 %v4481_v8  ;;  %2197 = vmatpush.msrb.mxu3 %v4443_v29 }
 0x544   :  { %2060 = vmatpush.msra.mxu1 %v4531_v42  ;;  %1904 = vmatpush.msra.mxu2 %v4546_v41 }
 0x545   :  { %2198 = vmatpush.msrb.mxu3 %v4448_v35  ;;  %2215 = vmatpush.msra.mxu0 %v4509_v19  ;;  %v4582_v35 = vld [vmem:[#allocation8 + $0x28] sm:$0xff] }
 0x546   :  { %2061 = vmatpush.msra.mxu1 %v4536_v18  ;;  %1905 = vmatpush.msra.mxu2 %v4558_v38 }
 0x547   :  { %2199 = vmatpush.msrb.mxu3 %v4455_v40  ;;  %2216 = vmatpush.msra.mxu0 %v4517_v43 }
 0x548   :  { %1722 = vmatmul.f32.gmra.mxu3 %v4346_v63  ;;  %1763 = vmatmul.f32.gmra.mxu0 %v4346_v63  ;;  %v239_v63 = vadd.f32 %v5185_v28, %v3951_v25  ;;  %v5186_v25 = vld [vmem:[#allocation17_spill] sm:$0xff] }
 0x549   :  { %2200 = vmatpush.msrb.mxu3 %v4459_v34  ;;  %2217 = vmatpush.msra.mxu0 %v4519_v10  ;;  %v4585_v34 = vld [vmem:[#allocation8 + $0x10] sm:$0xff] }
 0x54a   :  { %2062 = vmatpush.msra.mxu1 %v4541_v58  ;;  %1906 = vmatpush.msra.mxu2 %v4562_v55 }
 0x54b   :  { %2201 = vmatpush.msrb.mxu3 %v4464_v37  ;;  %2218 = vmatpush.msra.mxu0 %v4523_v20 }
 0x54c   :  { %2063 = vmatpush.msra.mxu1 %v4546_v41  ;;  %1907 = vmatpush.msra.mxu2 %v4567_v57 }
 0x54d   :  { %2202 = vmatpush.msrb.mxu3 %v1823_v44  ;;  %2219 = vmatpush.msra.mxu0 %v4531_v42 }
 0x54e   :  { %2064 = vmatpush.msra.mxu1 %v4558_v38  ;;  %1908 = vmatpush.msra.mxu2 %v4572_v26 }
 0x54f   :  { %2203 = vmatpush.msrb.mxu3 %v1820_v50  ;;  %2220 = vmatpush.msra.mxu0 %v4536_v18 }
 0x550   :  { %1725 = vmatmul.f32.gmra.mxu3 %v4426_v15  ;;  %1766 = vmatmul.f32.gmra.mxu0 %v4426_v15 }
 0x551   :  { %2204 = vmatpush.msrb.mxu3 %v1817_v13  ;;  %2221 = vmatpush.msra.mxu0 %v4541_v58 }
 0x552   :  { %2065 = vmatpush.msra.mxu1 %v4562_v55  ;;  %1909 = vmatpush.msra.mxu2 %v4578_v22 }
 0x553   :  { %2205 = vmatpush.msrb.mxu3 %v1814_v12  ;;  %2222 = vmatpush.msra.mxu0 %v4546_v41 }
 0x554   :  { %2066 = vmatpush.msra.mxu1 %v4567_v57  ;;  %1910 = vmatpush.msra.mxu2 %v4582_v35 }
 0x555   :  { %2206 = vmatpush.msrb.mxu3 %v1811_v48  ;;  %2223 = vmatpush.msra.mxu0 %v4558_v38 }
 0x556   :  { %2067 = vmatpush.msra.mxu1 %v4572_v26  ;;  %1911 = vmatpush.msra.mxu2 %v4585_v34 }
 0x557   :  { %2207 = vmatpush.msrb.mxu3 %v1808_v46  ;;  %2224 = vmatpush.msra.mxu0 %v4562_v55 }
 0x558   :  { %2068 = vmatpush.msra.mxu1 %v4578_v22  ;;  %2174 = vmatpush.msrb.mxu2 %v4369_v62 }
 0x559   :  { %2208 = vmatpush.msrb.mxu3 %v1805_v39  ;;  %2225 = vmatpush.msra.mxu0 %v4567_v57 }
 0x55a   :  { %2069 = vmatpush.msra.mxu1 %v4582_v35  ;;  %2175 = vmatpush.msrb.mxu2 %v4372_v27 }
 0x55b   :  { %2209 = vmatpush.msrb.mxu3 %v1802_v0  ;;  %2226 = vmatpush.msra.mxu0 %v4572_v26 }
 0x55c   :  { %2070 = vmatpush.msra.mxu1 %v4585_v34  ;;  %2176 = vmatpush.msrb.mxu2 %v4375_v2 }
 0x55d   :  { %2227 = vmatpush.msra.mxu0 %v4578_v22 }
 0x55e   :  { %2177 = vmatpush.msrb.mxu2 %v4378_v47 }
 0x55f   :  { %2228 = vmatpush.msra.mxu0 %v4582_v35 }
 0x560   :  { %2178 = vmatpush.msrb.mxu2 %v4381_v17 }
 0x561   :  { %2229 = vmatpush.msra.mxu0 %v4585_v34 }
 0x562   :  { %2179 = vmatpush.msrb.mxu2 %v4384_v11  ;;  %v1667_v11 = vpop.f32.mrf.mxu2 }
 0x564   :  { %2180 = vmatpush.msrb.mxu2 %v4387_v3 }
 0x566   :  { %2181 = vmatpush.msrb.mxu2 %v4396_v49  ;;  %v1797_v49 = vld [vmem:[%s5148_s8] sm:$0x7] }
 0x568   :  { %2182 = vmatpush.msrb.mxu2 %v4399_v45  ;;  %v1642_v45 = vld [vmem:[%s5147_s7] sm:$0x7] }
 0x56a   :  { %2183 = vmatpush.msrb.mxu2 %v4402_v16  ;;  %v4617_v3 = vpop.f32.mrf.mxu2  ;;  %v4625_v16 = vperm.slane %v1797_v49, 0 }
 0x56c   :  { %2184 = vmatpush.msrb.mxu2 %v4405_v24 }
 0x56e   :  { %2185 = vmatpush.msrb.mxu2 %v4408_v5 }
 0x570   :  { %2186 = vmatpush.msrb.mxu2 %v4411_v14  ;;  %v4629_v14 = vperm.slane %v1642_v45, 0 }
 0x572   :  { %2187 = vmatpush.msrb.mxu2 %v4414_v36  ;;  %v4627_v5 = vpop.f32.mrf.mxu2 }
 0x574   :  { %2188 = vmatpush.msrb.mxu2 %v4416_v4  ;;  %v1668_v4 = vadd.f32 %v1667_v11, %v4629_v14 }
 0x576   :  { %2189 = vmatpush.msrb.mxu2 %v4419_v56  ;;  %v4633_v56 = vperm.slane %v1797_v49, 1 }
 0x594   :  { %v1515_v9 = vpop.f32.mrf.mxu0 }
 0x595   :  { %v1516_v1 = vadd.f32 %v1515_v9, %v5174_v32  ;;  %v198_v32 = vadd.f32 %v5186_v25, %v3931_v6  ;;  %v1535_v48 = vpop.f32.mrf.mxu1 }
 0x596   :  { %v1536_v9 = vadd.f32 %v1535_v48, %v3963_v53 }
 0x597   :  { %v1558_v59 = vadd.f32 %v1516_v1, %v239_v63 }
 0x599   :  { %v3203_v21 = vmul.f32 -1.442695, %v1558_v59 }
 0x59a   :  { %v1495_v61 = vpop.f32.mrf.mxu3 }
 0x59b   :  { %3301 = vpow2.f32 %v3203_v21  ;;  %v1496_v31 = vadd.f32 %v1495_v61, %v3933_v7  ;;  %v5187_v21 = vld [vmem:[#allocation21_spill] sm:$0xff] }
 0x59d   :  { %v1538_v60 = vadd.f32 %v1496_v31, %v198_v32  ;;  %v1873_v24 = vpop.f32.mrf.mxu1 }
 0x59e   :  { %v1874_v36 = vadd.f32 %v1873_v24, %v4625_v16 }
 0x59f   :  { %v3202_v6 = vmul.f32 -1.442695, %v1538_v60 }
 0x5a1   :  { %v3302_v7 = vpop.eup %3301  ;;  %3303 = vpow2.f32 %v3202_v6  ;;  %v4635_v6 = vperm.slane %v1642_v45, 1 }
 0x5a2   :  { %v4549_v30 = vadd.f32 1.0, %v3302_v7  ;;  %v1708_v7 = vpop.f32.mrf.mxu3 }
 0x5a4   :  { %3305 = vrcp.f32 %v4549_v30  ;;  %v1574_v62 = vand.u32 2147483648, %v4549_v30  ;;  %vm1568_vm15 = vweird.f32 %v4549_v30  ;;  %v1572_v27 = vand.u32 2147483647, %v4549_v30 }
 0x5a6   :  { %v1575_v25 = vor.u32 1.1754944e-38, %v1574_v62  ;;  %vm1573_vm1 = vcmp.eq.f32.partialorder %v1572_v27, 8.507059e+37 }
 0x5a7   :  { %v3304_v54 = vpop.eup %3303 }
 0x5a8   :  { %v1542_v52 = vadd.f32 1.0, %v3304_v54 }
 0x5aa   :  { %3307 = vrcp.f32 %v1542_v52  ;;  %v3306_v33 = vpop.eup %3305  ;;  %v1554_v50 = vand.u32 2147483648, %v1542_v52  ;;  %v1552_v12 = vand.u32 2147483647, %v1542_v52  ;;  %vm1548_vm11 = vweird.f32 %v1542_v52 }
 0x5ab   :  { %v1564_v23 = vmul.f32 %v3306_v33, %v4549_v30  ;;  %vm1569_vm14 = vweird.f32 %v3306_v33  ;;  %v4637_v30 = vpop.f32.mrf.mxu2 }
 0x5ac   :  { %v1555_v0 = vor.u32 1.1754944e-38, %v1554_v50  ;;  %vm1553_vm13 = vcmp.eq.f32.partialorder %v1552_v12, 8.507059e+37  ;;  %vm1570_vm0 = vmor %vm1568_vm15, %vm1569_vm14 }
 0x5ad   :  { %v1565_v37 = vsub.f32 1.0, %v1564_v23 }
 0x5af   :  { %v1566_v46 = vmul.f32 %v3306_v33, %v1565_v37 }
 0x5b0   :  { %v3308_v29 = vpop.eup %3307 }
 0x5b1   :  { %v1544_v40 = vmul.f32 %v3308_v29, %v1542_v52  ;;  %vm1549_vm10 = vweird.f32 %v3308_v29  ;;  %v1567_v1 = vadd.f32 %v3306_v33, %v1566_v46 }
 0x5b2   :  { %vm1550_vm12 = vmor %vm1548_vm11, %vm1549_vm10 }
 0x5b3   :  { %v1545_v44 = vsub.f32 1.0, %v1544_v40  ;;  %v1571_v53 = vsel %vm1570_vm0, %v3306_v33, %v1567_v1  ;;  %v1709_v33 = vadd.f32 %v1708_v7, %v4635_v6  ;;  %v4641_v40 = vpop.f32.mrf.mxu2 }
 0x5b4   :  { %v1576_v2 = vsel %vm1573_vm1, %v1575_v25, %v1571_v53  ;;  %v4651_v25 = vperm.slane %v1642_v45, 2 }
 0x5b5   :  { %v1546_v13 = vmul.f32 %v3308_v29, %v1545_v44  ;;  %v1581_v47 = vsub.f32 1.0, %v1576_v2  ;;  %v1583_v60 = vmul.f32 %v1576_v2, %v4426_v15  ;;  %v1916_v15 = vadd.f32 %v1874_v36, %v1668_v4 }
 0x5b7   :  { %v1547_v39 = vadd.f32 %v3308_v29, %v1546_v13  ;;  %v3204_v52 = vmul.f32 -1.442695, %v1916_v15 }
 0x5b9   :  { %v1551_v28 = vsel %vm1550_vm12, %v3308_v29, %v1547_v39 }
 0x5ba   :  { %v1556_v63 = vsel %vm1553_vm13, %v1555_v0, %v1551_v28 }
 0x5bb   :  { %v1578_v59 = vmul.f32 %v1556_v63, %v1536_v9  ;;  %v4643_v13 = vpop.f32.mrf.mxu2 }
 0x5bd   :  { %v1579_v61 = vadd.f32 %v1578_v59, %v5187_v21  ;;  %v4649_v21 = vperm.slane %v1797_v49, 2 }
 0x5bf   :  { %3309 = vtanh.f32 %v1579_v61 }
 0x5c0   :  { %3311 = vpow2.f32 %v3204_v52 }
 0x5c3   :  { %v4645_v39 = vpop.f32.mrf.mxu2 }
 0x5c4   :  { %5188 = vst [vmem:[#allocation20_spill] sm:$0xff] %v4645_v39 }
 0x5c5   :  { %v3310_v32 = vpop.eup %3309 }
 0x5c6   :  { %v1582_v31 = vmul.f32 %v3310_v32, %v1581_v47  ;;  %v3312_v37 = vpop.eup %3311  ;;  %v1749_v47 = vpop.f32.mrf.mxu0 }
 0x5c7   :  { %v1920_v44 = vadd.f32 1.0, %v3312_v37  ;;  %v1750_v24 = vadd.f32 %v1749_v47, %v4651_v25 }
 0x5c8   :  { %v1584_v17 = vadd.f32 %v1583_v60, %v1582_v31 }
 0x5c9   :  { %v1932_v27 = vand.u32 2147483648, %v1920_v44  ;;  %vm1926_vm3 = vweird.f32 %v1920_v44  ;;  %v1930_v61 = vand.u32 2147483647, %v1920_v44 }
 0x5ca   :  { %1687 = vmatmul.f32.gmra.mxu2 %v1584_v17  ;;  %1728 = vmatmul.f32.gmra.mxu3 %v1584_v17 }
 0x5cb   :  { %1769 = vmatmul.f32.gmra.mxu0 %v1584_v17  ;;  %v1933_v31 = vor.u32 1.1754944e-38, %v1932_v27  ;;  %vm1931_vm5 = vcmp.eq.f32.partialorder %v1930_v61, 8.507059e+37 }
 0x5d2   :  { %1912 = vmatmul.f32.vlgmr.msra.gmra.mxu2 %v5184_v51  ;;  %v1893_v51 = vpop.f32.mrf.mxu1 }
 0x5d3   :  { %v1894_v54 = vadd.f32 %v1893_v51, %v4633_v56 }
 0x5d5   :  { %v1936_v23 = vadd.f32 %v1894_v54, %v1709_v33 }
 0x5d7   :  { %v3205_v29 = vmul.f32 -1.442695, %v1936_v23 }
 0x5d9   :  { %3313 = vpow2.f32 %v3205_v29 }
 0x5da   :  { %3315 = vrcp.f32 %v1920_v44 }
 0x5df   :  { %v3314_v50 = vpop.eup %3313 }
 0x5e0   :  { %v1940_v12 = vadd.f32 1.0, %v3314_v50  ;;  %v3316_v48 = vpop.eup %3315 }
 0x5e1   :  { %v1922_v46 = vmul.f32 %v3316_v48, %v1920_v44  ;;  %vm1927_vm2 = vweird.f32 %v3316_v48 }
 0x5e2   :  { %3317 = vrcp.f32 %v1940_v12  ;;  %vm1928_vm4 = vmor %vm1926_vm3, %vm1927_vm2  ;;  %v1952_v49 = vand.u32 2147483648, %v1940_v12  ;;  %vm1946_vm7 = vweird.f32 %v1940_v12  ;;  %v1950_v4 = vand.u32 2147483647, %v1940_v12 }
 0x5e3   :  { %v1923_v9 = vsub.f32 1.0, %v1922_v46 }
 0x5e4   :  { %v1953_v51 = vor.u32 1.1754944e-38, %v1952_v49  ;;  %vm1951_vm9 = vcmp.eq.f32.partialorder %v1950_v4, 8.507059e+37 }
 0x5e5   :  { %v1924_v63 = vmul.f32 %v3316_v48, %v1923_v9 }
 0x5e7   :  { %v1925_v59 = vadd.f32 %v3316_v48, %v1924_v63 }
 0x5e8   :  { %v3318_v0 = vpop.eup %3317 }
 0x5e9   :  { %v1942_v28 = vmul.f32 %v3318_v0, %v1940_v12  ;;  %v1929_v2 = vsel %vm1928_vm4, %v3316_v48, %v1925_v59  ;;  %vm1947_vm6 = vweird.f32 %v3318_v0  ;;  %v1671_v48 = vadd.f32 %v4617_v3, %v4629_v14 }
 0x5ea   :  { %v1934_v17 = vsel %vm1931_vm5, %v1933_v31, %v1929_v2  ;;  %vm1948_vm8 = vmor %vm1946_vm7, %vm1947_vm6 }
 0x5eb   :  { %v1943_v62 = vsub.f32 1.0, %v1942_v28 }
 0x5ed   :  { %v1944_v53 = vmul.f32 %v3318_v0, %v1943_v62 }
 0x5ef   :  { %v1945_v11 = vadd.f32 %v3318_v0, %v1944_v53 }
 0x5f1   :  { %v1949_v45 = vsel %vm1948_vm8, %v3318_v0, %v1945_v11 }
 0x5f2   :  { %v1954_v7 = vsel %vm1951_vm9, %v1953_v51, %v1949_v45 }
 0x5f3   :  { %v1959_v54 = vsub.f32 1.0, %v1954_v7  ;;  %v1961_v23 = vmul.f32 0.0, %v1954_v7 }
 0x64d   :  { %v4647_v1 = vpop.f32.mrf.mxu2 }
 0x64e   :  { %5189 = vst [vmem:[#allocation16_spill] sm:$0xff] %v4647_v1 }
 0x655   :  { %v1913_v32 = vpop.f32.mrf.mxu2 }
 0x656   :  { %v1914_v60 = vadd.f32 %v1913_v32, %v4649_v21 }
 0x658   :  { %v1956_v36 = vmul.f32 %v1934_v17, %v1914_v60 }
 0x65a   :  { %v1957_v15 = vadd.f32 %v1956_v36, %v1750_v24 }
 0x65c   :  { %3319 = vtanh.f32 %v1957_v15 }
 0x662   :  { %v3320_v52 = vpop.eup %3319 }
 0x663   :  { %v1960_v33 = vmul.f32 %v3320_v52, %v1959_v54 }
 0x665   :  { %v4655_v29 = vadd.f32 %v1961_v23, %v1960_v33 }
 0x667   :  { %5190 = vst [vmem:[#allocation14_spill] sm:$0xff] %v4655_v29  ;;  %2031 = vmatmul.f32.vlgmr.msra.gmra.mxu3 %v4655_v29  ;;  %2051 = vmatmul.f32.vlgmr.msrb.gmra.mxu0 %v4655_v29 }
 0x668   :  { %2071 = vmatmul.f32.vlgmr.msra.gmra.mxu1 %v4655_v29  ;;  %2373 = vmatpush.msra.mxu3 %v4481_v8  ;;  %v1752_v8 = vpop.f32.mrf.mxu0 }
 0x669   :  { %v1753_v51 = vadd.f32 %v1752_v8, %v4651_v25  ;;  %v4713_v8 = vld [vmem:[#allocation8 + $0x168] sm:$0xff] }
 0x66a   :  { %2374 = vmatpush.msra.mxu3 %v4509_v19  ;;  %v1711_v19 = vpop.f32.mrf.mxu3  ;;  %2333 = vmatpush.msrb.mxu1 %v4713_v8 }
 0x66b   :  { %2492 = vmatpush.msrb.mxu0 %v4713_v8 }
 0x66c   :  { %2375 = vmatpush.msra.mxu3 %v4517_v43 }
 0x66e   :  { %2376 = vmatpush.msra.mxu3 %v4519_v10 }
 0x670   :  { %2377 = vmatpush.msra.mxu3 %v4523_v20  ;;  %v4676_v43 = vpop.f32.mrf.mxu0 }
 0x672   :  { %2378 = vmatpush.msra.mxu3 %v4531_v42  ;;  %v4678_v10 = vpop.f32.mrf.mxu3 }
 0x674   :  { %2379 = vmatpush.msra.mxu3 %v4536_v18 }
 0x676   :  { %2380 = vmatpush.msra.mxu3 %v4541_v58 }
 0x678   :  { %2381 = vmatpush.msra.mxu3 %v4546_v41  ;;  %v4680_v20 = vpop.f32.mrf.mxu0 }
 0x67a   :  { %2382 = vmatpush.msra.mxu3 %v4558_v38  ;;  %v4682_v42 = vpop.f32.mrf.mxu3 }
 0x67c   :  { %2383 = vmatpush.msra.mxu3 %v4562_v55 }
 0x67e   :  { %2384 = vmatpush.msra.mxu3 %v4567_v57 }
 0x680   :  { %2385 = vmatpush.msra.mxu3 %v4572_v26  ;;  %v4684_v18 = vpop.f32.mrf.mxu0 }
 0x682   :  { %2386 = vmatpush.msra.mxu3 %v4578_v22  ;;  %v4686_v58 = vpop.f32.mrf.mxu3 }
 0x684   :  { %2387 = vmatpush.msra.mxu3 %v4582_v35 }
 0x686   :  { %2388 = vmatpush.msra.mxu3 %v4585_v34  ;;  %v1712_v34 = vadd.f32 %v1711_v19, %v4635_v6 }
 0x688   :  { %v4688_v41 = vpop.f32.mrf.mxu0 }
 0x689   :  { %5191 = vst [vmem:[#allocation23_spill] sm:$0xff] %v4688_v41 }
 0x68a   :  { %v4690_v38 = vpop.f32.mrf.mxu3 }
 0x690   :  { %v4692_v55 = vpop.f32.mrf.mxu0 }
 0x691   :  { %5192 = vst [vmem:[#allocation18_spill] sm:$0xff] %v4692_v55 }
 0x692   :  { %v4694_v57 = vpop.f32.mrf.mxu3 }
 0x693   :  { %5193 = vst [vmem:[#allocation22_spill] sm:$0xff] %v4694_v57 }
 0x698   :  { %v4696_v26 = vpop.f32.mrf.mxu0 }
 0x699   :  { %5194 = vst [vmem:[#allocation26_spill] sm:$0xff] %v4696_v26 }
 0x69a   :  { %v4698_v22 = vpop.f32.mrf.mxu3 }
 0x69b   :  { %5195 = vst [vmem:[#allocation15_spill] sm:$0xff] %v4698_v22 }
 0x6e4   :  { %v2052_v35 = vpop.f32.mrf.mxu0 }
 0x6e5   :  { %v2053_v37 = vadd.f32 %v2052_v35, %v4633_v56  ;;  %v2072_v11 = vpop.f32.mrf.mxu1 }
 0x6e6   :  { %v2073_v36 = vadd.f32 %v2072_v11, %v4649_v21 }
 0x6e7   :  { %v2095_v44 = vadd.f32 %v2053_v37, %v1712_v34 }
 0x6e9   :  { %v3207_v50 = vmul.f32 -1.442695, %v2095_v44 }
 0x6ea   :  { %v2032_v12 = vpop.f32.mrf.mxu3 }
 0x6eb   :  { %3321 = vpow2.f32 %v3207_v50  ;;  %v2033_v46 = vadd.f32 %v2032_v12, %v4625_v16 }
 0x6ed   :  { %v2075_v0 = vadd.f32 %v2033_v46, %v1671_v48  ;;  %v4715_v48 = vld [vmem:[#allocation8 + $0x170] sm:$0xff] }
 0x6ee   :  { %2353 = vmatpush.msra.mxu2 %v4715_v48  ;;  %v4719_v46 = vld [vmem:[#allocation8 + $0x150] sm:$0xff] }
 0x6ef   :  { %v3206_v9 = vmul.f32 -1.442695, %v2075_v0  ;;  %v4721_v0 = vld [vmem:[#allocation8 + $0x158] sm:$0xff]  ;;  %2334 = vmatpush.msrb.mxu1 %v4719_v46  ;;  %2493 = vmatpush.msrb.mxu0 %v4719_v46 }
 0x6f0   :  { %2354 = vmatpush.msra.mxu2 %v4721_v0 }
 0x6f1   :  { %v3322_v28 = vpop.eup %3321  ;;  %3323 = vpow2.f32 %v3206_v9  ;;  %v4727_v9 = vld [vmem:[#allocation8 + $0x138] sm:$0xff] }
 0x6f2   :  { %v2099_v63 = vadd.f32 1.0, %v3322_v28  ;;  %v4729_v28 = vld [vmem:[#allocation8 + $0x140] sm:$0xff]  ;;  %2335 = vmatpush.msrb.mxu1 %v4727_v9  ;;  %2494 = vmatpush.msrb.mxu0 %v4727_v9 }
 0x6f3   :  { %2355 = vmatpush.msra.mxu2 %v4729_v28 }
 0x6f4   :  { %3325 = vrcp.f32 %v2099_v63  ;;  %v2111_v7 = vand.u32 2147483648, %v2099_v63  ;;  %vm2105_vm15 = vweird.f32 %v2099_v63  ;;  %v2109_v52 = vand.u32 2147483647, %v2099_v63 }
 0x6f6   :  { %v2112_v19 = vor.u32 1.1754944e-38, %v2111_v7  ;;  %vm2110_vm1 = vcmp.eq.f32.partialorder %v2109_v52, 8.507059e+37  ;;  %v4795_v52 = vld [vmem:[#allocation8 + $0x80] sm:$0xff] }
 0x6f7   :  { %v3324_v62 = vpop.eup %3323 }
 0x6f8   :  { %v2079_v59 = vadd.f32 1.0, %v3324_v62  ;;  %v4737_v62 = vld [vmem:[#allocation8 + $0x128] sm:$0xff] }
 0x6f9   :  { %2356 = vmatpush.msra.mxu2 %v4737_v62 }
 0x6fa   :  { %3327 = vrcp.f32 %v2079_v59  ;;  %v3326_v27 = vpop.eup %3325  ;;  %v2091_v31 = vand.u32 2147483648, %v2079_v59  ;;  %v2089_v60 = vand.u32 2147483647, %v2079_v59  ;;  %vm2085_vm11 = vweird.f32 %v2079_v59 }
 0x6fb   :  { %v2101_v61 = vmul.f32 %v3326_v27, %v2099_v63  ;;  %vm2106_vm14 = vweird.f32 %v3326_v27  ;;  %v4735_v63 = vld [vmem:[#allocation8 + $0x120] sm:$0xff] }
 0x6fc   :  { %v2092_v49 = vor.u32 1.1754944e-38, %v2091_v31  ;;  %vm2090_vm13 = vcmp.eq.f32.partialorder %v2089_v60, 8.507059e+37  ;;  %vm2107_vm0 = vmor %vm2105_vm15, %vm2106_vm14  ;;  %2336 = vmatpush.msrb.mxu1 %v4735_v63  ;;  %2495 = vmatpush.msrb.mxu0 %v4735_v63  ;;  %v1715_v60 = vadd.f32 %v4678_v10, %v4635_v6 }
 0x6fd   :  { %v2102_v47 = vsub.f32 1.0, %v2101_v61  ;;  %v4751_v61 = vld [vmem:[#allocation8 + $0xf0] sm:$0xff] }
 0x6ff   :  { %v2103_v17 = vmul.f32 %v3326_v27, %v2102_v47  ;;  %v4761_v47 = vld [vmem:[#allocation8 + $0xe0] sm:$0xff] }
 0x700   :  { %v3328_v53 = vpop.eup %3327 }
 0x701   :  { %v2081_v2 = vmul.f32 %v3328_v53, %v2079_v59  ;;  %vm2086_vm10 = vweird.f32 %v3328_v53  ;;  %v2104_v45 = vadd.f32 %v3326_v27, %v2103_v17  ;;  %v4743_v59 = vld [vmem:[#allocation8 + $0x108] sm:$0xff] }
 0x702   :  { %vm2087_vm12 = vmor %vm2085_vm11, %vm2086_vm10  ;;  %2337 = vmatpush.msrb.mxu1 %v4743_v59  ;;  %2496 = vmatpush.msrb.mxu0 %v4743_v59 }
 0x703   :  { %v2082_v32 = vsub.f32 1.0, %v2081_v2  ;;  %v2108_v23 = vsel %vm2107_vm0, %v3326_v27, %v2104_v45  ;;  %v4745_v27 = vld [vmem:[#allocation8 + $0x110] sm:$0xff]  ;;  %v4759_v2 = vld [vmem:[#allocation8 + $0xd8] sm:$0xff] }
 0x704   :  { %v2113_v35 = vsel %vm2110_vm1, %v2112_v19, %v2108_v23  ;;  %2357 = vmatpush.msra.mxu2 %v4745_v27  ;;  %2338 = vmatpush.msrb.mxu1 %v4751_v61  ;;  %v4787_v45 = vld [vmem:[#allocation8 + $0x98] sm:$0xff]  ;;  %v4803_v23 = vld [vmem:[#allocation8 + $0x68] sm:$0xff] }
 0x705   :  { %v2083_v3 = vmul.f32 %v3328_v53, %v2082_v32  ;;  %v2118_v34 = vsub.f32 1.0, %v2113_v35  ;;  %v2120_v50 = vmul.f32 %v2113_v35, %v4655_v29  ;;  %2497 = vmatpush.msrb.mxu0 %v4751_v61  ;;  %v1674_v32 = vadd.f32 %v4627_v5, %v4629_v14  ;;  %v4783_v5 = vld [vmem:[#allocation8 + $0xb0] sm:$0xff]  ;;  %v4809_v19 = vld [vmem:[#allocation8 + $0x48] sm:$0xff] }
 0x706   :  { %2339 = vmatpush.msrb.mxu1 %v4759_v2  ;;  %v4811_v35 = vld [vmem:[#allocation8 + $0x50] sm:$0xff] }
 0x707   :  { %v2084_v24 = vadd.f32 %v3328_v53, %v2083_v3  ;;  %2498 = vmatpush.msrb.mxu0 %v4759_v2 }
 0x709   :  { %v2088_v4 = vsel %vm2087_vm12, %v3328_v53, %v2084_v24  ;;  %v4753_v53 = vld [vmem:[#allocation8 + $0xf8] sm:$0xff]  ;;  %v4773_v24 = vld [vmem:[#allocation8 + $0xc0] sm:$0xff] }
 0x70a   :  { %v2093_v15 = vsel %vm2090_vm13, %v2092_v49, %v2088_v4  ;;  %2358 = vmatpush.msra.mxu2 %v4753_v53  ;;  %v4775_v49 = vld [vmem:[#allocation8 + $0xc8] sm:$0xff]  ;;  %2340 = vmatpush.msrb.mxu1 %v4773_v24 }
 0x70b   :  { %v2115_v54 = vmul.f32 %v2093_v15, %v2073_v36  ;;  %v4777_v36 = vld [vmem:[#allocation8 + $0xa8] sm:$0xff]  ;;  %v4785_v15 = vld [vmem:[#allocation8 + $0x90] sm:$0xff]  ;;  %2499 = vmatpush.msrb.mxu0 %v4773_v24 }
 0x70c   :  { %2359 = vmatpush.msra.mxu2 %v4761_v47  ;;  %2341 = vmatpush.msrb.mxu1 %v4777_v36 }
 0x70d   :  { %v2116_v33 = vadd.f32 %v2115_v54, %v1753_v51  ;;  %v4793_v54 = vld [vmem:[#allocation8 + $0x78] sm:$0xff]  ;;  %2500 = vmatpush.msrb.mxu0 %v4777_v36 }
 0x70e   :  { %2360 = vmatpush.msra.mxu2 %v4775_v49  ;;  %2342 = vmatpush.msrb.mxu1 %v4785_v15 }
 0x70f   :  { %3329 = vtanh.f32 %v2116_v33  ;;  %v4801_v33 = vld [vmem:[#allocation8 + $0x60] sm:$0xff]  ;;  %2501 = vmatpush.msrb.mxu0 %v4785_v15 }
 0x710   :  { %2361 = vmatpush.msra.mxu2 %v4783_v5  ;;  %2343 = vmatpush.msrb.mxu1 %v4793_v54 }
 0x711   :  { %2502 = vmatpush.msrb.mxu0 %v4793_v54 }
 0x712   :  { %2362 = vmatpush.msra.mxu2 %v4787_v45  ;;  %2344 = vmatpush.msrb.mxu1 %v4801_v33 }
 0x713   :  { %2503 = vmatpush.msrb.mxu0 %v4801_v33 }
 0x714   :  { %2363 = vmatpush.msra.mxu2 %v4795_v52  ;;  %2345 = vmatpush.msrb.mxu1 %v4809_v19 }
 0x715   :  { %v3330_v37 = vpop.eup %3329  ;;  %2504 = vmatpush.msrb.mxu0 %v4809_v19 }
 0x716   :  { %v2119_v44 = vmul.f32 %v3330_v37, %v2118_v34  ;;  %2364 = vmatpush.msra.mxu2 %v4803_v23  ;;  %v4817_v34 = vld [vmem:[#allocation8 + $0x30] sm:$0xff]  ;;  %v4819_v37 = vld [vmem:[#allocation8 + $0x38] sm:$0xff] }
 0x717   :  { %2346 = vmatpush.msrb.mxu1 %v4817_v34  ;;  %2505 = vmatpush.msrb.mxu0 %v4817_v34 }
 0x718   :  { %v4708_v12 = vadd.f32 %v2120_v50, %v2119_v44  ;;  %2365 = vmatpush.msra.mxu2 %v4811_v35  ;;  %v4825_v50 = vld [vmem:[#allocation8 + $0x18] sm:$0xff] }
 0x719   :  { %2347 = vmatpush.msrb.mxu1 %v4825_v50  ;;  %2506 = vmatpush.msrb.mxu0 %v4825_v50 }
 0x71a   :  { %2190 = vmatmul.f32.vlgmr.msrb.gmra.mxu2 %v4708_v12  ;;  %2210 = vmatmul.f32.vlgmr.msrb.gmra.mxu3 %v4708_v12 }
 0x71b   :  { %2230 = vmatmul.f32.vlgmr.msra.gmra.mxu0 %v4708_v12  ;;  %2651 = vmatpush.msrb.mxu3 %v4713_v8 }
 0x71c   :  { %2366 = vmatpush.msra.mxu2 %v4819_v37 }
 0x71d   :  { %2652 = vmatpush.msrb.mxu3 %v4719_v46 }
 0x71f   :  { %2653 = vmatpush.msrb.mxu3 %v4727_v9 }
 0x721   :  { %2654 = vmatpush.msrb.mxu3 %v4735_v63 }
 0x723   :  { %2655 = vmatpush.msrb.mxu3 %v4743_v59 }
 0x725   :  { %2656 = vmatpush.msrb.mxu3 %v4751_v61 }
 0x727   :  { %2657 = vmatpush.msrb.mxu3 %v4759_v2 }
 0x729   :  { %2658 = vmatpush.msrb.mxu3 %v4773_v24 }
 0x72b   :  { %2659 = vmatpush.msrb.mxu3 %v4777_v36 }
 0x72d   :  { %2660 = vmatpush.msrb.mxu3 %v4785_v15 }
 0x72f   :  { %2661 = vmatpush.msrb.mxu3 %v4793_v54 }
 0x731   :  { %2662 = vmatpush.msrb.mxu3 %v4801_v33 }
 0x733   :  { %2663 = vmatpush.msrb.mxu3 %v4809_v19 }
 0x735   :  { %2664 = vmatpush.msrb.mxu3 %v4817_v34 }
 0x737   :  { %2665 = vmatpush.msrb.mxu3 %v4825_v50 }
 0x798   :  { %v2231_v55 = vpop.f32.mrf.mxu0 }
 0x79d   :  { %v2191_v31 = vpop.f32.mrf.mxu2  ;;  %v2211_v3 = vpop.f32.mrf.mxu3 }
 0x79e   :  { %v2192_v17 = vadd.f32 %v2191_v31, %v4625_v16  ;;  %v2212_v11 = vadd.f32 %v2211_v3, %v4633_v56 }
 0x7a0   :  { %v2234_v10 = vadd.f32 %v2192_v17, %v1674_v32  ;;  %v2254_v4 = vadd.f32 %v2212_v11, %v1715_v60  ;;  %v4827_v32 = vld [vmem:[#allocation8 + $0x20] sm:$0xff]  ;;  %v4837_v11 = vld [vmem:[#allocation8 + $0x8] sm:$0xff] }
 0x7a1   :  { %v4835_v17 = vld [vmem:[#allocation8] sm:$0xff]  ;;  %2367 = vmatpush.msra.mxu2 %v4827_v32 }
 0x7a2   :  { %v3208_v51 = vmul.f32 -1.442695, %v2234_v10  ;;  %v3209_v7 = vmul.f32 -1.442695, %v2254_v4  ;;  %2348 = vmatpush.msrb.mxu1 %v4835_v17  ;;  %2507 = vmatpush.msrb.mxu0 %v4835_v17 }
 0x7a3   :  { %2368 = vmatpush.msra.mxu2 %v4837_v11  ;;  %2666 = vmatpush.msrb.mxu3 %v4835_v17 }
 0x7a4   :  { %3331 = vpow2.f32 %v3208_v51  ;;  %2512 = vmatpush.msra.mxu1 %v4715_v48  ;;  %2671 = vmatpush.msra.mxu0 %v4715_v48 }
 0x7a5   :  { %3333 = vpow2.f32 %v3209_v7 }
 0x7a6   :  { %2513 = vmatpush.msra.mxu1 %v4721_v0  ;;  %2672 = vmatpush.msra.mxu0 %v4721_v0 }
 0x7a8   :  { %2514 = vmatpush.msra.mxu1 %v4729_v28  ;;  %2673 = vmatpush.msra.mxu0 %v4729_v28 }
 0x7aa   :  { %v3332_v44 = vpop.eup %3331  ;;  %2515 = vmatpush.msra.mxu1 %v4737_v62  ;;  %2674 = vmatpush.msra.mxu0 %v4737_v62 }
 0x7ab   :  { %v3334_v31 = vpop.eup %3333  ;;  %v2238_v3 = vadd.f32 1.0, %v3332_v44 }
 0x7ac   :  { %v4833_v60 = vadd.f32 1.0, %v3334_v31  ;;  %2516 = vmatpush.msra.mxu1 %v4745_v27  ;;  %2675 = vmatpush.msra.mxu0 %v4745_v27 }
 0x7ad   :  { %3335 = vrcp.f32 %v2238_v3  ;;  %v2250_v31 = vand.u32 2147483648, %v2238_v3  ;;  %v2248_v1 = vand.u32 2147483647, %v2238_v3  ;;  %vm2244_vm3 = vweird.f32 %v2238_v3 }
 0x7ae   :  { %3337 = vrcp.f32 %v4833_v60  ;;  %2517 = vmatpush.msra.mxu1 %v4753_v53  ;;  %2676 = vmatpush.msra.mxu0 %v4753_v53  ;;  %vm2264_vm7 = vweird.f32 %v4833_v60 }
 0x7af   :  { %vm2249_vm5 = vcmp.eq.f32.partialorder %v2248_v1, 8.507059e+37 }
 0x7b0   :  { %2518 = vmatpush.msra.mxu1 %v4761_v47  ;;  %2677 = vmatpush.msra.mxu0 %v4761_v47 }
 0x7b2   :  { %2519 = vmatpush.msra.mxu1 %v4775_v49  ;;  %2678 = vmatpush.msra.mxu0 %v4775_v49 }
 0x7b3   :  { %v3336_v10 = vpop.eup %3335 }
 0x7b4   :  { %v3338_v4 = vpop.eup %3337  ;;  %v2240_v51 = vmul.f32 %v3336_v10, %v2238_v3  ;;  %vm2245_vm2 = vweird.f32 %v3336_v10  ;;  %v2270_v3 = vand.u32 2147483648, %v4833_v60  ;;  %2520 = vmatpush.msra.mxu1 %v4783_v5  ;;  %2679 = vmatpush.msra.mxu0 %v4783_v5 }
 0x7b5   :  { %v2260_v7 = vmul.f32 %v3338_v4, %v4833_v60  ;;  %vm2246_vm4 = vmor %vm2244_vm3, %vm2245_vm2  ;;  %vm2265_vm6 = vweird.f32 %v3338_v4 }
 0x7b6   :  { %v2241_v44 = vsub.f32 1.0, %v2240_v51  ;;  %v2251_v51 = vor.u32 1.1754944e-38, %v2250_v31  ;;  %vm2266_vm8 = vmor %vm2264_vm7, %vm2265_vm6  ;;  %2521 = vmatpush.msra.mxu1 %v4787_v45  ;;  %2680 = vmatpush.msra.mxu0 %v4787_v45 }
 0x7b7   :  { %v2261_v26 = vsub.f32 1.0, %v2260_v7  ;;  %v2232_v7 = vadd.f32 %v2231_v55, %v4649_v21  ;;  %v2271_v55 = vor.u32 1.1754944e-38, %v2270_v3 }
 0x7b8   :  { %v2242_v22 = vmul.f32 %v3336_v10, %v2241_v44  ;;  %2522 = vmatpush.msra.mxu1 %v4795_v52  ;;  %2681 = vmatpush.msra.mxu0 %v4795_v52 }
 0x7b9   :  { %v2262_v57 = vmul.f32 %v3338_v4, %v2261_v26  ;;  %v1756_v26 = vadd.f32 %v4676_v43, %v4651_v25 }
 0x7ba   :  { %v2243_v39 = vadd.f32 %v3336_v10, %v2242_v22  ;;  %2523 = vmatpush.msra.mxu1 %v4803_v23  ;;  %2682 = vmatpush.msra.mxu0 %v4803_v23 }
 0x7bb   :  { %v2263_v41 = vadd.f32 %v3338_v4, %v2262_v57 }
 0x7bc   :  { %v2247_v29 = vsel %vm2246_vm4, %v3336_v10, %v2243_v39  ;;  %v2268_v39 = vand.u32 2147483647, %v4833_v60  ;;  %2524 = vmatpush.msra.mxu1 %v4811_v35  ;;  %2683 = vmatpush.msra.mxu0 %v4811_v35 }
 0x7bd   :  { %v2252_v44 = vsel %vm2249_vm5, %v2251_v51, %v2247_v29  ;;  %v2267_v29 = vsel %vm2266_vm8, %v3338_v4, %v2263_v41  ;;  %v4957_v51 = vld [vmem:[#allocation8 + $0x88] sm:$0xff] }
 0x7be   :  { %v2274_v22 = vmul.f32 %v2252_v44, %v2232_v7  ;;  %vm2269_vm9 = vcmp.eq.f32.partialorder %v2268_v39, 8.507059e+37  ;;  %2525 = vmatpush.msra.mxu1 %v4819_v37  ;;  %2684 = vmatpush.msra.mxu0 %v4819_v37  ;;  %v4961_v44 = vld [vmem:[#allocation8 + $0x70] sm:$0xff]  ;;  %v4971_v39 = vld [vmem:[#allocation8 + $0x28] sm:$0xff] }
 0x7bf   :  { %v2272_v43 = vsel %vm2269_vm9, %v2271_v55, %v2267_v29  ;;  %v4975_v29 = vld [vmem:[#allocation8 + $0x10] sm:$0xff] }
 0x7c0   :  { %v2275_v1 = vadd.f32 %v2274_v22, %v1756_v26  ;;  %v2277_v57 = vsub.f32 1.0, %v2272_v43  ;;  %v2279_v10 = vmul.f32 %v2272_v43, %v4708_v12  ;;  %2526 = vmatpush.msra.mxu1 %v4827_v32  ;;  %2685 = vmatpush.msra.mxu0 %v4827_v32  ;;  %v4965_v22 = vld [vmem:[#allocation8 + $0x58] sm:$0xff] }
 0x7c2   :  { %3339 = vtanh.f32 %v2275_v1  ;;  %2527 = vmatpush.msra.mxu1 %v4837_v11  ;;  %2686 = vmatpush.msra.mxu0 %v4837_v11 }
 0x7c8   :  { %v3340_v41 = vpop.eup %3339 }
 0x7c9   :  { %v2278_v60 = vmul.f32 %v3340_v41, %v2277_v57 }
 0x7cb   :  { %v4885_v4 = vadd.f32 %v2279_v10, %v2278_v60 }
 0x7cd   :  { %2349 = vmatmul.f32.vlgmr.msrb.gmra.mxu1 %v4885_v4  ;;  %2369 = vmatmul.f32.vlgmr.msra.gmra.mxu2 %v4885_v4 }
 0x7ce   :  { %2389 = vmatmul.f32.vlgmr.msra.gmra.mxu3 %v4885_v4 }
 0x7cf   :  { %2830 = vmatpush.msra.mxu3 %v4715_v48  ;;  %v4911_v48 = vld [vmem:[#allocation8 + $0x178] sm:$0xff] }
 0x7d0   :  { %2532 = vmatpush.msrb.mxu2 %v4911_v48  ;;  %2691 = vmatpush.msrb.mxu1 %v4911_v48 }
 0x7d1   :  { %2831 = vmatpush.msra.mxu3 %v4721_v0  ;;  %v4915_v0 = vld [vmem:[#allocation8 + $0x160] sm:$0xff] }
 0x7d2   :  { %2533 = vmatpush.msrb.mxu2 %v4915_v0  ;;  %2692 = vmatpush.msrb.mxu1 %v4915_v0 }
 0x7d3   :  { %2832 = vmatpush.msra.mxu3 %v4729_v28  ;;  %v4919_v28 = vld [vmem:[#allocation8 + $0x148] sm:$0xff] }
 0x7d4   :  { %2534 = vmatpush.msrb.mxu2 %v4919_v28  ;;  %2693 = vmatpush.msrb.mxu1 %v4919_v28 }
 0x7d5   :  { %2833 = vmatpush.msra.mxu3 %v4737_v62  ;;  %v4923_v62 = vld [vmem:[#allocation8 + $0x130] sm:$0xff] }
 0x7d6   :  { %2535 = vmatpush.msrb.mxu2 %v4923_v62  ;;  %2694 = vmatpush.msrb.mxu1 %v4923_v62 }
 0x7d7   :  { %2834 = vmatpush.msra.mxu3 %v4745_v27  ;;  %v4927_v27 = vld [vmem:[#allocation8 + $0x118] sm:$0xff] }
 0x7d8   :  { %2536 = vmatpush.msrb.mxu2 %v4927_v27  ;;  %2695 = vmatpush.msrb.mxu1 %v4927_v27 }
 0x7d9   :  { %2835 = vmatpush.msra.mxu3 %v4753_v53  ;;  %v4931_v53 = vld [vmem:[#allocation8 + $0x100] sm:$0xff] }
 0x7da   :  { %2537 = vmatpush.msrb.mxu2 %v4931_v53  ;;  %2696 = vmatpush.msrb.mxu1 %v4931_v53 }
 0x7db   :  { %2836 = vmatpush.msra.mxu3 %v4761_v47  ;;  %v4935_v47 = vld [vmem:[#allocation8 + $0xe8] sm:$0xff] }
 0x7dc   :  { %2538 = vmatpush.msrb.mxu2 %v4935_v47  ;;  %2697 = vmatpush.msrb.mxu1 %v4935_v47 }
 0x7dd   :  { %2837 = vmatpush.msra.mxu3 %v4775_v49 }
 0x7df   :  { %2838 = vmatpush.msra.mxu3 %v4783_v5  ;;  %v1677_v5 = vadd.f32 %v4637_v30, %v4629_v14  ;;  %v1718_v30 = vadd.f32 %v4682_v42, %v4635_v6  ;;  %v4968_v42 = vld [vmem:[#allocation8 + $0x40] sm:$0xff] }
 0x7e1   :  { %2839 = vmatpush.msra.mxu3 %v4787_v45 }
 0x7e3   :  { %2840 = vmatpush.msra.mxu3 %v4795_v52  ;;  %v4942_v52 = vld [vmem:[#allocation8 + $0xd0] sm:$0xff] }
 0x7e4   :  { %2539 = vmatpush.msrb.mxu2 %v4942_v52  ;;  %2698 = vmatpush.msrb.mxu1 %v4942_v52 }
 0x7e5   :  { %2841 = vmatpush.msra.mxu3 %v4803_v23 }
 0x7e7   :  { %2842 = vmatpush.msra.mxu3 %v4811_v35  ;;  %v4946_v35 = vld [vmem:[#allocation8 + $0xb8] sm:$0xff] }
 0x7e8   :  { %2540 = vmatpush.msrb.mxu2 %v4946_v35  ;;  %2699 = vmatpush.msrb.mxu1 %v4946_v35 }
 0x7e9   :  { %2843 = vmatpush.msra.mxu3 %v4819_v37 }
 0x7eb   :  { %2844 = vmatpush.msra.mxu3 %v4827_v32  ;;  %v4950_v32 = vld [vmem:[#allocation8 + $0xa0] sm:$0xff] }
 0x7ec   :  { %2541 = vmatpush.msrb.mxu2 %v4950_v32  ;;  %2700 = vmatpush.msrb.mxu1 %v4950_v32 }
 0x7ed   :  { %2845 = vmatpush.msra.mxu3 %v4837_v11 }
 0x7ee   :  { %2542 = vmatpush.msrb.mxu2 %v4957_v51  ;;  %2701 = vmatpush.msrb.mxu1 %v4957_v51 }
 0x7f0   :  { %2543 = vmatpush.msrb.mxu2 %v4961_v44  ;;  %2702 = vmatpush.msrb.mxu1 %v4961_v44 }
 0x7f2   :  { %2544 = vmatpush.msrb.mxu2 %v4965_v22  ;;  %2703 = vmatpush.msrb.mxu1 %v4965_v22 }
 0x7f4   :  { %2545 = vmatpush.msrb.mxu2 %v4968_v42  ;;  %2704 = vmatpush.msrb.mxu1 %v4968_v42 }
 0x7f6   :  { %2546 = vmatpush.msrb.mxu2 %v4971_v39  ;;  %2705 = vmatpush.msrb.mxu1 %v4971_v39 }
 0x7f8   :  { %2547 = vmatpush.msrb.mxu2 %v4975_v29  ;;  %2706 = vmatpush.msrb.mxu1 %v4975_v29 }
 0x7fa   :  { %2810 = vmatpush.msra.mxu2 %v4713_v8 }
 0x7fc   :  { %2811 = vmatpush.msra.mxu2 %v4719_v46 }
 0x7fe   :  { %2812 = vmatpush.msra.mxu2 %v4727_v9 }
 0x800   :  { %2813 = vmatpush.msra.mxu2 %v4735_v63  ;;  %v1759_v63 = vadd.f32 %v4680_v20, %v4651_v25 }
 0x802   :  { %2814 = vmatpush.msra.mxu2 %v4743_v59 }
 0x804   :  { %2815 = vmatpush.msra.mxu2 %v4751_v61 }
 0x806   :  { %2816 = vmatpush.msra.mxu2 %v4759_v2 }
 0x808   :  { %2817 = vmatpush.msra.mxu2 %v4773_v24 }
 0x80a   :  { %2818 = vmatpush.msra.mxu2 %v4777_v36 }
 0x80c   :  { %2819 = vmatpush.msra.mxu2 %v4785_v15 }
 0x80e   :  { %2820 = vmatpush.msra.mxu2 %v4793_v54 }
 0x810   :  { %2821 = vmatpush.msra.mxu2 %v4801_v33  ;;  %v1680_v33 = vadd.f32 %v4641_v40, %v4629_v14 }
 0x812   :  { %2822 = vmatpush.msra.mxu2 %v4809_v19  ;;  %v1721_v19 = vadd.f32 %v4686_v58, %v4635_v6 }
 0x814   :  { %2823 = vmatpush.msra.mxu2 %v4817_v34 }
 0x816   :  { %2824 = vmatpush.msra.mxu2 %v4825_v50 }
 0x818   :  { %2825 = vmatpush.msra.mxu2 %v4835_v17 }
 0x84a   :  { %v2350_v49 = vpop.f32.mrf.mxu1 }
 0x84b   :  { %v2351_v45 = vadd.f32 %v2350_v49, %v4625_v16 }
 0x84d   :  { %v2393_v23 = vadd.f32 %v2351_v45, %v1677_v5 }
 0x84f   :  { %v3210_v37 = vmul.f32 -1.442695, %v2393_v23 }
 0x850   :  { %v2370_v11 = vpop.f32.mrf.mxu2 }
 0x851   :  { %3341 = vpow2.f32 %v3210_v37  ;;  %v2371_v31 = vadd.f32 %v2370_v11, %v4633_v56  ;;  %v2390_v23 = vpop.f32.mrf.mxu3 }
 0x852   :  { %v2391_v9 = vadd.f32 %v2390_v23, %v4649_v21 }
 0x853   :  { %v2413_v7 = vadd.f32 %v2371_v31, %v1718_v30 }
 0x855   :  { %v3211_v26 = vmul.f32 -1.442695, %v2413_v7 }
 0x857   :  { %v3342_v3 = vpop.eup %3341  ;;  %3343 = vpow2.f32 %v3211_v26 }
 0x858   :  { %v2397_v1 = vadd.f32 1.0, %v3342_v3 }
 0x85a   :  { %3345 = vrcp.f32 %v2397_v1  ;;  %v2409_v10 = vand.u32 2147483648, %v2397_v1  ;;  %v2407_v5 = vand.u32 2147483647, %v2397_v1  ;;  %vm2403_vm11 = vweird.f32 %v2397_v1 }
 0x85c   :  { %v2410_v46 = vor.u32 1.1754944e-38, %v2409_v10  ;;  %vm2408_vm13 = vcmp.eq.f32.partialorder %v2407_v5, 8.507059e+37 }
 0x85d   :  { %v3344_v55 = vpop.eup %3343 }
 0x85e   :  { %v2417_v43 = vadd.f32 1.0, %v3344_v55 }
 0x860   :  { %v3346_v57 = vpop.eup %3345  ;;  %3347 = vrcp.f32 %v2417_v43  ;;  %v2429_v7 = vand.u32 2147483648, %v2417_v43  ;;  %v2427_v61 = vand.u32 2147483647, %v2417_v43  ;;  %vm2423_vm15 = vweird.f32 %v2417_v43 }
 0x861   :  { %v2399_v41 = vmul.f32 %v3346_v57, %v2397_v1  ;;  %vm2404_vm10 = vweird.f32 %v3346_v57 }
 0x862   :  { %vm2405_vm12 = vmor %vm2403_vm11, %vm2404_vm10  ;;  %v2430_v55 = vor.u32 1.1754944e-38, %v2429_v7  ;;  %vm2428_vm1 = vcmp.eq.f32.partialorder %v2427_v61, 8.507059e+37 }
 0x863   :  { %v2400_v60 = vsub.f32 1.0, %v2399_v41 }
 0x865   :  { %v2401_v49 = vmul.f32 %v3346_v57, %v2400_v60 }
 0x866   :  { %v3348_v45 = vpop.eup %3347 }
 0x867   :  { %v2419_v8 = vmul.f32 %v3348_v45, %v2417_v43  ;;  %v2402_v37 = vadd.f32 %v3346_v57, %v2401_v49  ;;  %vm2424_vm14 = vweird.f32 %v3348_v45 }
 0x868   :  { %vm2425_vm0 = vmor %vm2423_vm15, %vm2424_vm14 }
 0x869   :  { %v2420_v11 = vsub.f32 1.0, %v2419_v8  ;;  %v2406_v30 = vsel %vm2405_vm12, %v3346_v57, %v2402_v37 }
 0x86a   :  { %v2411_v59 = vsel %vm2408_vm13, %v2410_v46, %v2406_v30 }
 0x86b   :  { %v2421_v31 = vmul.f32 %v3348_v45, %v2420_v11  ;;  %v2433_v26 = vmul.f32 %v2411_v59, %v2391_v9 }
 0x86d   :  { %v2422_v3 = vadd.f32 %v3348_v45, %v2421_v31  ;;  %v2434_v1 = vadd.f32 %v2433_v26, %v1759_v63 }
 0x86f   :  { %v2426_v57 = vsel %vm2425_vm0, %v3348_v45, %v2422_v3  ;;  %3349 = vtanh.f32 %v2434_v1 }
 0x870   :  { %v2431_v20 = vsel %vm2428_vm1, %v2430_v55, %v2426_v57 }
 0x871   :  { %v2436_v2 = vsub.f32 1.0, %v2431_v20  ;;  %v2438_v41 = vmul.f32 %v2431_v20, %v4885_v4  ;;  %v1762_v20 = vadd.f32 %v4684_v18, %v4651_v25 }
 0x875   :  { %v3350_v24 = vpop.eup %3349 }
 0x876   :  { %v2437_v43 = vmul.f32 %v3350_v24, %v2436_v2 }
 0x878   :  { %v4999_v36 = vadd.f32 %v2438_v41, %v2437_v43 }
 0x87a   :  { %2508 = vmatmul.f32.vlgmr.msrb.gmra.mxu0 %v4999_v36  ;;  %2528 = vmatmul.f32.vlgmr.msra.gmra.mxu1 %v4999_v36 }
 0x87b   :  { %2548 = vmatmul.f32.vlgmr.msrb.gmra.mxu2 %v4999_v36  ;;  %2850 = vmatpush.msrb.mxu0 %v4911_v48 }
 0x87d   :  { %2851 = vmatpush.msrb.mxu0 %v4915_v0 }
 0x87f   :  { %2852 = vmatpush.msrb.mxu0 %v4919_v28 }
 0x881   :  { %2853 = vmatpush.msrb.mxu0 %v4923_v62 }
 0x883   :  { %2854 = vmatpush.msrb.mxu0 %v4927_v27 }
 0x885   :  { %2855 = vmatpush.msrb.mxu0 %v4931_v53 }
 0x887   :  { %2856 = vmatpush.msrb.mxu0 %v4935_v47 }
 0x889   :  { %2857 = vmatpush.msrb.mxu0 %v4942_v52 }
 0x88b   :  { %2858 = vmatpush.msrb.mxu0 %v4946_v35 }
 0x88d   :  { %2859 = vmatpush.msrb.mxu0 %v4950_v32 }
 0x88f   :  { %2860 = vmatpush.msrb.mxu0 %v4957_v51 }
 0x891   :  { %2861 = vmatpush.msrb.mxu0 %v4961_v44 }
 0x893   :  { %2862 = vmatpush.msrb.mxu0 %v4965_v22 }
 0x895   :  { %2863 = vmatpush.msrb.mxu0 %v4968_v42 }
 0x897   :  { %2864 = vmatpush.msrb.mxu0 %v4971_v39 }
 0x899   :  { %2865 = vmatpush.msrb.mxu0 %v4975_v29 }
 0x8f7   :  { %v2509_v15 = vpop.f32.mrf.mxu0  ;;  %v2529_v54 = vpop.f32.mrf.mxu1 }
 0x8f8   :  { %v2510_v34 = vadd.f32 %v2509_v15, %v4625_v16  ;;  %v2530_v50 = vadd.f32 %v2529_v54, %v4633_v56 }
 0x8fa   :  { %v2552_v17 = vadd.f32 %v2510_v34, %v1680_v33  ;;  %v2572_v60 = vadd.f32 %v2530_v50, %v1721_v19 }
 0x8fc   :  { %v3212_v10 = vmul.f32 -1.442695, %v2552_v17  ;;  %v3213_v49 = vmul.f32 -1.442695, %v2572_v60 }
 0x8fe   :  { %3351 = vpow2.f32 %v3212_v10  ;;  %v2549_v7 = vpop.f32.mrf.mxu2  ;;  %v3093_v10 = vld [vmem:[#allocation9 + $0x40] sm:$0xff] }
 0x8ff   :  { %3353 = vpow2.f32 %v3213_v49  ;;  %v2550_v3 = vadd.f32 %v2549_v7, %v4649_v21 }
 0x904   :  { %v3352_v5 = vpop.eup %3351 }
 0x905   :  { %v3354_v45 = vpop.eup %3353  ;;  %v2556_v23 = vadd.f32 1.0, %v3352_v5  ;;  %v3092_v5 = vld [vmem:[#allocation9 + $0x38] sm:$0xff] }
 0x906   :  { %v2576_v8 = vadd.f32 1.0, %v3354_v45 }
 0x907   :  { %3355 = vrcp.f32 %v2556_v23  ;;  %v2568_v30 = vand.u32 2147483648, %v2556_v23  ;;  %v2566_v59 = vand.u32 2147483647, %v2556_v23  ;;  %vm2562_vm3 = vweird.f32 %v2556_v23 }
 0x908   :  { %3357 = vrcp.f32 %v2576_v8  ;;  %v2588_v2 = vand.u32 2147483648, %v2576_v8  ;;  %vm2582_vm7 = vweird.f32 %v2576_v8  ;;  %v2586_v43 = vand.u32 2147483647, %v2576_v8 }
 0x909   :  { %v2569_v61 = vor.u32 1.1754944e-38, %v2568_v30  ;;  %vm2567_vm5 = vcmp.eq.f32.partialorder %v2566_v59, 8.507059e+37  ;;  %v3085_v59 = vld [vmem:[#allocation9] sm:$0xff] }
 0x90a   :  { %v2589_v54 = vor.u32 1.1754944e-38, %v2588_v2  ;;  %vm2587_vm9 = vcmp.eq.f32.partialorder %v2586_v43, 8.507059e+37 }
 0x90d   :  { %v3356_v40 = vpop.eup %3355 }
 0x90e   :  { %v3358_v37 = vpop.eup %3357  ;;  %v2558_v46 = vmul.f32 %v3356_v40, %v2556_v23  ;;  %vm2563_vm2 = vweird.f32 %v3356_v40  ;;  %v3090_v23 = vld [vmem:[#allocation9 + $0x28] sm:$0xff] }
 0x90f   :  { %v2578_v58 = vmul.f32 %v3358_v37, %v2576_v8  ;;  %vm2564_vm4 = vmor %vm2562_vm3, %vm2563_vm2  ;;  %vm2583_vm6 = vweird.f32 %v3358_v37 }
 0x910   :  { %v2559_v11 = vsub.f32 1.0, %v2558_v46  ;;  %vm2584_vm8 = vmor %vm2582_vm7, %vm2583_vm6  ;;  %v3088_v46 = vld [vmem:[#allocation9 + $0x18] sm:$0xff] }
 0x911   :  { %v2579_v9 = vsub.f32 1.0, %v2578_v58  ;;  %v3087_v58 = vld [vmem:[#allocation9 + $0x10] sm:$0xff] }
 0x912   :  { %v2560_v63 = vmul.f32 %v3356_v40, %v2559_v11 }
 0x913   :  { %v2580_v31 = vmul.f32 %v3358_v37, %v2579_v9  ;;  %v3086_v9 = vld [vmem:[#allocation9 + $0x8] sm:$0xff] }
 0x914   :  { %v2561_v26 = vadd.f32 %v3356_v40, %v2560_v63 }
 0x915   :  { %v2581_v57 = vadd.f32 %v3358_v37, %v2580_v31 }
 0x916   :  { %v2565_v1 = vsel %vm2564_vm4, %v3356_v40, %v2561_v26  ;;  %v3089_v40 = vld [vmem:[#allocation9 + $0x20] sm:$0xff] }
 0x917   :  { %v2570_v55 = vsel %vm2567_vm5, %v2569_v61, %v2565_v1  ;;  %v2585_v15 = vsel %vm2584_vm8, %v3358_v37, %v2581_v57 }
 0x918   :  { %v2592_v24 = vmul.f32 %v2570_v55, %v2550_v3  ;;  %v2590_v33 = vsel %vm2587_vm9, %v2589_v54, %v2585_v15  ;;  %v5196_v15 = vld [vmem:[#allocation23_spill] sm:$0xff] }
 0x919   :  { %v2595_v19 = vsub.f32 1.0, %v2590_v33  ;;  %v2597_v17 = vmul.f32 %v2590_v33, %v4999_v36  ;;  %v1765_v54 = vadd.f32 %v5196_v15, %v4651_v25 }
 0x91a   :  { %v2593_v41 = vadd.f32 %v2592_v24, %v1762_v20 }
 0x91c   :  { %3359 = vtanh.f32 %v2593_v41 }
 0x922   :  { %v3360_v34 = vpop.eup %3359 }
 0x923   :  { %v2596_v50 = vmul.f32 %v3360_v34, %v2595_v19 }
 0x925   :  { %v5032_v60 = vadd.f32 %v2597_v17, %v2596_v50 }
 0x927   :  { %2667 = vmatmul.f32.vlgmr.msrb.gmra.mxu3 %v5032_v60  ;;  %2687 = vmatmul.f32.vlgmr.msra.gmra.mxu0 %v5032_v60 }
 0x928   :  { %2707 = vmatmul.f32.vlgmr.msrb.gmra.mxu1 %v5032_v60  ;;  %3009 = vmatpush.msrb.mxu3 %v4911_v48  ;;  %v1724_v48 = vadd.f32 %v4690_v38, %v4635_v6 }
 0x92a   :  { %3010 = vmatpush.msrb.mxu3 %v4915_v0 }
 0x92c   :  { %3011 = vmatpush.msrb.mxu3 %v4919_v28  ;;  %v3100_v28 = vld [vmem:[#allocation9 + $0x78] sm:$0xff] }
 0x92d   :  { %3105 = vmatpush.msra.mxu0 %v3100_v28 }
 0x92e   :  { %3012 = vmatpush.msrb.mxu3 %v4923_v62 }
 0x930   :  { %3013 = vmatpush.msrb.mxu3 %v4927_v27  ;;  %v3099_v27 = vld [vmem:[#allocation9 + $0x70] sm:$0xff] }
 0x931   :  { %3106 = vmatpush.msra.mxu0 %v3099_v27 }
 0x932   :  { %3014 = vmatpush.msrb.mxu3 %v4931_v53 }
 0x934   :  { %3015 = vmatpush.msrb.mxu3 %v4935_v47  ;;  %v3098_v47 = vld [vmem:[#allocation9 + $0x68] sm:$0xff] }
 0x935   :  { %3107 = vmatpush.msra.mxu0 %v3098_v47  ;;  %v5197_v47 = vld [vmem:[#allocation14_spill] sm:$0xff] }
 0x936   :  { %3016 = vmatpush.msrb.mxu3 %v4942_v52 }
 0x938   :  { %3017 = vmatpush.msrb.mxu3 %v4946_v35  ;;  %v1683_v35 = vadd.f32 %v4643_v13, %v4629_v14  ;;  %v3091_v13 = vld [vmem:[#allocation9 + $0x30] sm:$0xff] }
 0x93a   :  { %3018 = vmatpush.msrb.mxu3 %v4950_v32 }
 0x93c   :  { %3019 = vmatpush.msrb.mxu3 %v4957_v51  ;;  %v3097_v51 = vld [vmem:[#allocation9 + $0x60] sm:$0xff] }
 0x93d   :  { %3108 = vmatpush.msra.mxu0 %v3097_v51  ;;  %v2964_v51 = vld [vmem:[#allocation8 + $0x158] sm:$0xff] }
 0x93e   :  { %3020 = vmatpush.msrb.mxu3 %v4961_v44  ;;  %v3096_v44 = vld [vmem:[#allocation9 + $0x58] sm:$0xff] }
 0x93f   :  { %3109 = vmatpush.msra.mxu0 %v3096_v44  ;;  %v2960_v44 = vld [vmem:[#allocation8 + $0x138] sm:$0xff] }
 0x940   :  { %3021 = vmatpush.msrb.mxu3 %v4965_v22  ;;  %v3095_v22 = vld [vmem:[#allocation9 + $0x50] sm:$0xff] }
 0x941   :  { %3110 = vmatpush.msra.mxu0 %v3095_v22  ;;  %v2955_v22 = vld [vmem:[#allocation8 + $0x110] sm:$0xff] }
 0x942   :  { %3022 = vmatpush.msrb.mxu3 %v4968_v42 }
 0x944   :  { %3023 = vmatpush.msrb.mxu3 %v4971_v39  ;;  %v3094_v39 = vld [vmem:[#allocation9 + $0x48] sm:$0xff] }
 0x945   :  { %3111 = vmatpush.msra.mxu0 %v3094_v39  ;;  %v2952_v39 = vld [vmem:[#allocation8 + $0xf8] sm:$0xff] }
 0x946   :  { %3024 = vmatpush.msrb.mxu3 %v4975_v29 }
 0x947   :  { %3112 = vmatpush.msra.mxu0 %v3093_v10  ;;  %v2949_v10 = vld [vmem:[#allocation8 + $0xe0] sm:$0xff] }
 0x949   :  { %3113 = vmatpush.msra.mxu0 %v3092_v5 }
 0x94b   :  { %3114 = vmatpush.msra.mxu0 %v3091_v13  ;;  %v5079_v13 = vld [vmem:[%s5150_s10] ss:$0 sm:$0xff] }
 0x94d   :  { %3115 = vmatpush.msra.mxu0 %v3090_v23 }
 0x94f   :  { %3116 = vmatpush.msra.mxu0 %v3089_v40 }
 0x951   :  { %3117 = vmatpush.msra.mxu0 %v3088_v46 }
 0x953   :  { %3118 = vmatpush.msra.mxu0 %v3087_v58  ;;  %v2945_v58 = vld [vmem:[#allocation8 + $0xc0] sm:$0xff] }
 0x955   :  { %3119 = vmatpush.msra.mxu0 %v3086_v9  ;;  %v2942_v9 = vld [vmem:[#allocation8 + $0xa8] sm:$0xff] }
 0x957   :  { %3120 = vmatpush.msra.mxu0 %v3085_v59 }
 0x9a4   :  { %v2688_v18 = vpop.f32.mrf.mxu0 }
 0x9a5   :  { %v2689_v0 = vadd.f32 %v2688_v18, %v4633_v56  ;;  %v2708_v55 = vpop.f32.mrf.mxu1 }
 0x9a6   :  { %v2709_v2 = vadd.f32 %v2708_v55, %v4649_v21  ;;  %v2936_v55 = vld [vmem:[#allocation8 + $0x78] sm:$0xff] }
 0x9a7   :  { %v2731_v62 = vadd.f32 %v2689_v0, %v1724_v48 }
 0x9a9   :  { %v3215_v53 = vmul.f32 -1.442695, %v2731_v62 }
 0x9aa   :  { %v2668_v52 = vpop.f32.mrf.mxu3 }
 0x9ab   :  { %3361 = vpow2.f32 %v3215_v53  ;;  %v2669_v32 = vadd.f32 %v2668_v52, %v4625_v16  ;;  %v2966_v52 = vld [vmem:[#allocation8 + $0x168] sm:$0xff] }
 0x9ac   :  { %2969 = vmatpush.msra.mxu1 %v2966_v52 }
 0x9ad   :  { %v2711_v38 = vadd.f32 %v2669_v32, %v1683_v35  ;;  %v2967_v35 = vld [vmem:[#allocation8 + $0x170] sm:$0xff] }
 0x9ae   :  { %2989 = vmatpush.msrb.mxu2 %v2967_v35  ;;  %v2963_v32 = vld [vmem:[#allocation8 + $0x150] sm:$0xff] }
 0x9af   :  { %v3214_v42 = vmul.f32 -1.442695, %v2711_v38  ;;  %2970 = vmatpush.msra.mxu1 %v2963_v32  ;;  %v2961_v38 = vld [vmem:[#allocation8 + $0x140] sm:$0xff] }
 0x9b0   :  { %2990 = vmatpush.msrb.mxu2 %v2964_v51 }
 0x9b1   :  { %v3362_v29 = vpop.eup %3361  ;;  %3363 = vpow2.f32 %v3214_v42  ;;  %2971 = vmatpush.msra.mxu1 %v2960_v44  ;;  %v2951_v42 = vld [vmem:[#allocation8 + $0xf0] sm:$0xff] }
 0x9b2   :  { %v2735_v49 = vadd.f32 1.0, %v3362_v29  ;;  %2991 = vmatpush.msrb.mxu2 %v2961_v38  ;;  %v2948_v29 = vld [vmem:[#allocation8 + $0xd8] sm:$0xff] }
 0x9b4   :  { %3365 = vrcp.f32 %v2735_v49  ;;  %v2747_v33 = vand.u32 2147483648, %v2735_v49  ;;  %vm2741_vm15 = vweird.f32 %v2735_v49  ;;  %v2745_v34 = vand.u32 2147483647, %v2735_v49 }
 0x9b6   :  { %v2748_v18 = vor.u32 1.1754944e-38, %v2747_v33  ;;  %vm2746_vm1 = vcmp.eq.f32.partialorder %v2745_v34, 8.507059e+37  ;;  %v2927_v33 = vld [vmem:[#allocation8 + $0x30] sm:$0xff] }
 0x9b7   :  { %v3364_v45 = vpop.eup %3363 }
 0x9b8   :  { %v2715_v8 = vadd.f32 1.0, %v3364_v45  ;;  %v5198_v45 = vld [vmem:[#allocation20_spill] sm:$0xff] }
 0x9b9   :  { %v1686_v23 = vadd.f32 %v5198_v45, %v4629_v14 }
 0x9ba   :  { %3367 = vrcp.f32 %v2715_v8  ;;  %v3366_v37 = vpop.eup %3365  ;;  %v2727_v26 = vand.u32 2147483648, %v2715_v8  ;;  %v2725_v3 = vand.u32 2147483647, %v2715_v8  ;;  %vm2721_vm11 = vweird.f32 %v2715_v8 }
 0x9bb   :  { %v2737_v11 = vmul.f32 %v3366_v37, %v2735_v49  ;;  %vm2742_vm14 = vweird.f32 %v3366_v37 }
 0x9bc   :  { %v2728_v20 = vor.u32 1.1754944e-38, %v2727_v26  ;;  %vm2726_vm13 = vcmp.eq.f32.partialorder %v2725_v3, 8.507059e+37  ;;  %vm2743_vm0 = vmor %vm2741_vm15, %vm2742_vm14  ;;  %v2939_v3 = vld [vmem:[#allocation8 + $0x90] sm:$0xff] }
 0x9bd   :  { %v2738_v31 = vsub.f32 1.0, %v2737_v11  ;;  %v2946_v11 = vld [vmem:[#allocation8 + $0xc8] sm:$0xff] }
 0x9bf   :  { %v2739_v1 = vmul.f32 %v3366_v37, %v2738_v31 }
 0x9c0   :  { %v3368_v30 = vpop.eup %3367 }
 0x9c1   :  { %v2717_v63 = vmul.f32 %v3368_v30, %v2715_v8  ;;  %vm2722_vm10 = vweird.f32 %v3368_v30  ;;  %v2740_v41 = vadd.f32 %v3366_v37, %v2739_v1  ;;  %v5199_v8 = vld [vmem:[#allocation22_spill] sm:$0xff]  ;;  %v2940_v1 = vld [vmem:[#allocation8 + $0x98] sm:$0xff] }
 0x9c2   :  { %vm2723_vm12 = vmor %vm2721_vm11, %vm2722_vm10  ;;  %v1727_v40 = vadd.f32 %v5199_v8, %v4635_v6 }
 0x9c3   :  { %v2718_v7 = vsub.f32 1.0, %v2717_v63  ;;  %v2744_v17 = vsel %vm2743_vm0, %v3366_v37, %v2740_v41 }
 0x9c4   :  { %v2749_v48 = vsel %vm2746_vm1, %v2748_v18, %v2744_v17  ;;  %v2924_v17 = vld [vmem:[#allocation8 + $0x18] sm:$0xff]  ;;  %v2925_v18 = vld [vmem:[#allocation8 + $0x20] sm:$0xff] }
 0x9c5   :  { %v2719_v61 = vmul.f32 %v3368_v30, %v2718_v7  ;;  %v2754_v0 = vsub.f32 1.0, %v2749_v48  ;;  %v2756_v27 = vmul.f32 %v2749_v48, %v5032_v60 }
 0x9c7   :  { %v2720_v57 = vadd.f32 %v3368_v30, %v2719_v61 }
 0x9c9   :  { %v2724_v24 = vsel %vm2723_vm12, %v3368_v30, %v2720_v57  ;;  %v2943_v30 = vld [vmem:[#allocation8 + $0xb0] sm:$0xff]  ;;  %v2937_v57 = vld [vmem:[#allocation8 + $0x80] sm:$0xff] }
 0x9ca   :  { %v2729_v43 = vsel %vm2726_vm13, %v2728_v20, %v2724_v24  ;;  %v2933_v20 = vld [vmem:[#allocation8 + $0x60] sm:$0xff]  ;;  %v2930_v24 = vld [vmem:[#allocation8 + $0x48] sm:$0xff] }
 0x9cb   :  { %v2751_v19 = vmul.f32 %v2729_v43, %v2709_v2  ;;  %v2934_v2 = vld [vmem:[#allocation8 + $0x68] sm:$0xff]  ;;  %v2931_v43 = vld [vmem:[#allocation8 + $0x50] sm:$0xff] }
 0x9cd   :  { %v2752_v50 = vadd.f32 %v2751_v19, %v1765_v54  ;;  %v2928_v19 = vld [vmem:[#allocation8 + $0x38] sm:$0xff] }
 0x9cf   :  { %3369 = vtanh.f32 %v2752_v50 }
 0x9d5   :  { %v3370_v28 = vpop.eup %3369 }
 0x9d6   :  { %v2755_v62 = vmul.f32 %v3370_v28, %v2754_v0  ;;  %v2921_v0 = vld [vmem:[#allocation8] sm:$0xff]  ;;  %v2922_v28 = vld [vmem:[#allocation8 + $0x8] sm:$0xff] }
 0x9d8   :  { %v5063_v53 = vadd.f32 %v2756_v27, %v2755_v62 }
 0x9da   :  { %2826 = vmatmul.f32.vlgmr.msra.gmra.mxu2 %v5063_v53  ;;  %2846 = vmatmul.f32.vlgmr.msra.gmra.mxu3 %v5063_v53 }
 0x9db   :  { %2866 = vmatmul.f32.vlgmr.msrb.gmra.mxu0 %v5063_v53 }
 0x9e3   :  { %3121 = vmatmul.f32.vlgmr.msra.gmra.mxu0 %v5197_v47 }
 0x9eb   :  { %3124 = vmatmul.f32.gmra.mxu0 %v4708_v12  ;;  %v2957_v12 = vld [vmem:[#allocation8 + $0x120] sm:$0xff] }
 0x9ec   :  { %2972 = vmatpush.msra.mxu1 %v2957_v12 }
 0x9f3   :  { %3127 = vmatmul.f32.gmra.mxu0 %v4885_v4  ;;  %v2958_v4 = vld [vmem:[#allocation8 + $0x128] sm:$0xff] }
 0x9f4   :  { %2992 = vmatpush.msrb.mxu2 %v2958_v4 }
 0x9f6   :  { %2993 = vmatpush.msrb.mxu2 %v2955_v22 }
 0x9f8   :  { %2994 = vmatpush.msrb.mxu2 %v2952_v39 }
 0x9fa   :  { %2995 = vmatpush.msrb.mxu2 %v2949_v10 }
 0x9fb   :  { %3130 = vmatmul.f32.gmra.mxu0 %v4999_v36 }
 0x9fc   :  { %2996 = vmatpush.msrb.mxu2 %v2946_v11 }
 0x9fe   :  { %2997 = vmatpush.msrb.mxu2 %v2943_v30 }
 0xa00   :  { %2998 = vmatpush.msrb.mxu2 %v2940_v1 }
 0xa02   :  { %2999 = vmatpush.msrb.mxu2 %v2937_v57  ;;  %v5201_v57 = vld [vmem:[#allocation16_spill] sm:$0xff] }
 0xa03   :  { %3133 = vmatmul.f32.gmra.mxu0 %v5032_v60  ;;  %v2954_v60 = vld [vmem:[#allocation8 + $0x108] sm:$0xff] }
 0xa04   :  { %2973 = vmatpush.msra.mxu1 %v2954_v60  ;;  %3000 = vmatpush.msrb.mxu2 %v2934_v2 }
 0xa06   :  { %2974 = vmatpush.msra.mxu1 %v2951_v42  ;;  %3001 = vmatpush.msrb.mxu2 %v2931_v43 }
 0xa08   :  { %2975 = vmatpush.msra.mxu1 %v2948_v29  ;;  %3002 = vmatpush.msrb.mxu2 %v2928_v19 }
 0xa0a   :  { %2976 = vmatpush.msra.mxu1 %v2945_v58  ;;  %3003 = vmatpush.msrb.mxu2 %v2925_v18 }
 0xa0b   :  { %3136 = vmatmul.f32.gmra.mxu0 %v5063_v53 }
 0xa0c   :  { %2977 = vmatpush.msra.mxu1 %v2942_v9  ;;  %3004 = vmatpush.msrb.mxu2 %v2922_v28 }
 0xa0e   :  { %2978 = vmatpush.msra.mxu1 %v2939_v3 }
 0xa10   :  { %2979 = vmatpush.msra.mxu1 %v2936_v55 }
 0xa12   :  { %2980 = vmatpush.msra.mxu1 %v2933_v20  ;;  %v1689_v20 = vadd.f32 %v5201_v57, %v4629_v14 }
 0xa14   :  { %2981 = vmatpush.msra.mxu1 %v2930_v24 }
 0xa16   :  { %2982 = vmatpush.msra.mxu1 %v2927_v33 }
 0xa18   :  { %2983 = vmatpush.msra.mxu1 %v2924_v17 }
 0xa1a   :  { %2984 = vmatpush.msra.mxu1 %v2921_v0 }
 0xa58   :  { %v5074_v36 = vpop.f32.mrf.mxu0 }
 0xa59   :  { %v2868_v10 = vadd.f32 %v5074_v36, %v4649_v21 }
 0xa5d   :  { %v2827_v49 = vpop.f32.mrf.mxu2  ;;  %v2847_v5 = vpop.f32.mrf.mxu3 }
 0xa5e   :  { %v2828_v37 = vadd.f32 %v2827_v49, %v4625_v16  ;;  %v2848_v46 = vadd.f32 %v2847_v5, %v4633_v56 }
 0xa60   :  { %v2870_v63 = vadd.f32 %v2828_v37, %v1686_v23  ;;  %v2890_v59 = vadd.f32 %v2848_v46, %v1727_v40  ;;  %v3122_v31 = vpop.f32.mrf.mxu0  ;;  %v5200_v23 = vld [vmem:[#allocation18_spill] sm:$0xff] }
 0xa61   :  { %v3123_v7 = vadd.f32 %v5079_v13, %v3122_v31  ;;  %v1768_v8 = vadd.f32 %v5200_v23, %v4651_v25 }
 0xa62   :  { %v3216_v26 = vmul.f32 -1.442695, %v2870_v63  ;;  %v3217_v61 = vmul.f32 -1.442695, %v2890_v59 }
 0xa63   :  { %3146 = vst [vmem:[%s5151_s11] sm:$0xff] %v3123_v7 }
 0xa64   :  { %3371 = vpow2.f32 %v3216_v26 }
 0xa65   :  { %3373 = vpow2.f32 %v3217_v61 }
 0xa68   :  { %v3125_v41 = vpop.f32.mrf.mxu0 }
 0xa69   :  { %v3126_v15 = vadd.f32 %v5079_v13, %v3125_v41 }
 0xa6a   :  { %v3372_v54 = vpop.eup %3371 }
 0xa6b   :  { %v3374_v34 = vpop.eup %3373  ;;  %v2874_v50 = vadd.f32 1.0, %v3372_v54  ;;  %3147 = vst [vmem:[%s5151_s11 + $0x8] sm:$0xff] %v3126_v15  ;;  %v5202_v54 = vld [vmem:[#allocation15_spill] sm:$0xff] }
 0xa6c   :  { %v2894_v48 = vadd.f32 1.0, %v3374_v34  ;;  %v1730_v33 = vadd.f32 %v5202_v54, %v4635_v6 }
 0xa6d   :  { %3375 = vrcp.f32 %v2874_v50  ;;  %v2886_v44 = vand.u32 2147483648, %v2874_v50  ;;  %v2884_v4 = vand.u32 2147483647, %v2874_v50  ;;  %vm2880_vm3 = vweird.f32 %v2874_v50 }
 0xa6e   :  { %3377 = vrcp.f32 %v2894_v48  ;;  %v2906_v37 = vand.u32 2147483648, %v2894_v48  ;;  %vm2900_vm7 = vweird.f32 %v2894_v48  ;;  %v2904_v46 = vand.u32 2147483647, %v2894_v48 }
 0xa6f   :  { %v2887_v29 = vor.u32 1.1754944e-38, %v2886_v44  ;;  %vm2885_vm5 = vcmp.eq.f32.partialorder %v2884_v4, 8.507059e+37 }
 0xa70   :  { %v3128_v62 = vpop.f32.mrf.mxu0  ;;  %v2907_v63 = vor.u32 1.1754944e-38, %v2906_v37  ;;  %vm2905_vm9 = vcmp.eq.f32.partialorder %v2904_v46, 8.507059e+37 }
 0xa71   :  { %v3129_v27 = vadd.f32 %v5079_v13, %v3128_v62 }
 0xa73   :  { %v3376_v47 = vpop.eup %3375  ;;  %3148 = vst [vmem:[%s5151_s11 + $0x10] sm:$0xff] %v3129_v27 }
 0xa74   :  { %v3378_v52 = vpop.eup %3377  ;;  %v2876_v35 = vmul.f32 %v3376_v47, %v2874_v50  ;;  %vm2881_vm2 = vweird.f32 %v3376_v47 }
 0xa75   :  { %v2896_v32 = vmul.f32 %v3378_v52, %v2894_v48  ;;  %vm2882_vm4 = vmor %vm2880_vm3, %vm2881_vm2  ;;  %vm2901_vm6 = vweird.f32 %v3378_v52 }
 0xa76   :  { %v2877_v51 = vsub.f32 1.0, %v2876_v35  ;;  %vm2902_vm8 = vmor %vm2900_vm7, %vm2901_vm6 }
 0xa77   :  { %v2897_v38 = vsub.f32 1.0, %v2896_v32 }
 0xa78   :  { %v2878_v12 = vmul.f32 %v3376_v47, %v2877_v51  ;;  %v3131_v60 = vpop.f32.mrf.mxu0 }
 0xa79   :  { %v2898_v22 = vmul.f32 %v3378_v52, %v2897_v38  ;;  %v3132_v42 = vadd.f32 %v5079_v13, %v3131_v60 }
 0xa7a   :  { %v2879_v39 = vadd.f32 %v3376_v47, %v2878_v12  ;;  %v5203_v12 = vld [vmem:[#allocation26_spill] sm:$0xff] }
 0xa7b   :  { %3149 = vst [vmem:[%s5151_s11 + $0x18] sm:$0xff] %v3132_v42  ;;  %v2899_v45 = vadd.f32 %v3378_v52, %v2898_v22  ;;  %v1771_v4 = vadd.f32 %v5203_v12, %v4651_v25 }
 0xa7c   :  { %v2883_v49 = vsel %vm2882_vm4, %v3376_v47, %v2879_v39 }
 0xa7d   :  { %v2888_v5 = vsel %vm2885_vm5, %v2887_v29, %v2883_v49  ;;  %v2903_v30 = vsel %vm2902_vm8, %v3378_v52, %v2899_v45 }
 0xa7e   :  { %v2910_v40 = vmul.f32 %v2888_v5, %v2868_v10  ;;  %v2908_v36 = vsel %vm2905_vm9, %v2907_v63, %v2903_v30 }
 0xa7f   :  { %v2913_v59 = vsub.f32 1.0, %v2908_v36  ;;  %v2915_v3 = vmul.f32 %v2908_v36, %v5063_v53 }
 0xa80   :  { %v3134_v58 = vpop.f32.mrf.mxu0  ;;  %v2911_v11 = vadd.f32 %v2910_v40, %v1768_v8 }
 0xa81   :  { %v3135_v9 = vadd.f32 %v5079_v13, %v3134_v58 }
 0xa82   :  { %3379 = vtanh.f32 %v2911_v11 }
 0xa83   :  { %3150 = vst [vmem:[%s5151_s11 + $0x20] sm:$0xff] %v3135_v9 }
 0xa88   :  { %v3380_v31 = vpop.eup %3379  ;;  %v3137_v7 = vpop.f32.mrf.mxu0 }
 0xa89   :  { %v3138_v26 = vadd.f32 %v5079_v13, %v3137_v7  ;;  %v2914_v61 = vmul.f32 %v3380_v31, %v2913_v59 }
 0xa8b   :  { %3151 = vst [vmem:[%s5151_s11 + $0x28] sm:$0xff] %v3138_v26  ;;  %v5116_v1 = vadd.f32 %v2915_v3, %v2914_v61 }
 0xa8d   :  { %2985 = vmatmul.f32.vlgmr.msra.gmra.mxu1 %v5116_v1  ;;  %3005 = vmatmul.f32.vlgmr.msrb.gmra.mxu2 %v5116_v1 }
 0xa8e   :  { %3025 = vmatmul.f32.vlgmr.msrb.gmra.mxu3 %v5116_v1  ;;  %3139 = vmatmul.f32.gmra.mxu0 %v5116_v1 }
 0xb0a   :  { %v2986_v55 = vpop.f32.mrf.mxu1 }
 0xb0b   :  { %v2987_v53 = vadd.f32 %v2986_v55, %v4625_v16  ;;  %v3140_v2 = vpop.f32.mrf.mxu0 }
 0xb0c   :  { %v3141_v24 = vadd.f32 %v5079_v13, %v3140_v2 }
 0xb0d   :  { %v3029_v43 = vadd.f32 %v2987_v53, %v1689_v20 }
 0xb0e   :  { %3152 = vst [vmem:[%s5151_s11 + $0x30] sm:$0xff] %v3141_v24 }
 0xb0f   :  { %v3218_v41 = vmul.f32 -1.442695, %v3029_v43 }
 0xb10   :  { %v3006_v15 = vpop.f32.mrf.mxu2 }
 0xb11   :  { %3381 = vpow2.f32 %v3218_v41  ;;  %v3007_v19 = vadd.f32 %v3006_v15, %v4633_v56  ;;  %v3026_v52 = vpop.f32.mrf.mxu3 }
 0xb12   :  { %v3027_v51 = vadd.f32 %v3026_v52, %v4649_v21 }
 0xb13   :  { %v3049_v34 = vadd.f32 %v3007_v19, %v1730_v33 }
 0xb15   :  { %v3219_v14 = vmul.f32 -1.442695, %v3049_v34 }
 0xb17   :  { %v3382_v50 = vpop.eup %3381  ;;  %3383 = vpow2.f32 %v3219_v14 }
 0xb18   :  { %v3033_v16 = vadd.f32 1.0, %v3382_v50 }
 0xb1a   :  { %3385 = vrcp.f32 %v3033_v16  ;;  %v3045_v62 = vand.u32 2147483648, %v3033_v16  ;;  %v3043_v47 = vand.u32 2147483647, %v3033_v16  ;;  %vm3039_vm11 = vweird.f32 %v3033_v16 }
 0xb1c   :  { %v3046_v32 = vor.u32 1.1754944e-38, %v3045_v62  ;;  %vm3044_vm13 = vcmp.eq.f32.partialorder %v3043_v47, 8.507059e+37 }
 0xb1d   :  { %v3384_v17 = vpop.eup %3383 }
 0xb1e   :  { %v3053_v18 = vadd.f32 1.0, %v3384_v17 }
 0xb20   :  { %v3386_v48 = vpop.eup %3385  ;;  %3387 = vrcp.f32 %v3053_v18  ;;  %v3065_v39 = vand.u32 2147483648, %v3053_v18  ;;  %v3063_v29 = vand.u32 2147483647, %v3053_v18  ;;  %vm3059_vm15 = vweird.f32 %v3053_v18 }
 0xb21   :  { %v3035_v0 = vmul.f32 %v3386_v48, %v3033_v16  ;;  %vm3040_vm10 = vweird.f32 %v3386_v48 }
 0xb22   :  { %vm3041_vm12 = vmor %vm3039_vm11, %vm3040_vm10  ;;  %v3066_v45 = vor.u32 1.1754944e-38, %v3065_v39  ;;  %vm3064_vm1 = vcmp.eq.f32.partialorder %v3063_v29, 8.507059e+37 }
 0xb23   :  { %v3036_v28 = vsub.f32 1.0, %v3035_v0 }
 0xb25   :  { %v3037_v27 = vmul.f32 %v3386_v48, %v3036_v28 }
 0xb26   :  { %v3388_v6 = vpop.eup %3387 }
 0xb27   :  { %v3055_v35 = vmul.f32 %v3388_v6, %v3053_v18  ;;  %v3038_v56 = vadd.f32 %v3386_v48, %v3037_v27  ;;  %vm3060_vm14 = vweird.f32 %v3388_v6 }
 0xb28   :  { %vm3061_vm0 = vmor %vm3059_vm15, %vm3060_vm14 }
 0xb29   :  { %v3042_v44 = vsel %vm3041_vm12, %v3386_v48, %v3038_v56  ;;  %v3056_v38 = vsub.f32 1.0, %v3055_v35 }
 0xb2a   :  { %v3047_v60 = vsel %vm3044_vm13, %v3046_v32, %v3042_v44 }
 0xb2b   :  { %v3069_v22 = vmul.f32 %v3047_v60, %v3027_v51  ;;  %v3057_v42 = vmul.f32 %v3388_v6, %v3056_v38 }
 0xb2d   :  { %v3070_v10 = vadd.f32 %v3069_v22, %v1771_v4  ;;  %v3058_v49 = vadd.f32 %v3388_v6, %v3057_v42 }
 0xb2f   :  { %3389 = vtanh.f32 %v3070_v10  ;;  %v3062_v5 = vsel %vm3061_vm0, %v3388_v6, %v3058_v49 }
 0xb30   :  { %v3067_v21 = vsel %vm3064_vm1, %v3066_v45, %v3062_v5 }
 0xb31   :  { %v3072_v23 = vsub.f32 1.0, %v3067_v21  ;;  %v3074_v25 = vmul.f32 %v3067_v21, %v5116_v1 }
 0xb35   :  { %v3390_v8 = vpop.eup %3389 }
 0xb36   :  { %v3073_v40 = vmul.f32 %v3390_v8, %v3072_v23 }
 0xb38   :  { %v3075_v37 = vadd.f32 %v3074_v25, %v3073_v40 }
 0xb3a   :  { %3142 = vmatmul.f32.gmra.mxu0 %v3075_v37 }
 0xbb7   :  { %v3143_v46 = vpop.f32.mrf.mxu0 }
 0xbb8   :  { %v3144_v58 = vadd.f32 %v5079_v13, %v3143_v46 }
 0xbba   :  { %3153 = vst [vmem:[%s5151_s11 + $0x38] sm:$0xff] %v3144_v58 }
 0xbbb   :  { %3158 = vsyncpa [#allocation5], 1 }
 0xbbc   :  { %3159 = vsyncpa [#allocation7], 1 }
 0xbbd   :  { %3160 = vsyncpa [#allocation10], 1 }

</bundles_post_ra>
